<compile_context>
chip_gen: v7x
topology: tpu7x:2x2x1
jax: 0.10.0
libtpu: 0.0.40
codegen_flags: <defaults>
</compile_context>

<pallas_src>
import functools

import jax
import jax.numpy as jnp
import numpy as np
from jax.experimental import pallas as pl
from jax.experimental.pallas import tpu as pltpu


# ------------------------------ fused kernel -------------------------------- #

def _fused_patch_embed_kernel(
    x_ref, s1_ref, s2_ref, r1_ref, r2_ref, m1_ref, m2_ref, o_ref,
    *, Cin, C1, C2, W0, W1, n0, n1, n2, off1, off2):
  """One grid step = one image through all six layers, entirely in VMEM.

  Layout: activations are channels-major (C, H*W) so vector lanes carry
  spatial positions (lane-dense), not the 1..48 channels.

  x_ref : (1, Cin, n0)   flattened NCHW input for this image
  s1_ref: (C1, *)        stage-1 weight slab [w1a | w1b | wd1 | b1a b1b bd1]
  s2_ref: (C2, *)        stage-2 weight slab [w2a | w2b | wd2 | b2a b2b bd2]
  r1_ref: (4*n0, n1)     0/1 phase-selection matrices for downlayer1
  r2_ref: (4*n1, n2)     0/1 phase-selection matrices for downlayer2
  m1_ref: (2, n0)        column-border masks (dx=-1 / dx=+1), 16-wide grid
  m2_ref: (2, n1)        column-border masks, 8-wide grid
  o_ref : (1, C2, n2)    output, already in NCHW order
  """
  f32 = jnp.float32

  def conv3x3(x, w9, b, mneg, mpos, wgrid, n, cin, single_matmul):
    # x: (cin, n) flat row-major spatial (grid width wgrid); w9: (cout, 9*cin)
    # Zero padding = one zero row on each side + border masks on dx=+-1 taps;
    # each tap is a static shifted lane slice of the flat padded buffer.
    pad = wgrid + 1
    z = jnp.zeros((cin, pad), f32)
    xf = jnp.concatenate([z, x, z], axis=1)              # (cin, n + 2*wgrid + 2)
    taps = []
    for dy in (-1, 0, 1):
      for dx in (-1, 0, 1):
        s = pad + dy * wgrid + dx
        tap = xf[:, s:s + n]                             # (cin, n)
        if dx == -1:
          tap = tap * mneg
        elif dx == 1:
          tap = tap * mpos
        taps.append(tap)
    if single_matmul:
      # ONE im2col MXU matmul (used when 9*cin rows are sublane-aligned).
      patches = jnp.concatenate(taps, axis=0)            # (9*cin, n)
      acc = jnp.dot(w9, patches, preferred_element_type=f32) + b
    else:
      acc = b                                            # (cout, 1) broadcasts
      for t, tap in enumerate(taps):
        wt = w9[:, t * cin:(t + 1) * cin]                # (cout, cin)
        if cin == 1:                                     # stage-1: pure VPU MAC
          acc = acc + wt * tap
        else:
          acc = acc + jnp.dot(wt, tap, preferred_element_type=f32)
    return jnp.maximum(acc, 0.0)                         # ReLU

  def down2x2(x, r_ref, wd, b, n_in, n_out, cin, single_matmul):
    # 2x2 / stride-2 conv: each phase extraction is a dense matmul with a 0/1
    # selection matrix (no strided reads), then one channel-mixing matmul.
    if single_matmul:
      gs = [jnp.dot(x, r_ref[k * n_in:(k + 1) * n_in, :],
                    preferred_element_type=f32) for k in range(4)]
      p = jnp.concatenate(gs, axis=0)                    # (4*cin, n_out)
      return jnp.dot(wd, p, preferred_element_type=f32) + b   # one dot
    acc = b
    for k in range(4):
      g = jnp.dot(x, r_ref[k * n_in:(k + 1) * n_in, :],
                  preferred_element_type=f32)            # (cin, n_out)
      acc = acc + jnp.dot(wd[:, k * cin:(k + 1) * cin], g,
                          preferred_element_type=f32)
    return acc

  # ---- unpack the two weight slabs (static column slices, no extra DMAs) ---
  a0, a1, a2, _ = off1
  w1a = s1_ref[:, 0:a0]
  w1b = s1_ref[:, a0:a1]
  wd1 = s1_ref[:, a1:a2]
  b1a = s1_ref[:, a2:a2 + 1]
  b1b = s1_ref[:, a2 + 1:a2 + 2]
  bd1 = s1_ref[:, a2 + 2:a2 + 3]
  c0, c1, c2, _ = off2
  w2a = s2_ref[:, 0:c0]
  w2b = s2_ref[:, c0:c1]
  wd2 = s2_ref[:, c1:c2]
  b2a = s2_ref[:, c2:c2 + 1]
  b2b = s2_ref[:, c2 + 1:c2 + 2]
  bd2 = s2_ref[:, c2 + 2:c2 + 3]

  m1neg = m1_ref[0:1, :]
  m1pos = m1_ref[1:2, :]
  m2neg = m2_ref[0:1, :]
  m2pos = m2_ref[1:2, :]

  x0 = x_ref[0].astype(f32)                              # (Cin, n0)

  # ---- convlayer1: DoubleConv(Cin -> C1), full resolution (VPU MACs) -------
  x1a = conv3x3(x0, w1a, b1a, m1neg, m1pos, W0, n0, Cin, single_matmul=False)
  x1b = conv3x3(x1a, w1b, b1b, m1neg, m1pos, W0, n0, C1, single_matmul=False)

  # ---- downlayer1: 2x2 conv, stride 2 (C1 -> C1) ----------------------------
  y1 = down2x2(x1b, r1_ref, wd1, bd1, n0, n1, C1, single_matmul=False)

  # ---- convlayer2: DoubleConv(C1 -> C2), half resolution --------------------
  x2a = conv3x3(y1, w2a, b2a, m2neg, m2pos, W1, n1, C1, single_matmul=False)
  x2b = conv3x3(x2a, w2b, b2b, m2neg, m2pos, W1, n1, C2, single_matmul=True)
  # ^ the only non-trivial FLOPs: one (C2, 9*C2) @ (9*C2, n1) MXU matmul.

  # ---- downlayer2: 2x2 conv, stride 2 (C2 -> C2): one dot + one store -------
  out = down2x2(x2b, r2_ref, wd2, bd2, n1, n2, C2, single_matmul=True)
  o_ref[0] = out.astype(o_ref.dtype)                     # NCHW order already


# --------------------------- host-side constant prep ------------------------ #

def _conv_w_cm(w):
  """(Cout, Cin, kh, kw) -> (Cout, kh*kw*Cin), tap-major columns."""
  cout, cin, kh, kw = w.shape
  return jnp.transpose(w, (0, 2, 3, 1)).reshape(cout, kh * kw * cin)


def _make_phase_selectors(h_in, w_in):
  """0/1 matrices turning a flat (C, h_in*w_in) map into its four 2x2/stride-2
  phases via matmul; phase k occupies rows [k*n_in, (k+1)*n_in)."""
  h_out, w_out = h_in // 2, w_in // 2
  n_in, n_out = h_in * w_in, h_out * w_out
  r = np.zeros((4, n_in, n_out), np.float32)
  for ky in range(2):
    for kx in range(2):
      k = ky * 2 + kx
      for ho in range(h_out):
        for wo in range(w_out):
          r[k, (2 * ho + ky) * w_in + (2 * wo + kx), ho * w_out + wo] = 1.0
  return jnp.asarray(r.reshape(4 * n_in, n_out))


def _make_border_masks(h, w):
  """Row 0: mask for the dx=-1 taps, row 1: dx=+1 taps (flat row-major grid)."""
  col = np.arange(h * w) % w
  return jnp.asarray(np.stack([(col != 0), (col != w - 1)]).astype(np.float32))


# --------------------------- ConvPatchEmbed forward -------------------------- #

def conv_patch_embed_forward(x_nchw, params, patch_size=4):
  """Forward pass matching the PyTorch ConvPatchEmbed (norm_layer=None)."""
  assert patch_size == 4, "kernel specialized to patch_size=4 (two 2x2/s2 downs)"
  B, Cin, H, W = x_nchw.shape
  if W % patch_size:
    x_nchw = jnp.pad(x_nchw, ((0, 0), (0, 0), (0, 0),
                              (0, patch_size - W % patch_size)))
  if H % patch_size:
    x_nchw = jnp.pad(x_nchw, ((0, 0), (0, 0),
                              (0, patch_size - H % patch_size), (0, 0)))
  B, Cin, H, W = x_nchw.shape
  C1 = params["c1a_w"].shape[0]
  C2 = params["d2_w"].shape[0]
  H1, W1 = H // 2, W // 2
  H2, W2 = H1 // 2, W1 // 2
  n0, n1, n2 = H * W, H1 * W1, H2 * W2
  f32 = jnp.float32

  # Stage-1 weight slab: [w1a | w1b | wd1 | b1a b1b bd1]  (C1, 9Cin+9C1+4C1+3)
  slab1 = jnp.concatenate(
      [_conv_w_cm(params["c1a_w"]), _conv_w_cm(params["c1b_w"]),
       _conv_w_cm(params["d1_w"]),
       params["c1a_b"].reshape(C1, 1), params["c1b_b"].reshape(C1, 1),
       params["d1_b"].reshape(C1, 1)], axis=1).astype(f32)
  off1 = (9 * Cin, 9 * Cin + 9 * C1, 9 * Cin + 9 * C1 + 4 * C1,
          9 * Cin + 9 * C1 + 4 * C1 + 3)

  # Stage-2 weight slab: [w2a | w2b | wd2 | b2a b2b bd2]  (C2, 9C1+9C2+4C2+3)
  slab2 = jnp.concatenate(
      [_conv_w_cm(params["c2a_w"]), _conv_w_cm(params["c2b_w"]),
       _conv_w_cm(params["d2_w"]),
       params["c2a_b"].reshape(C2, 1), params["c2b_b"].reshape(C2, 1),
       params["d2_b"].reshape(C2, 1)], axis=1).astype(f32)
  off2 = (9 * C1, 9 * C1 + 9 * C2, 9 * C1 + 9 * C2 + 4 * C2,
          9 * C1 + 9 * C2 + 4 * C2 + 3)

  r1 = _make_phase_selectors(H, W)      # (4*n0, n1)
  r2 = _make_phase_selectors(H1, W1)    # (4*n1, n2)
  m1 = _make_border_masks(H, W)         # (2, n0)
  m2 = _make_border_masks(H1, W1)       # (2, n1)

  # Channels-major, lane-dense input layout: (B, Cin, H*W) -- a free reshape.
  x_flat = x_nchw.reshape(B, Cin, n0).astype(f32)

  kernel = functools.partial(
      _fused_patch_embed_kernel,
      Cin=Cin, C1=C1, C2=C2, W0=W, W1=W1, n0=n0, n1=n1, n2=n2,
      off1=off1, off2=off2)

  def const_spec(arr):
    return pl.BlockSpec(arr.shape, lambda b, _nd=arr.ndim: (0,) * _nd)

  out = pl.pallas_call(
      kernel,
      out_shape=jax.ShapeDtypeStruct((B, C2, n2), x_nchw.dtype),
      grid=(B,),
      in_specs=[pl.BlockSpec((1, Cin, n0), lambda b: (b, 0, 0)),
                const_spec(slab1), const_spec(slab2),
                const_spec(r1), const_spec(r2),
                const_spec(m1), const_spec(m2)],
      out_specs=pl.BlockSpec((1, C2, n2), lambda b: (b, 0, 0)),
      compiler_params=pltpu.CompilerParams(
          dimension_semantics=("parallel",)),
  )(x_flat, slab1, slab2, r1, r2, m1, m2)

  # (B, C2, H2*W2) is already NCHW order -> free reshape, no transpose.
  # TODO(synk): if norm_layer were given, flatten->LayerNorm->reshape here.
  return out.reshape(B, C2, H2, W2)


# ------------------------------- param init --------------------------------- #

def init_params(key, in_chans=1, embed_dim=48, patch_size=4):
  c1 = 4 * in_chans
  ks = patch_size // 2
  shapes = {
      "c1a_w": (c1, in_chans, 3, 3), "c1a_b": (c1,),
      "c1b_w": (c1, c1, 3, 3),       "c1b_b": (c1,),
      "d1_w":  (c1, c1, ks, ks),     "d1_b":  (c1,),
      "c2a_w": (embed_dim, c1, 3, 3),        "c2a_b": (embed_dim,),
      "c2b_w": (embed_dim, embed_dim, 3, 3), "c2b_b": (embed_dim,),
      "d2_w":  (embed_dim, embed_dim, ks, ks), "d2_b": (embed_dim,),
  }
  params = {}
  keys = jax.random.split(key, len(shapes))
  for k, (name, shp) in zip(keys, sorted(shapes.items())):
    params[name] = jax.random.normal(k, shp, dtype=jnp.float32) * 0.1
  return params


# -------------------------------- reference --------------------------------- #

def _ref_conv(x, w, b, stride, padding):
  out = jax.lax.conv_general_dilated(
      x, w, window_strides=(stride, stride),
      padding=[(padding, padding), (padding, padding)],
      dimension_numbers=("NCHW", "OIHW", "NCHW"))
  return out + b.reshape(1, -1, 1, 1)


def reference_forward(x, p):
  y = jax.nn.relu(_ref_conv(x, p["c1a_w"], p["c1a_b"], 1, 1))
  y = jax.nn.relu(_ref_conv(y, p["c1b_w"], p["c1b_b"], 1, 1))
  y = _ref_conv(y, p["d1_w"], p["d1_b"], 2, 0)
  y = jax.nn.relu(_ref_conv(y, p["c2a_w"], p["c2a_b"], 1, 1))
  y = jax.nn.relu(_ref_conv(y, p["c2b_w"], p["c2b_b"], 1, 1))
  y = _ref_conv(y, p["d2_w"], p["d2_b"], 2, 0)
  return y


# ---------------------------------- main ------------------------------------ #

if __name__ == "__main__":
  key = jax.random.PRNGKey(0)
  k_x, k_p = jax.random.split(key)
  # Matches the module's NCHW convention: batch=2, in_chans=1, 16x16 image.
  x = jax.random.normal(k_x, (2, 1, 16, 16), dtype=jnp.float32)
  params = init_params(k_p, in_chans=1, embed_dim=48, patch_size=4)

  fwd = jax.jit(functools.partial(conv_patch_embed_forward, patch_size=4))
  out = jax.block_until_ready(fwd(x, params))
  assert out.shape == (2, 48, 4, 4), out.shape

  ref = jax.block_until_ready(reference_forward(x, params))
  np.testing.assert_allclose(np.asarray(out), np.asarray(ref),
                             rtol=2e-3, atol=2e-3)
  print("KERNEL_OK")
</pallas_src>

<mosaic_0001>
module attributes {stable_mosaic.version = 11 : i64} {
  func.func @_fused_patch_embed_kernel(%arg0: i32, %arg1: memref<1x1x256xf32, #tpu.memory_space<vmem>>, %arg2: memref<4x64xf32, #tpu.memory_space<vmem>>, %arg3: memref<48x663xf32, #tpu.memory_space<vmem>>, %arg4: memref<1024x64xf32, #tpu.memory_space<vmem>>, %arg5: memref<256x16xf32, #tpu.memory_space<vmem>>, %arg6: memref<2x256xf32, #tpu.memory_space<vmem>>, %arg7: memref<2x64xf32, #tpu.memory_space<vmem>>, %arg8: memref<1x48x16xf32, #tpu.memory_space<vmem>>) attributes {dimension_semantics = [#tpu.dimension_semantics<parallel>], iteration_bounds = array<i64: 2>, scalar_prefetch = 0 : i64, scratch_operands = 0 : i64, tpu.core_type = #tpu.core_type<tc>, window_params = [{transform_indices = @transform_0, window_bounds = array<i64: 1, 1, 256>}, {pipeline_mode = #tpu.pipeline_mode<synchronous>, transform_indices = @transform_1, window_bounds = array<i64: 4, 64>}, {pipeline_mode = #tpu.pipeline_mode<synchronous>, transform_indices = @transform_2, window_bounds = array<i64: 48, 663>}, {pipeline_mode = #tpu.pipeline_mode<synchronous>, transform_indices = @transform_3, window_bounds = array<i64: 1024, 64>}, {pipeline_mode = #tpu.pipeline_mode<synchronous>, transform_indices = @transform_4, window_bounds = array<i64: 256, 16>}, {pipeline_mode = #tpu.pipeline_mode<synchronous>, transform_indices = @transform_5, window_bounds = array<i64: 2, 256>}, {pipeline_mode = #tpu.pipeline_mode<synchronous>, transform_indices = @transform_6, window_bounds = array<i64: 2, 64>}, {transform_indices = @transform_7, window_bounds = array<i64: 1, 48, 16>}]} {
    %c0 = arith.constant 0 : index
    %c0_0 = arith.constant 0 : index
    %0 = vector.load %arg2[%c0, %c0_0] : memref<4x64xf32, #tpu.memory_space<vmem>>, vector<4x9xf32>
    %c0_1 = arith.constant 0 : index
    %c9 = arith.constant 9 : index
    %1 = vector.load %arg2[%c0_1, %c9] : memref<4x64xf32, #tpu.memory_space<vmem>>, vector<4x36xf32>
    %c0_2 = arith.constant 0 : index
    %c45 = arith.constant 45 : index
    %2 = vector.load %arg2[%c0_2, %c45] : memref<4x64xf32, #tpu.memory_space<vmem>>, vector<4x16xf32>
    %c0_3 = arith.constant 0 : index
    %c61 = arith.constant 61 : index
    %3 = vector.load %arg2[%c0_3, %c61] : memref<4x64xf32, #tpu.memory_space<vmem>>, vector<4x1xf32>
    %c0_4 = arith.constant 0 : index
    %c62 = arith.constant 62 : index
    %4 = vector.load %arg2[%c0_4, %c62] : memref<4x64xf32, #tpu.memory_space<vmem>>, vector<4x1xf32>
    %c0_5 = arith.constant 0 : index
    %c63 = arith.constant 63 : index
    %5 = vector.load %arg2[%c0_5, %c63] : memref<4x64xf32, #tpu.memory_space<vmem>>, vector<4x1xf32>
    %c0_6 = arith.constant 0 : index
    %c0_7 = arith.constant 0 : index
    %6 = vector.load %arg3[%c0_6, %c0_7] : memref<48x663xf32, #tpu.memory_space<vmem>>, vector<48x36xf32>
    %c0_8 = arith.constant 0 : index
    %c36 = arith.constant 36 : index
    %7 = vector.load %arg3[%c0_8, %c36] : memref<48x663xf32, #tpu.memory_space<vmem>>, vector<48x432xf32>
    %c0_9 = arith.constant 0 : index
    %c468 = arith.constant 468 : index
    %8 = vector.load %arg3[%c0_9, %c468] : memref<48x663xf32, #tpu.memory_space<vmem>>, vector<48x192xf32>
    %c0_10 = arith.constant 0 : index
    %c660 = arith.constant 660 : index
    %9 = vector.load %arg3[%c0_10, %c660] : memref<48x663xf32, #tpu.memory_space<vmem>>, vector<48x1xf32>
    %c0_11 = arith.constant 0 : index
    %c661 = arith.constant 661 : index
    %10 = vector.load %arg3[%c0_11, %c661] : memref<48x663xf32, #tpu.memory_space<vmem>>, vector<48x1xf32>
    %c0_12 = arith.constant 0 : index
    %c662 = arith.constant 662 : index
    %11 = vector.load %arg3[%c0_12, %c662] : memref<48x663xf32, #tpu.memory_space<vmem>>, vector<48x1xf32>
    %c0_13 = arith.constant 0 : index
    %c0_14 = arith.constant 0 : index
    %12 = vector.load %arg6[%c0_13, %c0_14] : memref<2x256xf32, #tpu.memory_space<vmem>>, vector<1x256xf32>
    %c1 = arith.constant 1 : index
    %c0_15 = arith.constant 0 : index
    %13 = vector.load %arg6[%c1, %c0_15] : memref<2x256xf32, #tpu.memory_space<vmem>>, vector<1x256xf32>
    %c0_16 = arith.constant 0 : index
    %c0_17 = arith.constant 0 : index
    %14 = vector.load %arg7[%c0_16, %c0_17] : memref<2x64xf32, #tpu.memory_space<vmem>>, vector<1x64xf32>
    %c1_18 = arith.constant 1 : index
    %c0_19 = arith.constant 0 : index
    %15 = vector.load %arg7[%c1_18, %c0_19] : memref<2x64xf32, #tpu.memory_space<vmem>>, vector<1x64xf32>
    %c0_20 = arith.constant 0 : index
    %c0_21 = arith.constant 0 : index
    %c0_22 = arith.constant 0 : index
    %16 = vector.load %arg1[%c0_20, %c0_21, %c0_22] : memref<1x1x256xf32, #tpu.memory_space<vmem>>, vector<1x1x256xf32>
    %17 = vector.shape_cast %16 : vector<1x1x256xf32> to vector<1x256xf32>
    %cst = arith.constant 0.000000e+00 : f32
    %18 = vector.broadcast %cst : f32 to vector<1x17xf32>
    %19 = tpu.concatenate %18, %17, %18 in 1 : vector<1x17xf32>, vector<1x256xf32>, vector<1x17xf32> -> vector<1x290xf32>
    %20 = vector.extract_strided_slice %19 {offsets = [0, 0], sizes = [1, 256], strides = [1, 1]} : vector<1x290xf32> to vector<1x256xf32>
    %21 = arith.mulf %20, %12 : vector<1x256xf32>
    %22 = vector.extract_strided_slice %19 {offsets = [0, 1], sizes = [1, 256], strides = [1, 1]} : vector<1x290xf32> to vector<1x256xf32>
    %23 = vector.extract_strided_slice %19 {offsets = [0, 2], sizes = [1, 256], strides = [1, 1]} : vector<1x290xf32> to vector<1x256xf32>
    %24 = arith.mulf %23, %13 : vector<1x256xf32>
    %25 = vector.extract_strided_slice %19 {offsets = [0, 16], sizes = [1, 256], strides = [1, 1]} : vector<1x290xf32> to vector<1x256xf32>
    %26 = arith.mulf %25, %12 : vector<1x256xf32>
    %27 = vector.extract_strided_slice %19 {offsets = [0, 17], sizes = [1, 256], strides = [1, 1]} : vector<1x290xf32> to vector<1x256xf32>
    %28 = vector.extract_strided_slice %19 {offsets = [0, 18], sizes = [1, 256], strides = [1, 1]} : vector<1x290xf32> to vector<1x256xf32>
    %29 = arith.mulf %28, %13 : vector<1x256xf32>
    %30 = vector.extract_strided_slice %19 {offsets = [0, 32], sizes = [1, 256], strides = [1, 1]} : vector<1x290xf32> to vector<1x256xf32>
    %31 = arith.mulf %30, %12 : vector<1x256xf32>
    %32 = vector.extract_strided_slice %19 {offsets = [0, 33], sizes = [1, 256], strides = [1, 1]} : vector<1x290xf32> to vector<1x256xf32>
    %33 = vector.extract_strided_slice %19 {offsets = [0, 34], sizes = [1, 256], strides = [1, 1]} : vector<1x290xf32> to vector<1x256xf32>
    %34 = arith.mulf %33, %13 : vector<1x256xf32>
    %35 = vector.extract_strided_slice %0 {offsets = [0, 0], sizes = [4, 1], strides = [1, 1]} : vector<4x9xf32> to vector<4x1xf32>
    %36 = vector.broadcast %35 : vector<4x1xf32> to vector<4x256xf32>
    %37 = vector.broadcast %21 : vector<1x256xf32> to vector<4x256xf32>
    %38 = arith.mulf %36, %37 : vector<4x256xf32>
    %39 = vector.broadcast %3 : vector<4x1xf32> to vector<4x256xf32>
    %40 = arith.addf %39, %38 : vector<4x256xf32>
    %41 = vector.extract_strided_slice %0 {offsets = [0, 1], sizes = [4, 1], strides = [1, 1]} : vector<4x9xf32> to vector<4x1xf32>
    %42 = vector.broadcast %41 : vector<4x1xf32> to vector<4x256xf32>
    %43 = vector.broadcast %22 : vector<1x256xf32> to vector<4x256xf32>
    %44 = arith.mulf %42, %43 : vector<4x256xf32>
    %45 = arith.addf %40, %44 : vector<4x256xf32>
    %46 = vector.extract_strided_slice %0 {offsets = [0, 2], sizes = [4, 1], strides = [1, 1]} : vector<4x9xf32> to vector<4x1xf32>
    %47 = vector.broadcast %46 : vector<4x1xf32> to vector<4x256xf32>
    %48 = vector.broadcast %24 : vector<1x256xf32> to vector<4x256xf32>
    %49 = arith.mulf %47, %48 : vector<4x256xf32>
    %50 = arith.addf %45, %49 : vector<4x256xf32>
    %51 = vector.extract_strided_slice %0 {offsets = [0, 3], sizes = [4, 1], strides = [1, 1]} : vector<4x9xf32> to vector<4x1xf32>
    %52 = vector.broadcast %51 : vector<4x1xf32> to vector<4x256xf32>
    %53 = vector.broadcast %26 : vector<1x256xf32> to vector<4x256xf32>
    %54 = arith.mulf %52, %53 : vector<4x256xf32>
    %55 = arith.addf %50, %54 : vector<4x256xf32>
    %56 = vector.extract_strided_slice %0 {offsets = [0, 4], sizes = [4, 1], strides = [1, 1]} : vector<4x9xf32> to vector<4x1xf32>
    %57 = vector.broadcast %56 : vector<4x1xf32> to vector<4x256xf32>
    %58 = vector.broadcast %27 : vector<1x256xf32> to vector<4x256xf32>
    %59 = arith.mulf %57, %58 : vector<4x256xf32>
    %60 = arith.addf %55, %59 : vector<4x256xf32>
    %61 = vector.extract_strided_slice %0 {offsets = [0, 5], sizes = [4, 1], strides = [1, 1]} : vector<4x9xf32> to vector<4x1xf32>
    %62 = vector.broadcast %61 : vector<4x1xf32> to vector<4x256xf32>
    %63 = vector.broadcast %29 : vector<1x256xf32> to vector<4x256xf32>
    %64 = arith.mulf %62, %63 : vector<4x256xf32>
    %65 = arith.addf %60, %64 : vector<4x256xf32>
    %66 = vector.extract_strided_slice %0 {offsets = [0, 6], sizes = [4, 1], strides = [1, 1]} : vector<4x9xf32> to vector<4x1xf32>
    %67 = vector.broadcast %66 : vector<4x1xf32> to vector<4x256xf32>
    %68 = vector.broadcast %31 : vector<1x256xf32> to vector<4x256xf32>
    %69 = arith.mulf %67, %68 : vector<4x256xf32>
    %70 = arith.addf %65, %69 : vector<4x256xf32>
    %71 = vector.extract_strided_slice %0 {offsets = [0, 7], sizes = [4, 1], strides = [1, 1]} : vector<4x9xf32> to vector<4x1xf32>
    %72 = vector.broadcast %71 : vector<4x1xf32> to vector<4x256xf32>
    %73 = vector.broadcast %32 : vector<1x256xf32> to vector<4x256xf32>
    %74 = arith.mulf %72, %73 : vector<4x256xf32>
    %75 = arith.addf %70, %74 : vector<4x256xf32>
    %76 = vector.extract_strided_slice %0 {offsets = [0, 8], sizes = [4, 1], strides = [1, 1]} : vector<4x9xf32> to vector<4x1xf32>
    %77 = vector.broadcast %76 : vector<4x1xf32> to vector<4x256xf32>
    %78 = vector.broadcast %34 : vector<1x256xf32> to vector<4x256xf32>
    %79 = arith.mulf %77, %78 : vector<4x256xf32>
    %80 = arith.addf %75, %79 : vector<4x256xf32>
    %cst_23 = arith.constant 0.000000e+00 : f32
    %81 = vector.broadcast %cst_23 : f32 to vector<4x256xf32>
    %82 = arith.maximumf %80, %81 : vector<4x256xf32>
    %cst_24 = arith.constant 0.000000e+00 : f32
    %83 = vector.broadcast %cst_24 : f32 to vector<4x17xf32>
    %84 = tpu.concatenate %83, %82, %83 in 1 : vector<4x17xf32>, vector<4x256xf32>, vector<4x17xf32> -> vector<4x290xf32>
    %85 = vector.extract_strided_slice %84 {offsets = [0, 0], sizes = [4, 256], strides = [1, 1]} : vector<4x290xf32> to vector<4x256xf32>
    %86 = vector.broadcast %12 : vector<1x256xf32> to vector<4x256xf32>
    %87 = arith.mulf %85, %86 : vector<4x256xf32>
    %88 = vector.extract_strided_slice %84 {offsets = [0, 1], sizes = [4, 256], strides = [1, 1]} : vector<4x290xf32> to vector<4x256xf32>
    %89 = vector.extract_strided_slice %84 {offsets = [0, 2], sizes = [4, 256], strides = [1, 1]} : vector<4x290xf32> to vector<4x256xf32>
    %90 = vector.broadcast %13 : vector<1x256xf32> to vector<4x256xf32>
    %91 = arith.mulf %89, %90 : vector<4x256xf32>
    %92 = vector.extract_strided_slice %84 {offsets = [0, 16], sizes = [4, 256], strides = [1, 1]} : vector<4x290xf32> to vector<4x256xf32>
    %93 = vector.broadcast %12 : vector<1x256xf32> to vector<4x256xf32>
    %94 = arith.mulf %92, %93 : vector<4x256xf32>
    %95 = vector.extract_strided_slice %84 {offsets = [0, 17], sizes = [4, 256], strides = [1, 1]} : vector<4x290xf32> to vector<4x256xf32>
    %96 = vector.extract_strided_slice %84 {offsets = [0, 18], sizes = [4, 256], strides = [1, 1]} : vector<4x290xf32> to vector<4x256xf32>
    %97 = vector.broadcast %13 : vector<1x256xf32> to vector<4x256xf32>
    %98 = arith.mulf %96, %97 : vector<4x256xf32>
    %99 = vector.extract_strided_slice %84 {offsets = [0, 32], sizes = [4, 256], strides = [1, 1]} : vector<4x290xf32> to vector<4x256xf32>
    %100 = vector.broadcast %12 : vector<1x256xf32> to vector<4x256xf32>
    %101 = arith.mulf %99, %100 : vector<4x256xf32>
    %102 = vector.extract_strided_slice %84 {offsets = [0, 33], sizes = [4, 256], strides = [1, 1]} : vector<4x290xf32> to vector<4x256xf32>
    %103 = vector.extract_strided_slice %84 {offsets = [0, 34], sizes = [4, 256], strides = [1, 1]} : vector<4x290xf32> to vector<4x256xf32>
    %104 = vector.broadcast %13 : vector<1x256xf32> to vector<4x256xf32>
    %105 = arith.mulf %103, %104 : vector<4x256xf32>
    %106 = vector.extract_strided_slice %1 {offsets = [0, 0], sizes = [4, 4], strides = [1, 1]} : vector<4x36xf32> to vector<4x4xf32>
    %cst_25 = arith.constant dense<0.000000e+00> : vector<4x256xf32>
    %107 = tpu.matmul %106, %87, %cst_25 {dimension_numbers = #tpu.dot_dimension_numbers<[1], [0], [0], [1], [0, 0, 1, 1], [], []>} : vector<4x4xf32>, vector<4x256xf32>, vector<4x256xf32> -> vector<4x256xf32>
    %108 = vector.broadcast %4 : vector<4x1xf32> to vector<4x256xf32>
    %109 = arith.addf %108, %107 : vector<4x256xf32>
    %110 = vector.extract_strided_slice %1 {offsets = [0, 4], sizes = [4, 4], strides = [1, 1]} : vector<4x36xf32> to vector<4x4xf32>
    %cst_26 = arith.constant dense<0.000000e+00> : vector<4x256xf32>
    %111 = tpu.matmul %110, %88, %cst_26 {dimension_numbers = #tpu.dot_dimension_numbers<[1], [0], [0], [1], [0, 0, 1, 1], [], []>} : vector<4x4xf32>, vector<4x256xf32>, vector<4x256xf32> -> vector<4x256xf32>
    %112 = arith.addf %109, %111 : vector<4x256xf32>
    %113 = vector.extract_strided_slice %1 {offsets = [0, 8], sizes = [4, 4], strides = [1, 1]} : vector<4x36xf32> to vector<4x4xf32>
    %cst_27 = arith.constant dense<0.000000e+00> : vector<4x256xf32>
    %114 = tpu.matmul %113, %91, %cst_27 {dimension_numbers = #tpu.dot_dimension_numbers<[1], [0], [0], [1], [0, 0, 1, 1], [], []>} : vector<4x4xf32>, vector<4x256xf32>, vector<4x256xf32> -> vector<4x256xf32>
    %115 = arith.addf %112, %114 : vector<4x256xf32>
    %116 = vector.extract_strided_slice %1 {offsets = [0, 12], sizes = [4, 4], strides = [1, 1]} : vector<4x36xf32> to vector<4x4xf32>
    %cst_28 = arith.constant dense<0.000000e+00> : vector<4x256xf32>
    %117 = tpu.matmul %116, %94, %cst_28 {dimension_numbers = #tpu.dot_dimension_numbers<[1], [0], [0], [1], [0, 0, 1, 1], [], []>} : vector<4x4xf32>, vector<4x256xf32>, vector<4x256xf32> -> vector<4x256xf32>
    %118 = arith.addf %115, %117 : vector<4x256xf32>
    %119 = vector.extract_strided_slice %1 {offsets = [0, 16], sizes = [4, 4], strides = [1, 1]} : vector<4x36xf32> to vector<4x4xf32>
    %cst_29 = arith.constant dense<0.000000e+00> : vector<4x256xf32>
    %120 = tpu.matmul %119, %95, %cst_29 {dimension_numbers = #tpu.dot_dimension_numbers<[1], [0], [0], [1], [0, 0, 1, 1], [], []>} : vector<4x4xf32>, vector<4x256xf32>, vector<4x256xf32> -> vector<4x256xf32>
    %121 = arith.addf %118, %120 : vector<4x256xf32>
    %122 = vector.extract_strided_slice %1 {offsets = [0, 20], sizes = [4, 4], strides = [1, 1]} : vector<4x36xf32> to vector<4x4xf32>
    %cst_30 = arith.constant dense<0.000000e+00> : vector<4x256xf32>
    %123 = tpu.matmul %122, %98, %cst_30 {dimension_numbers = #tpu.dot_dimension_numbers<[1], [0], [0], [1], [0, 0, 1, 1], [], []>} : vector<4x4xf32>, vector<4x256xf32>, vector<4x256xf32> -> vector<4x256xf32>
    %124 = arith.addf %121, %123 : vector<4x256xf32>
    %125 = vector.extract_strided_slice %1 {offsets = [0, 24], sizes = [4, 4], strides = [1, 1]} : vector<4x36xf32> to vector<4x4xf32>
    %cst_31 = arith.constant dense<0.000000e+00> : vector<4x256xf32>
    %126 = tpu.matmul %125, %101, %cst_31 {dimension_numbers = #tpu.dot_dimension_numbers<[1], [0], [0], [1], [0, 0, 1, 1], [], []>} : vector<4x4xf32>, vector<4x256xf32>, vector<4x256xf32> -> vector<4x256xf32>
    %127 = arith.addf %124, %126 : vector<4x256xf32>
    %128 = vector.extract_strided_slice %1 {offsets = [0, 28], sizes = [4, 4], strides = [1, 1]} : vector<4x36xf32> to vector<4x4xf32>
    %cst_32 = arith.constant dense<0.000000e+00> : vector<4x256xf32>
    %129 = tpu.matmul %128, %102, %cst_32 {dimension_numbers = #tpu.dot_dimension_numbers<[1], [0], [0], [1], [0, 0, 1, 1], [], []>} : vector<4x4xf32>, vector<4x256xf32>, vector<4x256xf32> -> vector<4x256xf32>
    %130 = arith.addf %127, %129 : vector<4x256xf32>
    %131 = vector.extract_strided_slice %1 {offsets = [0, 32], sizes = [4, 4], strides = [1, 1]} : vector<4x36xf32> to vector<4x4xf32>
    %cst_33 = arith.constant dense<0.000000e+00> : vector<4x256xf32>
    %132 = tpu.matmul %131, %105, %cst_33 {dimension_numbers = #tpu.dot_dimension_numbers<[1], [0], [0], [1], [0, 0, 1, 1], [], []>} : vector<4x4xf32>, vector<4x256xf32>, vector<4x256xf32> -> vector<4x256xf32>
    %133 = arith.addf %130, %132 : vector<4x256xf32>
    %cst_34 = arith.constant 0.000000e+00 : f32
    %134 = vector.broadcast %cst_34 : f32 to vector<4x256xf32>
    %135 = arith.maximumf %133, %134 : vector<4x256xf32>
    %c0_35 = arith.constant 0 : index
    %c0_36 = arith.constant 0 : index
    %136 = vector.load %arg4[%c0_35, %c0_36] : memref<1024x64xf32, #tpu.memory_space<vmem>>, vector<256x64xf32>
    %cst_37 = arith.constant dense<0.000000e+00> : vector<4x64xf32>
    %137 = tpu.matmul %135, %136, %cst_37 {dimension_numbers = #tpu.dot_dimension_numbers<[1], [0], [0], [1], [0, 0, 1, 1], [], []>} : vector<4x256xf32>, vector<256x64xf32>, vector<4x64xf32> -> vector<4x64xf32>
    %138 = vector.extract_strided_slice %2 {offsets = [0, 0], sizes = [4, 4], strides = [1, 1]} : vector<4x16xf32> to vector<4x4xf32>
    %cst_38 = arith.constant dense<0.000000e+00> : vector<4x64xf32>
    %139 = tpu.matmul %138, %137, %cst_38 {dimension_numbers = #tpu.dot_dimension_numbers<[1], [0], [0], [1], [0, 0, 1, 1], [], []>} : vector<4x4xf32>, vector<4x64xf32>, vector<4x64xf32> -> vector<4x64xf32>
    %140 = vector.broadcast %5 : vector<4x1xf32> to vector<4x64xf32>
    %141 = arith.addf %140, %139 : vector<4x64xf32>
    %c256 = arith.constant 256 : index
    %c0_39 = arith.constant 0 : index
    %142 = vector.load %arg4[%c256, %c0_39] : memref<1024x64xf32, #tpu.memory_space<vmem>>, vector<256x64xf32>
    %cst_40 = arith.constant dense<0.000000e+00> : vector<4x64xf32>
    %143 = tpu.matmul %135, %142, %cst_40 {dimension_numbers = #tpu.dot_dimension_numbers<[1], [0], [0], [1], [0, 0, 1, 1], [], []>} : vector<4x256xf32>, vector<256x64xf32>, vector<4x64xf32> -> vector<4x64xf32>
    %144 = vector.extract_strided_slice %2 {offsets = [0, 4], sizes = [4, 4], strides = [1, 1]} : vector<4x16xf32> to vector<4x4xf32>
    %cst_41 = arith.constant dense<0.000000e+00> : vector<4x64xf32>
    %145 = tpu.matmul %144, %143, %cst_41 {dimension_numbers = #tpu.dot_dimension_numbers<[1], [0], [0], [1], [0, 0, 1, 1], [], []>} : vector<4x4xf32>, vector<4x64xf32>, vector<4x64xf32> -> vector<4x64xf32>
    %146 = arith.addf %141, %145 : vector<4x64xf32>
    %c512 = arith.constant 512 : index
    %c0_42 = arith.constant 0 : index
    %147 = vector.load %arg4[%c512, %c0_42] : memref<1024x64xf32, #tpu.memory_space<vmem>>, vector<256x64xf32>
    %cst_43 = arith.constant dense<0.000000e+00> : vector<4x64xf32>
    %148 = tpu.matmul %135, %147, %cst_43 {dimension_numbers = #tpu.dot_dimension_numbers<[1], [0], [0], [1], [0, 0, 1, 1], [], []>} : vector<4x256xf32>, vector<256x64xf32>, vector<4x64xf32> -> vector<4x64xf32>
    %149 = vector.extract_strided_slice %2 {offsets = [0, 8], sizes = [4, 4], strides = [1, 1]} : vector<4x16xf32> to vector<4x4xf32>
    %cst_44 = arith.constant dense<0.000000e+00> : vector<4x64xf32>
    %150 = tpu.matmul %149, %148, %cst_44 {dimension_numbers = #tpu.dot_dimension_numbers<[1], [0], [0], [1], [0, 0, 1, 1], [], []>} : vector<4x4xf32>, vector<4x64xf32>, vector<4x64xf32> -> vector<4x64xf32>
    %151 = arith.addf %146, %150 : vector<4x64xf32>
    %c768 = arith.constant 768 : index
    %c0_45 = arith.constant 0 : index
    %152 = vector.load %arg4[%c768, %c0_45] : memref<1024x64xf32, #tpu.memory_space<vmem>>, vector<256x64xf32>
    %cst_46 = arith.constant dense<0.000000e+00> : vector<4x64xf32>
    %153 = tpu.matmul %135, %152, %cst_46 {dimension_numbers = #tpu.dot_dimension_numbers<[1], [0], [0], [1], [0, 0, 1, 1], [], []>} : vector<4x256xf32>, vector<256x64xf32>, vector<4x64xf32> -> vector<4x64xf32>
    %154 = vector.extract_strided_slice %2 {offsets = [0, 12], sizes = [4, 4], strides = [1, 1]} : vector<4x16xf32> to vector<4x4xf32>
    %cst_47 = arith.constant dense<0.000000e+00> : vector<4x64xf32>
    %155 = tpu.matmul %154, %153, %cst_47 {dimension_numbers = #tpu.dot_dimension_numbers<[1], [0], [0], [1], [0, 0, 1, 1], [], []>} : vector<4x4xf32>, vector<4x64xf32>, vector<4x64xf32> -> vector<4x64xf32>
    %156 = arith.addf %151, %155 : vector<4x64xf32>
    %cst_48 = arith.constant 0.000000e+00 : f32
    %157 = vector.broadcast %cst_48 : f32 to vector<4x9xf32>
    %158 = tpu.concatenate %157, %156, %157 in 1 : vector<4x9xf32>, vector<4x64xf32>, vector<4x9xf32> -> vector<4x82xf32>
    %159 = vector.extract_strided_slice %158 {offsets = [0, 0], sizes = [4, 64], strides = [1, 1]} : vector<4x82xf32> to vector<4x64xf32>
    %160 = vector.broadcast %14 : vector<1x64xf32> to vector<4x64xf32>
    %161 = arith.mulf %159, %160 : vector<4x64xf32>
    %162 = vector.extract_strided_slice %158 {offsets = [0, 1], sizes = [4, 64], strides = [1, 1]} : vector<4x82xf32> to vector<4x64xf32>
    %163 = vector.extract_strided_slice %158 {offsets = [0, 2], sizes = [4, 64], strides = [1, 1]} : vector<4x82xf32> to vector<4x64xf32>
    %164 = vector.broadcast %15 : vector<1x64xf32> to vector<4x64xf32>
    %165 = arith.mulf %163, %164 : vector<4x64xf32>
    %166 = vector.extract_strided_slice %158 {offsets = [0, 8], sizes = [4, 64], strides = [1, 1]} : vector<4x82xf32> to vector<4x64xf32>
    %167 = vector.broadcast %14 : vector<1x64xf32> to vector<4x64xf32>
    %168 = arith.mulf %166, %167 : vector<4x64xf32>
    %169 = vector.extract_strided_slice %158 {offsets = [0, 9], sizes = [4, 64], strides = [1, 1]} : vector<4x82xf32> to vector<4x64xf32>
    %170 = vector.extract_strided_slice %158 {offsets = [0, 10], sizes = [4, 64], strides = [1, 1]} : vector<4x82xf32> to vector<4x64xf32>
    %171 = vector.broadcast %15 : vector<1x64xf32> to vector<4x64xf32>
    %172 = arith.mulf %170, %171 : vector<4x64xf32>
    %173 = vector.extract_strided_slice %158 {offsets = [0, 16], sizes = [4, 64], strides = [1, 1]} : vector<4x82xf32> to vector<4x64xf32>
    %174 = vector.broadcast %14 : vector<1x64xf32> to vector<4x64xf32>
    %175 = arith.mulf %173, %174 : vector<4x64xf32>
    %176 = vector.extract_strided_slice %158 {offsets = [0, 17], sizes = [4, 64], strides = [1, 1]} : vector<4x82xf32> to vector<4x64xf32>
    %177 = vector.extract_strided_slice %158 {offsets = [0, 18], sizes = [4, 64], strides = [1, 1]} : vector<4x82xf32> to vector<4x64xf32>
    %178 = vector.broadcast %15 : vector<1x64xf32> to vector<4x64xf32>
    %179 = arith.mulf %177, %178 : vector<4x64xf32>
    %180 = vector.extract_strided_slice %6 {offsets = [0, 0], sizes = [48, 4], strides = [1, 1]} : vector<48x36xf32> to vector<48x4xf32>
    %cst_49 = arith.constant dense<0.000000e+00> : vector<48x64xf32>
    %181 = tpu.matmul %180, %161, %cst_49 {dimension_numbers = #tpu.dot_dimension_numbers<[1], [0], [0], [1], [0, 0, 1, 1], [], []>} : vector<48x4xf32>, vector<4x64xf32>, vector<48x64xf32> -> vector<48x64xf32>
    %182 = vector.broadcast %9 : vector<48x1xf32> to vector<48x64xf32>
    %183 = arith.addf %182, %181 : vector<48x64xf32>
    %184 = vector.extract_strided_slice %6 {offsets = [0, 4], sizes = [48, 4], strides = [1, 1]} : vector<48x36xf32> to vector<48x4xf32>
    %cst_50 = arith.constant dense<0.000000e+00> : vector<48x64xf32>
    %185 = tpu.matmul %184, %162, %cst_50 {dimension_numbers = #tpu.dot_dimension_numbers<[1], [0], [0], [1], [0, 0, 1, 1], [], []>} : vector<48x4xf32>, vector<4x64xf32>, vector<48x64xf32> -> vector<48x64xf32>
    %186 = arith.addf %183, %185 : vector<48x64xf32>
    %187 = vector.extract_strided_slice %6 {offsets = [0, 8], sizes = [48, 4], strides = [1, 1]} : vector<48x36xf32> to vector<48x4xf32>
    %cst_51 = arith.constant dense<0.000000e+00> : vector<48x64xf32>
    %188 = tpu.matmul %187, %165, %cst_51 {dimension_numbers = #tpu.dot_dimension_numbers<[1], [0], [0], [1], [0, 0, 1, 1], [], []>} : vector<48x4xf32>, vector<4x64xf32>, vector<48x64xf32> -> vector<48x64xf32>
    %189 = arith.addf %186, %188 : vector<48x64xf32>
    %190 = vector.extract_strided_slice %6 {offsets = [0, 12], sizes = [48, 4], strides = [1, 1]} : vector<48x36xf32> to vector<48x4xf32>
    %cst_52 = arith.constant dense<0.000000e+00> : vector<48x64xf32>
    %191 = tpu.matmul %190, %168, %cst_52 {dimension_numbers = #tpu.dot_dimension_numbers<[1], [0], [0], [1], [0, 0, 1, 1], [], []>} : vector<48x4xf32>, vector<4x64xf32>, vector<48x64xf32> -> vector<48x64xf32>
    %192 = arith.addf %189, %191 : vector<48x64xf32>
    %193 = vector.extract_strided_slice %6 {offsets = [0, 16], sizes = [48, 4], strides = [1, 1]} : vector<48x36xf32> to vector<48x4xf32>
    %cst_53 = arith.constant dense<0.000000e+00> : vector<48x64xf32>
    %194 = tpu.matmul %193, %169, %cst_53 {dimension_numbers = #tpu.dot_dimension_numbers<[1], [0], [0], [1], [0, 0, 1, 1], [], []>} : vector<48x4xf32>, vector<4x64xf32>, vector<48x64xf32> -> vector<48x64xf32>
    %195 = arith.addf %192, %194 : vector<48x64xf32>
    %196 = vector.extract_strided_slice %6 {offsets = [0, 20], sizes = [48, 4], strides = [1, 1]} : vector<48x36xf32> to vector<48x4xf32>
    %cst_54 = arith.constant dense<0.000000e+00> : vector<48x64xf32>
    %197 = tpu.matmul %196, %172, %cst_54 {dimension_numbers = #tpu.dot_dimension_numbers<[1], [0], [0], [1], [0, 0, 1, 1], [], []>} : vector<48x4xf32>, vector<4x64xf32>, vector<48x64xf32> -> vector<48x64xf32>
    %198 = arith.addf %195, %197 : vector<48x64xf32>
    %199 = vector.extract_strided_slice %6 {offsets = [0, 24], sizes = [48, 4], strides = [1, 1]} : vector<48x36xf32> to vector<48x4xf32>
    %cst_55 = arith.constant dense<0.000000e+00> : vector<48x64xf32>
    %200 = tpu.matmul %199, %175, %cst_55 {dimension_numbers = #tpu.dot_dimension_numbers<[1], [0], [0], [1], [0, 0, 1, 1], [], []>} : vector<48x4xf32>, vector<4x64xf32>, vector<48x64xf32> -> vector<48x64xf32>
    %201 = arith.addf %198, %200 : vector<48x64xf32>
    %202 = vector.extract_strided_slice %6 {offsets = [0, 28], sizes = [48, 4], strides = [1, 1]} : vector<48x36xf32> to vector<48x4xf32>
    %cst_56 = arith.constant dense<0.000000e+00> : vector<48x64xf32>
    %203 = tpu.matmul %202, %176, %cst_56 {dimension_numbers = #tpu.dot_dimension_numbers<[1], [0], [0], [1], [0, 0, 1, 1], [], []>} : vector<48x4xf32>, vector<4x64xf32>, vector<48x64xf32> -> vector<48x64xf32>
    %204 = arith.addf %201, %203 : vector<48x64xf32>
    %205 = vector.extract_strided_slice %6 {offsets = [0, 32], sizes = [48, 4], strides = [1, 1]} : vector<48x36xf32> to vector<48x4xf32>
    %cst_57 = arith.constant dense<0.000000e+00> : vector<48x64xf32>
    %206 = tpu.matmul %205, %179, %cst_57 {dimension_numbers = #tpu.dot_dimension_numbers<[1], [0], [0], [1], [0, 0, 1, 1], [], []>} : vector<48x4xf32>, vector<4x64xf32>, vector<48x64xf32> -> vector<48x64xf32>
    %207 = arith.addf %204, %206 : vector<48x64xf32>
    %cst_58 = arith.constant 0.000000e+00 : f32
    %208 = vector.broadcast %cst_58 : f32 to vector<48x64xf32>
    %209 = arith.maximumf %207, %208 : vector<48x64xf32>
    %cst_59 = arith.constant 0.000000e+00 : f32
    %210 = vector.broadcast %cst_59 : f32 to vector<48x9xf32>
    %211 = tpu.concatenate %210, %209, %210 in 1 : vector<48x9xf32>, vector<48x64xf32>, vector<48x9xf32> -> vector<48x82xf32>
    %212 = vector.extract_strided_slice %211 {offsets = [0, 0], sizes = [48, 64], strides = [1, 1]} : vector<48x82xf32> to vector<48x64xf32>
    %213 = vector.broadcast %14 : vector<1x64xf32> to vector<48x64xf32>
    %214 = arith.mulf %212, %213 : vector<48x64xf32>
    %215 = vector.extract_strided_slice %211 {offsets = [0, 1], sizes = [48, 64], strides = [1, 1]} : vector<48x82xf32> to vector<48x64xf32>
    %216 = vector.extract_strided_slice %211 {offsets = [0, 2], sizes = [48, 64], strides = [1, 1]} : vector<48x82xf32> to vector<48x64xf32>
    %217 = vector.broadcast %15 : vector<1x64xf32> to vector<48x64xf32>
    %218 = arith.mulf %216, %217 : vector<48x64xf32>
    %219 = vector.extract_strided_slice %211 {offsets = [0, 8], sizes = [48, 64], strides = [1, 1]} : vector<48x82xf32> to vector<48x64xf32>
    %220 = vector.broadcast %14 : vector<1x64xf32> to vector<48x64xf32>
    %221 = arith.mulf %219, %220 : vector<48x64xf32>
    %222 = vector.extract_strided_slice %211 {offsets = [0, 9], sizes = [48, 64], strides = [1, 1]} : vector<48x82xf32> to vector<48x64xf32>
    %223 = vector.extract_strided_slice %211 {offsets = [0, 10], sizes = [48, 64], strides = [1, 1]} : vector<48x82xf32> to vector<48x64xf32>
    %224 = vector.broadcast %15 : vector<1x64xf32> to vector<48x64xf32>
    %225 = arith.mulf %223, %224 : vector<48x64xf32>
    %226 = vector.extract_strided_slice %211 {offsets = [0, 16], sizes = [48, 64], strides = [1, 1]} : vector<48x82xf32> to vector<48x64xf32>
    %227 = vector.broadcast %14 : vector<1x64xf32> to vector<48x64xf32>
    %228 = arith.mulf %226, %227 : vector<48x64xf32>
    %229 = vector.extract_strided_slice %211 {offsets = [0, 17], sizes = [48, 64], strides = [1, 1]} : vector<48x82xf32> to vector<48x64xf32>
    %230 = vector.extract_strided_slice %211 {offsets = [0, 18], sizes = [48, 64], strides = [1, 1]} : vector<48x82xf32> to vector<48x64xf32>
    %231 = vector.broadcast %15 : vector<1x64xf32> to vector<48x64xf32>
    %232 = arith.mulf %230, %231 : vector<48x64xf32>
    %233 = tpu.concatenate %214, %215, %218, %221, %222, %225, %228, %229, %232 in 0 : vector<48x64xf32>, vector<48x64xf32>, vector<48x64xf32>, vector<48x64xf32>, vector<48x64xf32>, vector<48x64xf32>, vector<48x64xf32>, vector<48x64xf32>, vector<48x64xf32> -> vector<432x64xf32>
    %cst_60 = arith.constant dense<0.000000e+00> : vector<48x64xf32>
    %234 = tpu.matmul %7, %233, %cst_60 {dimension_numbers = #tpu.dot_dimension_numbers<[1], [0], [0], [1], [0, 0, 1, 1], [], []>} : vector<48x432xf32>, vector<432x64xf32>, vector<48x64xf32> -> vector<48x64xf32>
    %235 = vector.broadcast %10 : vector<48x1xf32> to vector<48x64xf32>
    %236 = arith.addf %234, %235 : vector<48x64xf32>
    %cst_61 = arith.constant 0.000000e+00 : f32
    %237 = vector.broadcast %cst_61 : f32 to vector<48x64xf32>
    %238 = arith.maximumf %236, %237 : vector<48x64xf32>
    %c0_62 = arith.constant 0 : index
    %c0_63 = arith.constant 0 : index
    %239 = vector.load %arg5[%c0_62, %c0_63] : memref<256x16xf32, #tpu.memory_space<vmem>>, vector<64x16xf32>
    %cst_64 = arith.constant dense<0.000000e+00> : vector<48x16xf32>
    %240 = tpu.matmul %238, %239, %cst_64 {dimension_numbers = #tpu.dot_dimension_numbers<[1], [0], [0], [1], [0, 0, 1, 1], [], []>} : vector<48x64xf32>, vector<64x16xf32>, vector<48x16xf32> -> vector<48x16xf32>
    %c64 = arith.constant 64 : index
    %c0_65 = arith.constant 0 : index
    %241 = vector.load %arg5[%c64, %c0_65] : memref<256x16xf32, #tpu.memory_space<vmem>>, vector<64x16xf32>
    %cst_66 = arith.constant dense<0.000000e+00> : vector<48x16xf32>
    %242 = tpu.matmul %238, %241, %cst_66 {dimension_numbers = #tpu.dot_dimension_numbers<[1], [0], [0], [1], [0, 0, 1, 1], [], []>} : vector<48x64xf32>, vector<64x16xf32>, vector<48x16xf32> -> vector<48x16xf32>
    %c128 = arith.constant 128 : index
    %c0_67 = arith.constant 0 : index
    %243 = vector.load %arg5[%c128, %c0_67] : memref<256x16xf32, #tpu.memory_space<vmem>>, vector<64x16xf32>
    %cst_68 = arith.constant dense<0.000000e+00> : vector<48x16xf32>
    %244 = tpu.matmul %238, %243, %cst_68 {dimension_numbers = #tpu.dot_dimension_numbers<[1], [0], [0], [1], [0, 0, 1, 1], [], []>} : vector<48x64xf32>, vector<64x16xf32>, vector<48x16xf32> -> vector<48x16xf32>
    %c192 = arith.constant 192 : index
    %c0_69 = arith.constant 0 : index
    %245 = vector.load %arg5[%c192, %c0_69] : memref<256x16xf32, #tpu.memory_space<vmem>>, vector<64x16xf32>
    %cst_70 = arith.constant dense<0.000000e+00> : vector<48x16xf32>
    %246 = tpu.matmul %238, %245, %cst_70 {dimension_numbers = #tpu.dot_dimension_numbers<[1], [0], [0], [1], [0, 0, 1, 1], [], []>} : vector<48x64xf32>, vector<64x16xf32>, vector<48x16xf32> -> vector<48x16xf32>
    %247 = tpu.concatenate %240, %242, %244, %246 in 0 : vector<48x16xf32>, vector<48x16xf32>, vector<48x16xf32>, vector<48x16xf32> -> vector<192x16xf32>
    %cst_71 = arith.constant dense<0.000000e+00> : vector<48x16xf32>
    %248 = tpu.matmul %8, %247, %cst_71 {dimension_numbers = #tpu.dot_dimension_numbers<[1], [0], [0], [1], [0, 0, 1, 1], [], []>} : vector<48x192xf32>, vector<192x16xf32>, vector<48x16xf32> -> vector<48x16xf32>
    %249 = vector.broadcast %11 : vector<48x1xf32> to vector<48x16xf32>
    %250 = arith.addf %248, %249 : vector<48x16xf32>
    %c0_72 = arith.constant 0 : index
    %c0_73 = arith.constant 0 : index
    %c0_74 = arith.constant 0 : index
    %251 = vector.load %arg8[%c0_72, %c0_73, %c0_74] : memref<1x48x16xf32, #tpu.memory_space<vmem>>, vector<1x48x16xf32>
    %252 = vector.shape_cast %251 : vector<1x48x16xf32> to vector<48x16xf32>
    %253 = vector.shape_cast %250 : vector<48x16xf32> to vector<1x48x16xf32>
    tpu.vector_store %arg8[%c0_72, %c0_73, %c0_74], %253 {strides = array<i32>} : memref<1x48x16xf32, #tpu.memory_space<vmem>>, vector<1x48x16xf32>,
    return
  }
  func.func @transform_0(%arg0: i32) -> (i32, i32, i32) {
    %c0_i32 = arith.constant 0 : i32
    %c0_i32_0 = arith.constant 0 : i32
    %c0_i32_1 = arith.constant 0 : i32
    return %arg0, %c0_i32, %c0_i32_0 : i32, i32, i32
  }
  func.func @transform_1(%arg0: i32) -> (i32, i32) {
    %c0_i32 = arith.constant 0 : i32
    %c0_i32_0 = arith.constant 0 : i32
    %c0_i32_1 = arith.constant 0 : i32
    return %c0_i32, %c0_i32_0 : i32, i32
  }
  func.func @transform_2(%arg0: i32) -> (i32, i32) {
    %c0_i32 = arith.constant 0 : i32
    %c0_i32_0 = arith.constant 0 : i32
    %c0_i32_1 = arith.constant 0 : i32
    return %c0_i32, %c0_i32_0 : i32, i32
  }
  func.func @transform_3(%arg0: i32) -> (i32, i32) {
    %c0_i32 = arith.constant 0 : i32
    %c0_i32_0 = arith.constant 0 : i32
    %c0_i32_1 = arith.constant 0 : i32
    return %c0_i32, %c0_i32_0 : i32, i32
  }
  func.func @transform_4(%arg0: i32) -> (i32, i32) {
    %c0_i32 = arith.constant 0 : i32
    %c0_i32_0 = arith.constant 0 : i32
    %c0_i32_1 = arith.constant 0 : i32
    return %c0_i32, %c0_i32_0 : i32, i32
  }
  func.func @transform_5(%arg0: i32) -> (i32, i32) {
    %c0_i32 = arith.constant 0 : i32
    %c0_i32_0 = arith.constant 0 : i32
    %c0_i32_1 = arith.constant 0 : i32
    return %c0_i32, %c0_i32_0 : i32, i32
  }
  func.func @transform_6(%arg0: i32) -> (i32, i32) {
    %c0_i32 = arith.constant 0 : i32
    %c0_i32_0 = arith.constant 0 : i32
    %c0_i32_1 = arith.constant 0 : i32
    return %c0_i32, %c0_i32_0 : i32, i32
  }
  func.func @transform_7(%arg0: i32) -> (i32, i32, i32) {
    %c0_i32 = arith.constant 0 : i32
    %c0_i32_0 = arith.constant 0 : i32
    %c0_i32_1 = arith.constant 0 : i32
    return %arg0, %c0_i32, %c0_i32_0 : i32, i32, i32
  }
}

</mosaic_0001>

<bundles_post_ra>
// kernel: conv_patch_embed_forward.1
= control target key start
LH: loop header
LB: loop body
LE: loop exit
PB: predicated region body
PF: predicated region fallthrough
CT: control target
= control target key end

     0   :  { %s6201_s24 = smov 0   ;;  %s7815_s0 = inlined_call_operand.vmem [shape: f32[2,1,256], index: 0, kind: input, shape index: {}]   ;;  %s7816_s1 = inlined_call_operand.vmem [shape: f32[4,64], index: 1, kind: input, shape index: {}]   ;;  %s7817_s2 = inlined_call_operand.vmem [shape: f32[48,663], index: 2, kind: input, shape index: {}]   ;;  %s7818_s3 = inlined_call_operand.vmem [shape: f32[1024,64], index: 3, kind: input, shape index: {}]   ;;  %s7819_s4 = inlined_call_operand.vmem [shape: f32[256,16], index: 4, kind: input, shape index: {}]   ;;  %s7820_s5 = inlined_call_operand.vmem [shape: f32[2,256], index: 5, kind: input, shape index: {}]   ;;  %s7821_s6 = inlined_call_operand.vmem [shape: f32[2,64], index: 6, kind: input, shape index: {}]   ;;  %s7822_s7 = inlined_call_operand.vmem [shape: f32[2,48,16], index: 7, kind: output, shape index: {}]  }
   0x1 LB: > { %s4780_s25 = sadd.s32 4294967295, %s6104_s24   ;;  %p4784_p0 = scmp.ge.s32.totalorder %s6104_s24, 1  ;;  %s6104_s24 = sphi %s6201_s24, %s17_s24  }
   0x2   : > { %p236_p1 = scmp.lt.s32.totalorder %s6104_s24, 3 }
   0x4   : > { %p237_p2 = pnand %p4784_p0, %p236_p1 }
   0x5   : > { %v6212_v0 = vld [vmem:[%s7816_s1] sm:$0xf] (!%p237_p2)  ;;  %v320_v1 = vlaneseq (!%p237_p2)  ;;  %p267_p3 = scmp.lt.s32.totalorder (!%p237_p2), %s4780_s25, 1  ;;  %v6106_v2 = vmov (!%p237_p2), 1   ;;  %v6107_v5 = vmov (!%p237_p2), 3   ;;  %v6108_v8 = vmov (!%p237_p2), 2  }
   0x6   : > { %240 = sbr.rel (%p237_p2) target bundleno = 3180 (0xc6c), region = 48  ;;  %5898 = vset.pattern.permute.xlu0 (!%p237_p2), %v6106_v2  ;;  %v4787_v4 = vld [vmem:[%s7820_s5 + $0x1] ss:$2 sm:$0x3] (!%p237_p2)  ;;  %5900 = vset.pattern.permute.xlu1 (!%p237_p2), %v6107_v5  ;;  %s6109_s11 = smov (!%p237_p2), 2   ;;  %v6111_v16 = vmov (!%p237_p2), 4  }
   0x7   : > { %443 = vperm.xlu0 (!%p237_p2), %5898, %v6212_v0   ;;  %v321_v3 = vshrl.u32 (!%p237_p2), %v320_v1, 7  ;;  %v313_v13 = vld [vmem:[%s7820_s5] ss:$2 sm:$0x3] (!%p237_p2)  ;;  %s6110_s14 = smov (!%p237_p2), 17   ;;  %s6112_s15 = smov (!%p237_p2), 16  }
   0x8   : > { %s6113_s16 = smov (!%p237_p2), 18   ;;  %v6114_v18 = vmov (!%p237_p2), 7   ;;  %v6115_v19 = vmov (!%p237_p2), 5   ;;  %s6116_s17 = smov (!%p237_p2), 32   ;;  %v6117_v20 = vmov (!%p237_p2), 6   ;;  %v6119_v21 = vmov (!%p237_p2), 61  }
   0x9   : > { %v6220_v6 = vsub.s32 (!%p237_p2), 0, %v321_v3  ;;  %v326_v7 = vsub.s32 (!%p237_p2), 1, %v321_v3  ;;  %s6118_s18 = smov (!%p237_p2), 34   ;;  %v6120_v22 = vmov (!%p237_p2), 8   ;;  %v6121_v23 = vmov (!%p237_p2), 0   ;;  %s6122_s19 = smov (!%p237_p2), 127  }
   0xa   : > { %vm332_vm0 = vcmask (!%p237_p2), 138240   ;;  %vm365_vm1 = vcmask (!%p237_p2), 15360   ;;  %s6123_s20 = smov (!%p237_p2), 126   ;;  %vm377_vm2 = vcmask (!%p237_p2), 130048   ;;  %s6124_s21 = smov (!%p237_p2), 112   ;;  %vm389_vm3 = vcmask (!%p237_p2), 146432  }
   0xb   : > { %5899 = vset.pattern.permute.xlu0 (!%p237_p2), %v6108_v8  ;;  %v356_v9 = vrot.slane (!%p237_p2), %v4787_v4, %v6220_v6  ;;  %v360_v11 = vrot.slane (!%p237_p2), %v4787_v4, %v326_v7  ;;  %v6235_v14 = vrot.slane (!%p237_p2), %v313_v13, %v6220_v6  ;;  %v6243_v17 = vrot.slane (!%p237_p2), %v313_v13, %v326_v7  ;;  %s6125_s22 = smov (!%p237_p2), 111   ;;  %s6126_s23 = smov (!%p237_p2), 110  }
   0xc   : > { %478 = vperm.xlu0 (!%p237_p2), %5899, %v6212_v0   ;;  %vm401_vm4 = vcmask (!%p237_p2), 261120   ;;  %vm413_vm5 = vcmask (!%p237_p2), 277504   ;;  %s6127_s26 = smov (!%p237_p2), 96   ;;  %s6128_s27 = smov (!%p237_p2), 95   ;;  %vm470_vm6 = vcmask (!%p237_p2), 1039360   ;;  %vm505_vm7 = vcmask (!%p237_p2), 1031168  }
   0xd   : > { %s7824_s25 = smov (!%p267_p3, %s4780_s25), 1  ;;  %361 = vrot.lane.b32.xlu1 %v356_v9, %s6109_s11  ;;  %s6129_s28 = smov 94   ;;  %vm540_vm8 = vcmask 916480   ;;  %vm563_vm9 = vcmask 908288   ;;  %vm598_vm10 = vcmask 900096   ;;  %vm633_vm11 = vcmask 785408  }
   0xe   : > { %s4785_s30 = sshll.u32 %s7824_s25, 1  ;;  %vm656_vm12 = vcmask 777216   ;;  %vm691_vm13 = vcmask 769024   ;;  %vm734_vm14 = vcmask 1043456   ;;  %s6131_s29 = smov 115   ;;  %vm731_vm15 = vcmask 31744  }
   0xf   : > { %s270_s10 = scalar_lea.vmem %s7815_s0, %s4785_s30  ;;  %s6132_s30 = smov 107  }
  0x10   : > { %v318_v10 = vld [vmem:[%s270_s10] sm:$0x3]  ;;  %363 = vrot.lane.b32.xlu0 %v360_v11, %s6109_s11  ;;  %s6133_s8 = smov 103   ;;  %s6134_s9 = smov 99  }
  0x11   : > { %v323_v12 = vrot.slane %v318_v10, %v6220_v6  ;;  %v327_v15 = vrot.slane %v318_v10, %v326_v7  ;;  %5901 = vset.pattern.permute.xlu0 %v6111_v16  ;;  %s6135_s10 = smov 91   ;;  %s6137_s12 = smov 119  }
  0x12   : > { %s6138_s13 = smov 87  }
  0x13   : > { %328 = vrot.lane.b32.xlu1 %v323_v12, %s6110_s14 }
  0x14   : > { %373 = vrot.lane.b32.xlu0 %v6235_v14, %s6112_s15 }
  0x17   : > { %330 = vrot.lane.b32.xlu1 %v327_v15, %s6110_s14 }
  0x18   : > { %548 = vperm.xlu0 %5901, %v6212_v0  }
  0x1b   : > { %513 = vperm.xlu1 %5900, %v6212_v0  }
  0x1c   : > { %387 = vrot.lane.b32.xlu0 %v360_v11, %s6113_s16 }
  0x1d   : > { %5904 = vset.pattern.permute.xlu0 %v6114_v18 }
  0x1f   : > { %375 = vrot.lane.b32.xlu1 %v6243_v17, %s6112_s15 }
  0x20   : > { %5902 = vset.pattern.permute.xlu1 %v6115_v19  ;;  %397 = vrot.lane.b32.xlu0 %v6235_v14, %s6116_s17 }
  0x23   : > { %571 = vperm.xlu1 %5902, %v6212_v0  }
  0x24   : > { %641 = vperm.xlu0 %5904, %v6212_v0  }
  0x27   : > { %385 = vrot.lane.b32.xlu1 %v356_v9, %s6113_s16 }
  0x28   : > { %5903 = vset.pattern.permute.xlu1 %v6117_v20  ;;  %411 = vrot.lane.b32.xlu0 %v360_v11, %s6118_s18 }
  0x29   : > { %5907 = vset.pattern.permute.xlu0 %v6119_v21 }
  0x2b   : > { %606 = vperm.xlu1 %5903, %v6212_v0  }
  0x2c   : > { %437 = vperm.xlu0 %5907, %v6212_v0  }
  0x2f   : > { %399 = vrot.lane.b32.xlu1 %v6243_v17, %s6116_s17  ;;  %s6156_s17 = smov 92  }
  0x30   : > { %5905 = vset.pattern.permute.xlu1 %v6120_v22 }
  0x33   : > { %664 = vperm.xlu1 %5905, %v6212_v0  }
  0x37   : > { %409 = vrot.lane.b32.xlu1 %v356_v9, %s6118_s18  ;;  %s6139_s18 = smov 83  }
  0x38   : > { %5906 = vset.pattern.permute.xlu1 %v6121_v23 }
  0x3b   : > { %423 = vperm.xlu1 %5906, %v6212_v0  }
  0x7f   : > { %v6257_v24 = vpop.permute.xlu1 %361 }
  0x85   : > { %v329_v25 = vpop.permute.xlu1 %328 }
  0x86   : > { %v6260_v26 = vsel %vm332_vm0, 0.0, %v329_v25  ;;  %v444_v28 = vpop.permute.xlu0 %443 }
  0x87   : > { %v6264_v27 = vrot.slane %v6260_v26, %v6220_v6  ;;  %v370_v35 = vmul.f32 %v6257_v24, %v6260_v26 }
  0x89   : > { %v331_v29 = vpop.permute.xlu1 %330  ;;  %v458_v30 = vmul.f32 %v6264_v27, %v444_v28  ;;  %v484_v39 = vrot.slane %v370_v35, %v6220_v6 }
  0x8a   : > { %v6268_v31 = vsel %vm332_vm0, %v329_v25, %v331_v29  ;;  %v6271_v32 = vsel %vm332_vm0, %v331_v29, 0.0 }
  0x8b   : > { %464 = vrot.lane.b32.xlu1 %v458_v30, %s6122_s19  ;;  %v6276_v33 = vrot.slane %v6271_v32, %v6220_v6  ;;  %v6280_v34 = vrot.slane %v6268_v31, %v6220_v6  ;;  %v479_v36 = vpop.permute.xlu0 %478 }
  0x8c   : > { %v493_v41 = vmul.f32 %v484_v39, %v479_v36 }
  0x8d   : > { %v460_v37 = vmul.f32 %v6276_v33, %v444_v28  ;;  %v459_v38 = vmul.f32 %v6280_v34, %v444_v28 }
  0x8f   : > { %468 = vrot.lane.b32.xlu0 %v460_v37, %s6122_s19  ;;  %466 = vrot.lane.b32.xlu1 %v459_v38, %s6122_s19  ;;  %v6289_v40 = vpop.permute.xlu0 %363 }
  0x90   : > { %v6293_v42 = vsel %vm365_vm1, %v6257_v24, %v6289_v40  ;;  %v372_v43 = vmul.f32 %v6289_v40, %v6271_v32  ;;  %vm2277_vm1 = vcmask 72704  }
  0x91   : > { %v371_v44 = vmul.f32 %v6293_v42, %v6268_v31 }
  0x92   : > { %v492_v45 = vrot.slane %v372_v43, %v6220_v6 }
  0x93   : > { %499 = vrot.lane.b32.xlu1 %v493_v41, %s6123_s20  ;;  %v6301_v46 = vpop.permute.xlu0 %373  ;;  %v488_v47 = vrot.slane %v371_v44, %v6220_v6 }
  0x94   : > { %v382_v48 = vmul.f32 %v6301_v46, %v6260_v26  ;;  %v495_v49 = vmul.f32 %v492_v45, %v479_v36 }
  0x95   : > { %v494_v50 = vmul.f32 %v488_v47, %v479_v36 }
  0x96   : > { %v519_v51 = vrot.slane %v382_v48, %v6220_v6 }
  0x97   : > { %503 = vrot.lane.b32.xlu1 %v495_v49, %s6123_s20  ;;  %501 = vrot.lane.b32.xlu0 %v494_v50, %s6123_s20  ;;  %v549_v54 = vpop.permute.xlu0 %548 }
  0x98   : > { %v552_v7 = vmul.f32 %v549_v54, %v6280_v34  ;;  %v551_v9 = vmul.f32 %v549_v54, %v6264_v27  ;;  %v553_v16 = vmul.f32 %v549_v54, %v6276_v33 }
  0x9a   : > { %v514_v52 = vpop.permute.xlu1 %513 }
  0x9b   : > { %v528_v53 = vmul.f32 %v519_v51, %v514_v52  ;;  %v6323_v63 = vpop.permute.xlu0 %387 }
  0x9c   : > { %v396_v3 = vmul.f32 %v6323_v63, %v6271_v32 }
  0x9d   : > { %534 = vrot.lane.b32.xlu0 %v528_v53, %s6124_s21 }
  0x9e   : > { %v6310_v55 = vpop.permute.xlu1 %375  ;;  %v585_v15 = vrot.slane %v396_v3, %v6220_v6 }
  0x9f   : > { %v6315_v56 = vsel %vm377_vm2, %v6301_v46, %v6310_v55  ;;  %v384_v57 = vmul.f32 %v6310_v55, %v6271_v32  ;;  %v6343_v11 = vpop.permute.xlu0 %397 }
  0xa0   : > { %v383_v58 = vmul.f32 %v6315_v56, %v6268_v31  ;;  %v406_v19 = vmul.f32 %v6343_v11, %v6260_v26 }
  0xa1   : > { %v527_v59 = vrot.slane %v384_v57, %v6220_v6 }
  0xa2   : > { %v572_v60 = vpop.permute.xlu1 %571  ;;  %v523_v61 = vrot.slane %v383_v58, %v6220_v6  ;;  %v612_v35 = vrot.slane %v406_v19, %v6220_v6 }
  0xa3   : > { %v530_v62 = vmul.f32 %v527_v59, %v514_v52  ;;  %v588_v22 = vmul.f32 %v585_v15, %v572_v60  ;;  %v642_v23 = vpop.permute.xlu0 %641  ;;  %v351_v15 = vmul.f32 %v6243_v17, %v6268_v31 }
  0xa4   : > { %v529_v1 = vmul.f32 %v523_v61, %v514_v52  ;;  %v644_v49 = vmul.f32 %v642_v23, %v6264_v27  ;;  %v645_v50 = vmul.f32 %v642_v23, %v6280_v34  ;;  %v646_v51 = vmul.f32 %v642_v23, %v6276_v33 }
  0xa5   : > { %538 = vrot.lane.b32.xlu0 %v530_v62, %s6124_s21  ;;  %v433_v23 = vrot.slane %v351_v15, %v6220_v6 }
  0xa6   : > { %536 = vrot.lane.b32.xlu1 %v529_v1, %s6124_s21  ;;  %v6327_v2 = vpop.permute.xlu1 %385 }
  0xa7   : > { %v6333_v4 = vsel %vm389_vm3, %v6327_v2, %v6323_v63  ;;  %v394_v5 = vmul.f32 %v6327_v2, %v6260_v26  ;;  %v6368_v41 = vpop.permute.xlu0 %411  ;;  %vm2279_vm3 = vcmask 596992  }
  0xa8   : > { %v395_v8 = vmul.f32 %v6333_v4, %v6268_v31  ;;  %v420_v54 = vmul.f32 %v6368_v41, %v6271_v32 }
  0xa9   : > { %559 = vrot.lane.b32.xlu0 %v552_v7, %s6125_s22  ;;  %v577_v10 = vrot.slane %v394_v5, %v6220_v6 }
  0xaa   : > { %557 = vrot.lane.b32.xlu1 %v551_v9, %s6125_s22  ;;  %v607_v12 = vpop.permute.xlu1 %606  ;;  %v581_v18 = vrot.slane %v395_v8, %v6220_v6  ;;  %v678_v33 = vrot.slane %v420_v54, %v6220_v6 }
  0xab   : > { %v586_v13 = vmul.f32 %v577_v10, %v572_v60  ;;  %v621_v37 = vmul.f32 %v612_v35, %v607_v12  ;;  %v350_v10 = vmul.f32 %v6235_v14, %v6260_v26 }
  0xac   : > { %v587_v29 = vmul.f32 %v581_v18, %v572_v60  ;;  %v438_v60 = vpop.permute.xlu0 %437 }
  0xad   : > { %592 = vrot.lane.b32.xlu0 %v586_v13, %s6126_s23 }
  0xae   : > { %561 = vrot.lane.b32.xlu1 %v553_v16, %s6125_s22  ;;  %v6353_v20 = vpop.permute.xlu1 %399  ;;  %v429_v16 = vrot.slane %v350_v10, %v6220_v6 }
  0xaf   : > { %v6357_v21 = vsel %vm401_vm4, %v6343_v11, %v6353_v20  ;;  %v408_v28 = vmul.f32 %v6353_v20, %v6271_v32  ;;  %vm3850_vm4 = vcmask 752640  }
  0xb0   : > { %v407_v25 = vmul.f32 %v6357_v21, %v6268_v31 }
  0xb1   : > { %596 = vrot.lane.b32.xlu0 %v588_v22, %s6126_s23  ;;  %v620_v39 = vrot.slane %v408_v28, %v6220_v6 }
  0xb2   : > { %594 = vrot.lane.b32.xlu1 %v587_v29, %s6126_s23  ;;  %v665_v30 = vpop.permute.xlu1 %664  ;;  %v616_v36 = vrot.slane %v407_v25, %v6220_v6 }
  0xb3   : > { %v623_v48 = vmul.f32 %v620_v39, %v607_v12  ;;  %v681_v34 = vmul.f32 %v678_v33, %v665_v30 }
  0xb4   : > { %v622_v38 = vmul.f32 %v616_v36, %v607_v12 }
  0xb6   : > { %627 = vrot.lane.b32.xlu1 %v621_v37, %s6127_s26  ;;  %629 = vrot.lane.b32.xlu0 %v622_v38, %s6127_s26  ;;  %v6372_v43 = vpop.permute.xlu1 %409 }
  0xb7   : > { %v6376_v44 = vsel %vm413_vm5, %v6372_v43, %v6368_v41  ;;  %v418_v45 = vmul.f32 %v6372_v43, %v6260_v26  ;;  %vm3887_vm5 = vcmask 392192  }
  0xb8   : > { %v419_v47 = vmul.f32 %v6376_v44, %v6268_v31 }
  0xb9   : > { %v670_v52 = vrot.slane %v418_v45, %v6220_v6 }
  0xba   : > { %631 = vrot.lane.b32.xlu1 %v623_v48, %s6127_s26  ;;  %650 = vrot.lane.b32.xlu0 %v644_v49, %s6128_s27  ;;  %v674_v53 = vrot.slane %v419_v47, %v6220_v6  ;;  %v424_v58 = vpop.permute.xlu1 %423 }
  0xbb   : > { %v679_v27 = vmul.f32 %v670_v52, %v665_v30  ;;  %v434_v19 = vmul.f32 %v429_v16, %v424_v58  ;;  %v435_v29 = vmul.f32 %v433_v23, %v424_v58 }
  0xbc   : > { %v680_v57 = vmul.f32 %v674_v53, %v665_v30 }
  0xbd   : > { %v440_v30 = vadd.f32 %v438_v60, %v434_v19  ;;  %v441_v39 = vadd.f32 %v438_v60, %v435_v29 }
  0xbe   : > { %652 = vrot.lane.b32.xlu1 %v645_v50, %s6128_s27  ;;  %654 = vrot.lane.b32.xlu0 %v646_v51, %s6128_s27 }
  0xc2   : > { %685 = vrot.lane.b32.xlu1 %v679_v27, %s6129_s28  ;;  %687 = vrot.lane.b32.xlu0 %v680_v57, %s6129_s28 }
  0xc6   : > { %689 = vrot.lane.b32.xlu1 %v681_v34, %s6129_s28 }
  0xfd   : > { %v465_v59 = vpop.permute.xlu1 %464 }
 0x101   : > { %v467_v32 = vpop.permute.xlu1 %466  ;;  %v469_v61 = vpop.permute.xlu0 %468 }
 0x102   : > { %v471_v28 = vsel %vm470_vm6, %v465_v59, %v467_v32  ;;  %v472_v37 = vsel %vm470_vm6, %v467_v32, %v469_v61 }
 0x103   : > { %v475_v35 = vadd.f32 %v471_v28, %v440_v30  ;;  %v476_v48 = vadd.f32 %v472_v37, %v441_v39  ;;  %v6130_v28 = vmov 0.0  }
 0x104   : > { %900 = vmatprep.mubr.f32.mxu0 %v6130_v28  ;;  %805 = vmatprep.mubr.f32.mxu1 %v6130_v28 }
 0x105   : > { %v500_v1 = vpop.permute.xlu1 %499 }
 0x109   : > { %v502_v62 = vpop.permute.xlu0 %501  ;;  %v504_v5 = vpop.permute.xlu1 %503 }
 0x10a   : > { %v506_v26 = vsel %vm505_vm7, %v500_v1, %v502_v62  ;;  %v507_v6 = vsel %vm505_vm7, %v502_v62, %v504_v5 }
 0x10b   : > { %v510_v45 = vadd.f32 %v506_v26, %v475_v35  ;;  %v511_v54 = vadd.f32 %v507_v6, %v476_v48 }
 0x10f   : > { %v535_v3 = vpop.permute.xlu0 %534 }
 0x117   : > { %v539_v7 = vpop.permute.xlu0 %538 }
 0x118   : > { %v537_v8 = vpop.permute.xlu1 %536 }
 0x119   : > { %v541_v38 = vsel %vm540_vm8, %v535_v3, %v537_v8  ;;  %v542_v52 = vsel %vm540_vm8, %v537_v8, %v539_v7 }
 0x11a   : > { %v545_v49 = vadd.f32 %v541_v38, %v510_v45  ;;  %v546_v34 = vadd.f32 %v542_v52, %v511_v54 }
 0x11b   : > { %v560_v9 = vpop.permute.xlu0 %559 }
 0x11c   : > { %v558_v12 = vpop.permute.xlu1 %557 }
 0x11d   : > { %v564_v47 = vsel %vm563_vm9, %v558_v12, %v560_v9 }
 0x11e   : > { %v568_v27 = vadd.f32 %v564_v47, %v545_v49 }
 0x11f   : > { %v593_v13 = vpop.permute.xlu0 %592 }
 0x120   : > { %v562_v18 = vpop.permute.xlu1 %561 }
 0x121   : > { %v565_v57 = vsel %vm563_vm9, %v560_v9, %v562_v18 }
 0x122   : > { %v569_v62 = vadd.f32 %v565_v57, %v546_v34 }
 0x123   : > { %v597_v22 = vpop.permute.xlu0 %596 }
 0x124   : > { %v595_v25 = vpop.permute.xlu1 %594 }
 0x125   : > { %v599_v53 = vsel %vm598_vm10, %v593_v13, %v595_v25  ;;  %v600_v32 = vsel %vm598_vm10, %v595_v25, %v597_v22 }
 0x126   : > { %v603_v58 = vadd.f32 %v599_v53, %v568_v27  ;;  %v604_v5 = vadd.f32 %v600_v32, %v569_v62 }
 0x128   : > { %v630_v31 = vpop.permute.xlu0 %629  ;;  %v628_v36 = vpop.permute.xlu1 %627 }
 0x129   : > { %v634_v33 = vsel %vm633_vm11, %v628_v36, %v630_v31 }
 0x12a   : > { %v638_v1 = vadd.f32 %v634_v33, %v603_v58 }
 0x12c   : > { %v651_v50 = vpop.permute.xlu0 %650  ;;  %v632_v51 = vpop.permute.xlu1 %631 }
 0x12d   : > { %v635_v3 = vsel %vm633_vm11, %v630_v31, %v632_v51 }
 0x12e   : > { %v639_v13 = vadd.f32 %v635_v3, %v604_v5 }
 0x130   : > { %v655_v59 = vpop.permute.xlu0 %654  ;;  %v653_v60 = vpop.permute.xlu1 %652 }
 0x131   : > { %v657_v61 = vsel %vm656_vm12, %v651_v50, %v653_v60  ;;  %v658_v9 = vsel %vm656_vm12, %v653_v60, %v655_v59 }
 0x132   : > { %v661_v7 = vadd.f32 %v657_v61, %v638_v1  ;;  %v662_v16 = vadd.f32 %v658_v9, %v639_v13 }
 0x134   : > { %v688_v8 = vpop.permute.xlu0 %687  ;;  %v686_v10 = vpop.permute.xlu1 %685 }
 0x135   : > { %v692_v12 = vsel %vm691_vm13, %v686_v10, %v688_v8 }
 0x136   : > { %v696_v15 = vadd.f32 %v692_v12, %v661_v7 }
 0x138   : > { %v698_v18 = vmax.f32 %v696_v15, 0.0  ;;  %v690_v19 = vpop.permute.xlu1 %689 }
 0x139   : > { %v693_v22 = vsel %vm691_vm13, %v688_v8, %v690_v19 }
 0x13a   : > { %v697_v23 = vadd.f32 %v693_v22, %v662_v16  ;;  %702 = vrot.lane.b32.xlu0 %v698_v18, %s6110_s14 }
 0x13c   : > { %v699_v25 = vmax.f32 %v697_v23, 0.0 }
 0x13e   : > { %704 = vrot.lane.b32.xlu1 %v699_v25, %s6110_s14  ;;  %s6145_s14 = smov 8  }
 0x1ac   : > { %v703_v29 = vpop.permute.xlu0 %702 }
 0x1ad   : > { %v710_v30 = vsel %vm332_vm0, 0.0, %v703_v29 }
 0x1ae   : > { %v712_v37 = vmul.f32 %v710_v30, %v6235_v14  ;;  %v714_v14 = vmul.f32 %v710_v30, %v6257_v24 }
 0x1b0   : > { %v705_v26 = vpop.permute.xlu1 %704 }
 0x1b1   : > { %v706_v35 = vsel %vm332_vm0, %v703_v29, %v705_v26  ;;  %v711_v31 = vsel %vm332_vm0, %v705_v26, 0.0  ;;  %vm6141_vm0 = vmmov 0  }
 0x1b2   : > { %826 = vrot.lane.b32.xlu1 %v711_v31, %s6122_s19  ;;  %824 = vrot.lane.b32.xlu0 %v706_v35, %s6122_s19  ;;  %v713_v36 = vmul.f32 %v706_v35, %v6243_v17  ;;  %v716_v38 = vmul.f32 %v711_v31, %v6289_v40  ;;  %v715_v39 = vmul.f32 %v706_v35, %v6293_v42 }
 0x1b3   : > { %v719_v17 = vmul.f32 %v711_v31, %v6310_v55  ;;  %v718_v45 = vmul.f32 %v706_v35, %v6315_v56  ;;  %v717_v40 = vmul.f32 %v710_v30, %v6301_v46  ;;  %v722_v24 = vmul.f32 %v711_v31, %v6323_v63 }
 0x1b4   : > { %4788 = vmatprep.subr.msk.mxu1 %vm734_vm14, %v713_v36  ;;  %v721_v42 = vmul.f32 %v706_v35, %v6333_v4  ;;  %v720_v46 = vmul.f32 %v710_v30, %v6327_v2  ;;  %v725_v55 = vmul.f32 %v711_v31, %v6353_v20  ;;  %v724_v56 = vmul.f32 %v706_v35, %v6357_v21  ;;  %v1565_v36 = vld [vmem:[%s7818_s3 + $0x80] sm:$0xff] }
 0x1b5   : > { %4789 = vmatpush1.msk.msra.mxu1 %vm734_vm14, %v712_v37  ;;  %v723_v63 = vmul.f32 %v710_v30, %v6343_v11  ;;  %v6136_v2 = vmov 62   ;;  %v728_v4 = vmul.f32 %v711_v31, %v6368_v41  ;;  %v726_v11 = vmul.f32 %v710_v30, %v6372_v43  ;;  %v1566_v37 = vld [vmem:[%s7818_s3 + $0x88] sm:$0xff] }
 0x1b6   : > { %818 = vrot.lane.b32.xlu1 %v6212_v0, %s6131_s29  ;;  %822 = vrot.lane.b32.xlu0 %v710_v30, %s6122_s19  ;;  %v727_v20 = vmul.f32 %v706_v35, %v6376_v44 }
 0x1b7   : > { %5243 = vmatprep.subr.mxu1 %v6130_v28  ;;  %5908 = vset.pattern.permute.xlu1 %v6136_v2  ;;  %v1552_v2 = vld [vmem:[%s7818_s3 + $0x18] sm:$0xff] }
 0x1ba   : > { %918 = vrot.lane.b32.xlu1 %v716_v38, %s6123_s20  ;;  %916 = vrot.lane.b32.xlu0 %v715_v39, %s6123_s20  ;;  %v1549_v38 = vld [vmem:[%s7818_s3] sm:$0xff]  ;;  %v1550_v39 = vld [vmem:[%s7818_s3 + $0x8] sm:$0xff] }
 0x1be   : > { %909 = vrot.lane.b32.xlu1 %v6212_v0, %s6125_s22  ;;  %914 = vrot.lane.b32.xlu0 %v714_v14, %s6123_s20 }
 0x1c2   : > { %1010 = vrot.lane.b32.xlu1 %v719_v17, %s6124_s21  ;;  %1008 = vrot.lane.b32.xlu0 %v718_v45, %s6124_s21  ;;  %v5462_v45 = vpack.c.bf16 %v1566_v37, %v1565_v36 }
 0x1c6   : > { %1001 = vrot.lane.b32.xlu1 %v6212_v0, %s6132_s30  ;;  %1006 = vrot.lane.b32.xlu0 %v717_v40, %s6124_s21  ;;  %v1567_v40 = vld [vmem:[%s7818_s3 + $0x90] sm:$0xff] }
 0x1ca   : > { %1099 = vrot.lane.b32.xlu1 %v711_v31, %s6125_s22  ;;  %1097 = vrot.lane.b32.xlu0 %v706_v35, %s6125_s22 }
 0x1ce   : > { %1093 = vrot.lane.b32.xlu1 %v6212_v0, %s6133_s8  ;;  %1095 = vrot.lane.b32.xlu0 %v710_v30, %s6125_s22  ;;  %s6153_s8 = smov 104  }
 0x1d2   : > { %1191 = vrot.lane.b32.xlu1 %v722_v24, %s6126_s23  ;;  %1189 = vrot.lane.b32.xlu0 %v721_v42, %s6126_s23  ;;  %v1568_v24 = vld [vmem:[%s7818_s3 + $0x98] sm:$0xff] }
 0x1d6   : > { %1182 = vrot.lane.b32.xlu1 %v6212_v0, %s6134_s9  ;;  %1187 = vrot.lane.b32.xlu0 %v720_v46, %s6126_s23  ;;  %s6154_s9 = smov 100  }
 0x1da   : > { %1283 = vrot.lane.b32.xlu1 %v725_v55, %s6127_s26  ;;  %1281 = vrot.lane.b32.xlu0 %v724_v56, %s6127_s26  ;;  %v5464_v55 = vpack.c.bf16 %v1550_v39, %v1549_v38  ;;  %v5466_v56 = vpack.c.bf16 %v1568_v24, %v1567_v40  ;;  %v1733_v38 = vld [vmem:[%s7818_s3 + $0x100] sm:$0xff]  ;;  %v1734_v39 = vld [vmem:[%s7818_s3 + $0x108] sm:$0xff] }
 0x1db   : > { %v5496_v40 = vpack.c.bf16 %v1734_v39, %v1733_v38  ;;  %v2097_v38 = vld [vmem:[%s7818_s3 + $0x320] sm:$0xff]  ;;  %v2098_v39 = vld [vmem:[%s7818_s3 + $0x328] sm:$0xff] }
 0x1de   : > { %1274 = vrot.lane.b32.xlu1 %v6212_v0, %s6128_s27  ;;  %1279 = vrot.lane.b32.xlu0 %v723_v63, %s6127_s26  ;;  %v1551_v63 = vld [vmem:[%s7818_s3 + $0x10] sm:$0xff] }
 0x1e2   : > { %1372 = vrot.lane.b32.xlu1 %v711_v31, %s6128_s27  ;;  %1370 = vrot.lane.b32.xlu0 %v706_v35, %s6128_s27 }
 0x1e6   : > { %1366 = vrot.lane.b32.xlu1 %v6212_v0, %s6135_s10  ;;  %1368 = vrot.lane.b32.xlu0 %v710_v30, %s6128_s27  ;;  %s6140_s27 = smov 79   ;;  %s6142_s10 = smov 75  }
 0x1ea   : > { %1464 = vrot.lane.b32.xlu1 %v728_v4, %s6129_s28  ;;  %729 = vrot.lane.b32.xlu0 %v6212_v0, %s6137_s12 }
 0x1ee   : > { %1460 = vrot.lane.b32.xlu1 %v726_v11, %s6129_s28  ;;  %1462 = vrot.lane.b32.xlu0 %v727_v20, %s6129_s28  ;;  %v1569_v11 = vld [vmem:[%s7818_s3 + $0xa0] sm:$0xff]  ;;  %v1570_v20 = vld [vmem:[%s7818_s3 + $0xa8] sm:$0xff]  ;;  %s6148_s28 = smov 9  }
 0x1f2   : > { %1455 = vrot.lane.b32.xlu0 %v6212_v0, %s6138_s13  ;;  %813 = vperm.xlu1 %5908, %v6212_v0   ;;  %s6143_s13 = smov 71  }
 0x1f6   : > { %1651 = vrot.lane.b32.xlu0 %v6212_v0, %s6139_s18  ;;  %1835 = vrot.lane.b32.xlu1 %v6212_v0, %s6140_s27  ;;  %v1751_v0 = vld [vmem:[%s7818_s3 + $0x190] sm:$0xff]  ;;  %s6146_s27 = smov 124  }
 0x224   : > { %v827_v21 = vpop.permute.xlu1 %826  ;;  %v825_v41 = vpop.permute.xlu0 %824 }
 0x225   : > { %v829_v6 = vsel %vm470_vm6, %v825_v41, %v827_v21  ;;  %v5468_v21 = vpack.c.bf16 %v1552_v2, %v1551_v63  ;;  %v1754_v63 = vld [vmem:[%s7818_s3 + $0x1a8] sm:$0xff] }
 0x226   : > { %4791 = vmatprep.subr.msk.mxu0 %vm734_vm14, %v829_v6  ;;  %v1553_v6 = vld [vmem:[%s7818_s3 + $0x20] sm:$0xff] }
 0x228   : > { %v819_v47 = vpop.permute.xlu1 %818  ;;  %v823_v48 = vpop.permute.xlu0 %822 }
 0x229   : > { %v828_v43 = vsel %vm470_vm6, %v823_v48, %v825_v41  ;;  %v5470_v41 = vpack.c.bf16 %v1570_v20, %v1569_v11  ;;  %v1571_v48 = vld [vmem:[%s7818_s3 + $0xb0] sm:$0xff]  ;;  %v1737_v11 = vld [vmem:[%s7818_s3 + $0x120] sm:$0xff]  ;;  %v1738_v20 = vld [vmem:[%s7818_s3 + $0x128] sm:$0xff]  ;;  %vm4104_vm6 = vcmask 523264  }
 0x22a   : > { %4792 = vmatpush1.msk.msra.mxu0 %vm734_vm14, %v828_v43  ;;  %v1572_v43 = vld [vmem:[%s7818_s3 + $0xb8] sm:$0xff] }
 0x22b   : > { %4793 = vmatmul.mubr.msk.f32.vlgmr.msra.gmra.mrb[0].mxu0 %vm731_vm15, %v819_v47  ;;  %v1554_v47 = vld [vmem:[%s7818_s3 + $0x28] sm:$0xff] }
 0x22c   : > { %v919_v44 = vpop.permute.xlu1 %918  ;;  %v917_v49 = vpop.permute.xlu0 %916  ;;  %992 = vmatprep.mubr.f32.mxu0 %v6130_v28 }
 0x22d   : > { %v921_v50 = vsel %vm505_vm7, %v917_v49, %v919_v44  ;;  %v5472_v44 = vpack.c.bf16 %v1554_v47, %v1553_v6  ;;  %v5504_v6 = vpack.c.bf16 %v1738_v20, %v1737_v11  ;;  %v2102_v11 = vld [vmem:[%s7818_s3 + $0x348] sm:$0xff]  ;;  %v2119_v20 = vld [vmem:[%s7818_s3 + $0x3d0] sm:$0xff] }
 0x22e   : > { %4794 = vmatprep.subr.msk.mxu0 %vm734_vm14, %v921_v50  ;;  %v1555_v50 = vld [vmem:[%s7818_s3 + $0x30] sm:$0xff] }
 0x230   : > { %v910_v51 = vpop.permute.xlu1 %909  ;;  %v915_v52 = vpop.permute.xlu0 %914 }
 0x231   : > { %v920_v53 = vsel %vm505_vm7, %v915_v52, %v917_v49  ;;  %v5474_v49 = vpack.c.bf16 %v1572_v43, %v1571_v48  ;;  %v1573_v52 = vld [vmem:[%s7818_s3 + $0xc0] sm:$0xff]  ;;  %v1739_v48 = vld [vmem:[%s7818_s3 + $0x130] sm:$0xff]  ;;  %v1740_v43 = vld [vmem:[%s7818_s3 + $0x138] sm:$0xff]  ;;  %vm4593_vm7 = vcmask 359424  }
 0x232   : > { %4795 = vmatpush1.msk.msra.mxu0 %vm734_vm14, %v920_v53  ;;  %v1574_v53 = vld [vmem:[%s7818_s3 + $0xc8] sm:$0xff] }
 0x233   : > { %4796 = vmatmul.mubr.msk.f32.vlgmr.msra.gmra.mrb[0].mxu0 %vm731_vm15, %v910_v51  ;;  %v1556_v51 = vld [vmem:[%s7818_s3 + $0x38] sm:$0xff] }
 0x234   : > { %v1011_v54 = vpop.permute.xlu1 %1010  ;;  %v1009_v27 = vpop.permute.xlu0 %1008  ;;  %1084 = vmatprep.mubr.f32.mxu0 %v6130_v28 }
 0x235   : > { %v1013_v57 = vsel %vm540_vm8, %v1009_v27, %v1011_v54  ;;  %v5476_v54 = vpack.c.bf16 %v1556_v51, %v1555_v50  ;;  %v5508_v50 = vpack.c.bf16 %v1740_v43, %v1739_v48  ;;  %v2104_v48 = vld [vmem:[%s7818_s3 + $0x358] sm:$0xff]  ;;  %v2121_v43 = vld [vmem:[%s7818_s3 + $0x3e0] sm:$0xff] }
 0x236   : > { %4797 = vmatprep.subr.msk.mxu0 %vm734_vm14, %v1013_v57  ;;  %v1557_v57 = vld [vmem:[%s7818_s3 + $0x40] sm:$0xff] }
 0x238   : > { %v1002_v33 = vpop.permute.xlu1 %1001  ;;  %v1007_v34 = vpop.permute.xlu0 %1006 }
 0x239   : > { %v1012_v58 = vsel %vm540_vm8, %v1007_v34, %v1009_v27  ;;  %v5478_v27 = vpack.c.bf16 %v1574_v53, %v1573_v52  ;;  %v1741_v52 = vld [vmem:[%s7818_s3 + $0x140] sm:$0xff]  ;;  %v1742_v53 = vld [vmem:[%s7818_s3 + $0x148] sm:$0xff] }
 0x23a   : > { %4798 = vmatpush1.msk.msra.mxu0 %vm734_vm14, %v1012_v58  ;;  %v1575_v58 = vld [vmem:[%s7818_s3 + $0xd0] sm:$0xff] }
 0x23b   : > { %4799 = vmatmul.mubr.msk.f32.vlgmr.msra.gmra.mrb[0].mxu0 %vm731_vm15, %v1002_v33  ;;  %v1558_v33 = vld [vmem:[%s7818_s3 + $0x48] sm:$0xff] }
 0x23c   : > { %v1100_v59 = vpop.permute.xlu1 %1099  ;;  %v1098_v60 = vpop.permute.xlu0 %1097  ;;  %1173 = vmatprep.mubr.f32.mxu0 %v6130_v28  ;;  %v5480_v34 = vpack.c.bf16 %v1558_v33, %v1557_v57  ;;  %v5512_v57 = vpack.c.bf16 %v1742_v53, %v1741_v52  ;;  %v2106_v52 = vld [vmem:[%s7818_s3 + $0x368] sm:$0xff]  ;;  %v2123_v53 = vld [vmem:[%s7818_s3 + $0x3f0] sm:$0xff] }
 0x23d   : > { %v1102_v32 = vsel %vm563_vm9, %v1098_v60, %v1100_v59  ;;  %v1576_v59 = vld [vmem:[%s7818_s3 + $0xd8] sm:$0xff] }
 0x23e   : > { %4800 = vmatprep.subr.msk.mxu0 %vm734_vm14, %v1102_v32  ;;  %v1559_v32 = vld [vmem:[%s7818_s3 + $0x50] sm:$0xff] }
 0x240   : > { %v1094_v61 = vpop.permute.xlu1 %1093  ;;  %v1096_v62 = vpop.permute.xlu0 %1095 }
 0x241   : > { %v1101_v1 = vsel %vm563_vm9, %v1096_v62, %v1098_v60  ;;  %v5482_v60 = vpack.c.bf16 %v1576_v59, %v1575_v58  ;;  %v1577_v62 = vld [vmem:[%s7818_s3 + $0xe0] sm:$0xff]  ;;  %v1744_v58 = vld [vmem:[%s7818_s3 + $0x158] sm:$0xff] }
 0x242   : > { %4801 = vmatpush1.msk.msra.mxu0 %vm734_vm14, %v1101_v1  ;;  %v1761_v59 = vld [vmem:[%s7818_s3 + $0x1e0] sm:$0xff] }
 0x243   : > { %4802 = vmatmul.mubr.msk.f32.vlgmr.msra.gmra.mrb[0].mxu0 %vm731_vm15, %v1094_v61  ;;  %v1560_v61 = vld [vmem:[%s7818_s3 + $0x58] sm:$0xff] }
 0x244   : > { %v1192_v3 = vpop.permute.xlu1 %1191  ;;  %v1190_v5 = vpop.permute.xlu0 %1189  ;;  %1265 = vmatprep.mubr.f32.mxu0 %v6130_v28  ;;  %v5484_v1 = vpack.c.bf16 %v1560_v61, %v1559_v32 }
 0x245   : > { %v1194_v7 = vsel %vm598_vm10, %v1190_v5, %v1192_v3  ;;  %v1578_v3 = vld [vmem:[%s7818_s3 + $0xe8] sm:$0xff] }
 0x246   : > { %4803 = vmatprep.subr.msk.mxu0 %vm734_vm14, %v1194_v7  ;;  %v1562_v7 = vld [vmem:[%s7818_s3 + $0x68] sm:$0xff] }
 0x248   : > { %v1183_v8 = vpop.permute.xlu1 %1182  ;;  %v1188_v10 = vpop.permute.xlu0 %1187 }
 0x249   : > { %v1193_v9 = vsel %vm598_vm10, %v1188_v10, %v1190_v5  ;;  %v1561_v5 = vld [vmem:[%s7818_s3 + $0x60] sm:$0xff] }
 0x24a   : > { %4804 = vmatpush1.msk.msra.mxu0 %vm734_vm14, %v1193_v9  ;;  %v5488_v10 = vpack.c.bf16 %v1562_v7, %v1561_v5  ;;  %v1579_v9 = vld [vmem:[%s7818_s3 + $0xf0] sm:$0xff]  ;;  %v1764_v5 = vld [vmem:[%s7818_s3 + $0x1f8] sm:$0xff] }
 0x24b   : > { %4805 = vmatmul.mubr.msk.f32.vlgmr.msra.gmra.mrb[0].mxu0 %vm731_vm15, %v1183_v8  ;;  %v5486_v8 = vpack.c.bf16 %v1578_v3, %v1577_v62  ;;  %v1745_v62 = vld [vmem:[%s7818_s3 + $0x160] sm:$0xff]  ;;  %v1763_v3 = vld [vmem:[%s7818_s3 + $0x1f0] sm:$0xff] }
 0x24c   : > { %v1284_v12 = vpop.permute.xlu1 %1283  ;;  %v1282_v13 = vpop.permute.xlu0 %1281  ;;  %1357 = vmatprep.mubr.f32.mxu0 %v6130_v28 }
 0x24d   : > { %v1286_v15 = vsel %vm633_vm11, %v1282_v13, %v1284_v12  ;;  %v1580_v12 = vld [vmem:[%s7818_s3 + $0xf8] sm:$0xff] }
 0x24e   : > { %4806 = vmatprep.subr.msk.mxu0 %vm734_vm14, %v1286_v15  ;;  %v1563_v15 = vld [vmem:[%s7818_s3 + $0x70] sm:$0xff] }
 0x250   : > { %v1275_v16 = vpop.permute.xlu1 %1274  ;;  %v1280_v18 = vpop.permute.xlu0 %1279 }
 0x251   : > { %v1285_v19 = vsel %vm633_vm11, %v1280_v18, %v1282_v13  ;;  %v5490_v13 = vpack.c.bf16 %v1580_v12, %v1579_v9  ;;  %v1748_v9 = vld [vmem:[%s7818_s3 + $0x178] sm:$0xff]  ;;  %v2109_v12 = vld [vmem:[%s7818_s3 + $0x380] sm:$0xff] }
 0x252   : > { %4807 = vmatpush1.msk.msra.mxu0 %vm734_vm14, %v1285_v19  ;;  %v1749_v19 = vld [vmem:[%s7818_s3 + $0x180] sm:$0xff] }
 0x253   : > { %4808 = vmatmul.mubr.msk.f32.vlgmr.msra.gmra.mrb[0].mxu0 %vm731_vm15, %v1275_v16  ;;  %v1564_v16 = vld [vmem:[%s7818_s3 + $0x78] sm:$0xff] }
 0x254   : > { %v1373_v22 = vpop.permute.xlu1 %1372  ;;  %v1371_v23 = vpop.permute.xlu0 %1370  ;;  %1446 = vmatprep.mubr.f32.mxu0 %v6130_v28  ;;  %v5492_v18 = vpack.c.bf16 %v1564_v16, %v1563_v15 }
 0x255   : > { %v1375_v25 = vsel %vm656_vm12, %v1371_v23, %v1373_v22  ;;  %v1750_v22 = vld [vmem:[%s7818_s3 + $0x188] sm:$0xff] }
 0x256   : > { %4809 = vmatprep.subr.msk.mxu0 %vm734_vm14, %v1375_v25 }
 0x258   : > { %v1367_v29 = vpop.permute.xlu1 %1366  ;;  %v1369_v30 = vpop.permute.xlu0 %1368 }
 0x259   : > { %v1374_v26 = vsel %vm656_vm12, %v1369_v30, %v1371_v23  ;;  %v5494_v23 = vpack.c.bf16 %v1750_v22, %v1749_v19  ;;  %v2094_v19 = vld [vmem:[%s7818_s3 + $0x308] sm:$0xff]  ;;  %v2111_v22 = vld [vmem:[%s7818_s3 + $0x390] sm:$0xff] }
 0x25a   : > { %4810 = vmatpush1.msk.msra.mxu0 %vm734_vm14, %v1374_v26 }
 0x25b   : > { %4811 = vmatmul.mubr.msk.f32.vlgmr.msra.gmra.mrb[0].mxu0 %vm731_vm15, %v1367_v29 }
 0x25c   : > { %v1465_v35 = vpop.permute.xlu1 %1464  ;;  %v730_v31 = vpop.permute.xlu0 %729  ;;  %1538 = vmatprep.mubr.f32.mxu0 %v6130_v28 }
 0x25d   : > { %4790 = vmatmul.mubr.msk.f32.vlgmr.msra.gmra.mrb[0].mxu1 %vm731_vm15, %v730_v31 }
 0x25e   : > { %5245 = vmatprep.mubr.msk.f32.mxu1 %vm6141_vm0, %v6130_v28 }
 0x260   : > { %v1461_v14 = vpop.permute.xlu1 %1460  ;;  %v1463_v17 = vpop.permute.xlu0 %1462 }
 0x261   : > { %v1466_v42 = vsel %vm691_vm13, %v1461_v14, %v1463_v17  ;;  %v1467_v46 = vsel %vm691_vm13, %v1463_v17, %v1465_v35  ;;  %v1752_v17 = vld [vmem:[%s7818_s3 + $0x198] sm:$0xff] }
 0x262   : > { %4812 = vmatprep.subr.msk.mxu0 %vm734_vm14, %v1467_v46  ;;  %v1735_v46 = vld [vmem:[%s7818_s3 + $0x110] sm:$0xff] }
 0x263   : > { %4813 = vmatpush1.msk.msra.mxu0 %vm734_vm14, %v1466_v42  ;;  %v5498_v42 = vpack.c.bf16 %v1752_v17, %v1751_v0  ;;  %v2116_v0 = vld [vmem:[%s7818_s3 + $0x3b8] sm:$0xff]  ;;  %v5568_v17 = vpack.c.bf16 %v2098_v39, %v2097_v38  ;;  %v1919_v39 = vld [vmem:[%s7818_s3 + $0x230] sm:$0xff] }
 0x264   : > { %v1456_v4 = vpop.permute.xlu0 %1455  ;;  %5463 = vmatprep.subr.bf16.mxu0 %v5462_v45 }
 0x265   : > { %4814 = vmatmul.mubr.msk.f32.vlgmr.msra.gmra.mrb[0].mxu0 %vm731_vm15, %v1456_v4 }
 0x266   : > { %5465 = vmatpush3.bf16.msra.mxu0 %v5464_v55  ;;  %v1736_v55 = vld [vmem:[%s7818_s3 + $0x118] sm:$0xff] }
 0x267   : > { %5467 = vmatprep.subr.bf16.mxu0 %v5466_v56  ;;  %v1753_v56 = vld [vmem:[%s7818_s3 + $0x1a0] sm:$0xff]  ;;  %v5500_v2 = vpack.c.bf16 %v1736_v55, %v1735_v46  ;;  %v2100_v46 = vld [vmem:[%s7818_s3 + $0x338] sm:$0xff] }
 0x268   : > { %v5502_v4 = vpack.c.bf16 %v1754_v63, %v1753_v56  ;;  %v2117_v55 = vld [vmem:[%s7818_s3 + $0x3c0] sm:$0xff]  ;;  %v2118_v56 = vld [vmem:[%s7818_s3 + $0x3c8] sm:$0xff] }
 0x26a   : > { %5469 = vmatpush3.bf16.msra.mxu0 %v5468_v21  ;;  %v1755_v21 = vld [vmem:[%s7818_s3 + $0x1b0] sm:$0xff] }
 0x26b   : > { %5471 = vmatprep.subr.bf16.mxu0 %v5470_v41  ;;  %v1756_v41 = vld [vmem:[%s7818_s3 + $0x1b8] sm:$0xff] }
 0x26c   : > { %v5506_v47 = vpack.c.bf16 %v1756_v41, %v1755_v21  ;;  %v2120_v21 = vld [vmem:[%s7818_s3 + $0x3d8] sm:$0xff] }
 0x26e   : > { %5473 = vmatpush3.bf16.msra.mxu0 %v5472_v44  ;;  %v1757_v44 = vld [vmem:[%s7818_s3 + $0x1c0] sm:$0xff] }
 0x26f   : > { %5475 = vmatprep.subr.bf16.mxu0 %v5474_v49  ;;  %v1758_v49 = vld [vmem:[%s7818_s3 + $0x1c8] sm:$0xff] }
 0x270   : > { %v5510_v51 = vpack.c.bf16 %v1758_v49, %v1757_v44  ;;  %v2122_v44 = vld [vmem:[%s7818_s3 + $0x3e8] sm:$0xff] }
 0x271   : > { %v814_v30 = vpop.permute.xlu1 %813 }
 0x272   : > { %5477 = vmatpush3.bf16.msra.mxu0 %v5476_v54  ;;  %v1759_v54 = vld [vmem:[%s7818_s3 + $0x1d0] sm:$0xff] }
 0x273   : > { %5479 = vmatprep.subr.bf16.mxu0 %v5478_v27  ;;  %v1760_v27 = vld [vmem:[%s7818_s3 + $0x1d8] sm:$0xff] }
 0x274   : > { %v5514_v33 = vpack.c.bf16 %v1760_v27, %v1759_v54  ;;  %v2124_v54 = vld [vmem:[%s7818_s3 + $0x3f8] sm:$0xff] }
 0x276   : > { %5481 = vmatpush3.bf16.msra.mxu0 %v5480_v34  ;;  %v1743_v34 = vld [vmem:[%s7818_s3 + $0x150] sm:$0xff] }
 0x277   : > { %5483 = vmatprep.subr.bf16.mxu0 %v5482_v60  ;;  %v1762_v60 = vld [vmem:[%s7818_s3 + $0x1e8] sm:$0xff]  ;;  %v5516_v32 = vpack.c.bf16 %v1744_v58, %v1743_v34  ;;  %v2108_v34 = vld [vmem:[%s7818_s3 + $0x378] sm:$0xff] }
 0x278   : > { %v5518_v61 = vpack.c.bf16 %v1762_v60, %v1761_v59  ;;  %v6836_v59 = vld [vmem:[%s7816_s1] sm:$0xf] }
 0x279   : > { %2015 = vrot.lane.b32.xlu0 %v6836_v59, %s6142_s10  ;;  %2195 = vrot.lane.b32.xlu1 %v6836_v59, %s6143_s13  ;;  %s6147_s10 = smov 120  }
 0x27a   : > { %5485 = vmatpush3.bf16.msra.mxu0 %v5484_v1  ;;  %v1746_v1 = vld [vmem:[%s7818_s3 + $0x168] sm:$0xff] }
 0x27b   : > { %5487 = vmatprep.subr.bf16.mxu0 %v5486_v8  ;;  %v5520_v7 = vpack.c.bf16 %v1746_v1, %v1745_v62  ;;  %v5522_v8 = vpack.c.bf16 %v1764_v5, %v1763_v3  ;;  %v1652_v62 = vpop.permute.xlu0 %1651  ;;  %v1929_v1 = vld [vmem:[%s7818_s3 + $0x280] sm:$0xff]  ;;  %v1930_v3 = vld [vmem:[%s7818_s3 + $0x288] sm:$0xff] }
 0x27c   : > { %v1913_v5 = vld [vmem:[%s7818_s3 + $0x200] sm:$0xff] }
 0x27e   : > { %5489 = vmatpush3.bf16.msra.mxu0 %v5488_v10  ;;  %v1747_v10 = vld [vmem:[%s7818_s3 + $0x170] sm:$0xff] }
 0x27f   : > { %5491 = vmatprep.subr.bf16.mxu0 %v5490_v13  ;;  %v2110_v13 = vld [vmem:[%s7818_s3 + $0x388] sm:$0xff]  ;;  %v5524_v15 = vpack.c.bf16 %v1748_v9, %v1747_v10  ;;  %v1931_v10 = vld [vmem:[%s7818_s3 + $0x290] sm:$0xff]  ;;  %v1932_v9 = vld [vmem:[%s7818_s3 + $0x298] sm:$0xff] }
 0x280   : > { %v5558_v16 = vpack.c.bf16 %v2110_v13, %v2109_v12  ;;  %v5526_v13 = vpack.c.bf16 %v1930_v3, %v1929_v1  ;;  %v6981_v1 = vld [vmem:[%s7817_s2 + $0xc0] sm:$0xff]  ;;  %v6987_v3 = vld [vmem:[%s7817_s2 + $0x30] sm:$0xff] }
 0x282   : > { %5493 = vmatpush3.bf16.msra.mxu0 %v5492_v18  ;;  %v2093_v18 = vld [vmem:[%s7818_s3 + $0x300] sm:$0xff] }
 0x283   : > { %5495 = vmatprep.subr.bf16.mxu0 %v5494_v23  ;;  %v2112_v23 = vld [vmem:[%s7818_s3 + $0x398] sm:$0xff] }
 0x330   : > { %v807_v25 = vpop.f32.mrb[0].mxu1 }
 0x331   : > { %v809_v29 = vpop.f32.mrb[1].mxu1  ;;  %v816_v26 = vadd.f32 %v814_v30, %v807_v25  ;;  %v5560_v25 = vpack.c.bf16 %v2094_v19, %v2093_v18  ;;  %v5530_v19 = vpack.c.bf16 %v1932_v9, %v1931_v10 }
 0x332   : > { %v817_v35 = vadd.f32 %v814_v30, %v809_v29  ;;  %v5562_v29 = vpack.c.bf16 %v2112_v23, %v2111_v22  ;;  %v2095_v30 = vld [vmem:[%s7818_s3 + $0x310] sm:$0xff]  ;;  %v1916_v23 = vld [vmem:[%s7818_s3 + $0x218] sm:$0xff] }
 0x333   : > { %v1915_v22 = vld [vmem:[%s7818_s3 + $0x210] sm:$0xff] }
 0x338   : > { %v1540_v31 = vpop.f32.mrb[0].mxu0 }
 0x339   : > { %v5756_v36 = vadd.f32 %v1540_v31, %v816_v26  ;;  %v1542_v37 = vpop.f32.mrb[1].mxu0  ;;  %v2096_v26 = vld [vmem:[%s7818_s3 + $0x318] sm:$0xff]  ;;  %v2114_v31 = vld [vmem:[%s7818_s3 + $0x3a8] sm:$0xff] }
 0x33a   : > { %v5758_v14 = vadd.f32 %v1542_v37, %v817_v35  ;;  %v2113_v35 = vld [vmem:[%s7818_s3 + $0x3a0] sm:$0xff] }
 0x33b   : > { %v6649_v24 = vmax.f32 %v5756_v36, 0.0  ;;  %v5564_v36 = vpack.c.bf16 %v2096_v26, %v2095_v30  ;;  %v5566_v37 = vpack.c.bf16 %v2114_v31, %v2113_v35  ;;  %v5532_v30 = vpack.c.bf16 %v1916_v23, %v1915_v22  ;;  %v1917_v35 = vld [vmem:[%s7818_s3 + $0x220] sm:$0xff]  ;;  %v1918_v31 = vld [vmem:[%s7818_s3 + $0x228] sm:$0xff] }
 0x33c   : > { %v6647_v45 = vmax.f32 %v5758_v14, 0.0  ;;  %v2115_v14 = vld [vmem:[%s7818_s3 + $0x3b0] sm:$0xff] }
 0x33e   : > { %1645 = vmatprep.mubr.f32.mxu0 %v6647_v45 }
 0x33f   : > { %1646 = vmatmul.mubr.f32.vlgmr.msra.gmra.mrb[2].mxu0 %v6649_v24 }
 0x340   : > { %5497 = vmatpush3.bf16.msra.mxu0 %v5496_v40  ;;  %1829 = vmatprep.mubr.f32.mxu0 %v6647_v45  ;;  %v5570_v40 = vpack.c.bf16 %v2116_v0, %v2115_v14  ;;  %v1920_v14 = vld [vmem:[%s7818_s3 + $0x238] sm:$0xff]  ;;  %v1937_v0 = vld [vmem:[%s7818_s3 + $0x2c0] sm:$0xff] }
 0x341   : > { %5499 = vmatprep.subr.bf16.mxu0 %v5498_v42  ;;  %v2099_v42 = vld [vmem:[%s7818_s3 + $0x330] sm:$0xff] }
 0x342   : > { %v5572_v63 = vpack.c.bf16 %v2100_v46, %v2099_v42  ;;  %v1921_v46 = vld [vmem:[%s7818_s3 + $0x240] sm:$0xff] }
 0x344   : > { %5501 = vmatpush3.bf16.msra.mxu0 %v5500_v2  ;;  %v5574_v2 = vpack.c.bf16 %v2118_v56, %v2117_v55  ;;  %v1922_v55 = vld [vmem:[%s7818_s3 + $0x248] sm:$0xff]  ;;  %v1939_v56 = vld [vmem:[%s7818_s3 + $0x2d0] sm:$0xff] }
 0x345   : > { %5503 = vmatprep.subr.bf16.mxu0 %v5502_v4  ;;  %v2101_v4 = vld [vmem:[%s7818_s3 + $0x340] sm:$0xff] }
 0x346   : > { %v5576_v41 = vpack.c.bf16 %v2102_v11, %v2101_v4  ;;  %v1923_v11 = vld [vmem:[%s7818_s3 + $0x250] sm:$0xff] }
 0x348   : > { %5505 = vmatpush3.bf16.msra.mxu0 %v5504_v6  ;;  %v5578_v6 = vpack.c.bf16 %v2120_v21, %v2119_v20  ;;  %v1924_v20 = vld [vmem:[%s7818_s3 + $0x258] sm:$0xff]  ;;  %v1941_v21 = vld [vmem:[%s7818_s3 + $0x2e0] sm:$0xff] }
 0x349   : > { %5507 = vmatprep.subr.bf16.mxu0 %v5506_v47  ;;  %v2103_v47 = vld [vmem:[%s7818_s3 + $0x350] sm:$0xff] }
 0x34a   : > { %v5580_v49 = vpack.c.bf16 %v2104_v48, %v2103_v47  ;;  %v1925_v48 = vld [vmem:[%s7818_s3 + $0x260] sm:$0xff] }
 0x34c   : > { %5509 = vmatpush3.bf16.msra.mxu0 %v5508_v50  ;;  %v5582_v50 = vpack.c.bf16 %v2122_v44, %v2121_v43  ;;  %v1926_v43 = vld [vmem:[%s7818_s3 + $0x268] sm:$0xff]  ;;  %v1943_v44 = vld [vmem:[%s7818_s3 + $0x2f0] sm:$0xff] }
 0x34d   : > { %5511 = vmatprep.subr.bf16.mxu0 %v5510_v51  ;;  %v2105_v51 = vld [vmem:[%s7818_s3 + $0x360] sm:$0xff] }
 0x34e   : > { %v5584_v27 = vpack.c.bf16 %v2106_v52, %v2105_v51  ;;  %v1927_v52 = vld [vmem:[%s7818_s3 + $0x270] sm:$0xff] }
 0x350   : > { %5513 = vmatpush3.bf16.msra.mxu0 %v5512_v57  ;;  %v5586_v57 = vpack.c.bf16 %v2124_v54, %v2123_v53  ;;  %v1928_v53 = vld [vmem:[%s7818_s3 + $0x278] sm:$0xff] }
 0x351   : > { %5515 = vmatprep.subr.bf16.mxu0 %v5514_v33  ;;  %v2107_v33 = vld [vmem:[%s7818_s3 + $0x370] sm:$0xff]  ;;  %v5556_v54 = vpack.c.bf16 %v1928_v53, %v1927_v52 }
 0x352   : > { %v5588_v58 = vpack.c.bf16 %v2108_v34, %v2107_v33  ;;  %v6144_v34 = vmov 63  }
 0x353   : > { %5909 = vset.pattern.permute.xlu0 %v6144_v34 }
 0x354   : > { %5517 = vmatpush3.bf16.msra.mxu0 %v5516_v32  ;;  %1729 = vperm.xlu0 %5909, %v6836_v59   ;;  %v6959_v59 = vld [vmem:[%s7821_s6] ss:$0 sm:$0xff] }
 0x355   : > { %5519 = vmatprep.subr.bf16.mxu0 %v5518_v61 }
 0x358   : > { %5521 = vmatpush3.bf16.msra.mxu0 %v5520_v7  ;;  %v1914_v7 = vld [vmem:[%s7818_s3 + $0x208] sm:$0xff]  ;;  %2296 = vrot.lane.b32.xlu0 %v6959_v59, %s6145_s14 }
 0x359   : > { %5523 = vmatprep.subr.bf16.mxu0 %v5522_v8  ;;  %v5528_v18 = vpack.c.bf16 %v1914_v7, %v1913_v5  ;;  %v6994_v5 = vld [vmem:[%s7817_s2 + $0x90] sm:$0xff] }
 0x35a   : > { %v7001_v7 = vld [vmem:[%s7817_s2 + $0xf0] sm:$0xff] }
 0x35c   : > { %5525 = vmatpush3.bf16.msra.mxu0 %v5524_v15  ;;  %2304 = vrot.lane.b32.xlu0 %v6959_v59, %s6112_s15  ;;  %s6149_s15 = smov 10  }
 0x35d   : > { %5559 = vmatprep.subr.bf16.mxu0 %v5558_v16  ;;  %v1836_v16 = vpop.permute.xlu1 %1835 }
 0x35f   : > { %1830 = vmatmul.mubr.f32.vlgmr.msra.gmra.mrb[4].mxu0 %v6649_v24 }
 0x360   : > { %5561 = vmatpush3.bf16.msra.mxu0 %v5560_v25  ;;  %2189 = vmatprep.mubr.f32.mxu0 %v6647_v45  ;;  %v1933_v25 = vld [vmem:[%s7818_s3 + $0x2a0] sm:$0xff] }
 0x361   : > { %5563 = vmatprep.subr.bf16.mxu0 %v5562_v29  ;;  %v1934_v29 = vld [vmem:[%s7818_s3 + $0x2a8] sm:$0xff] }
 0x362   : > { %v5534_v26 = vpack.c.bf16 %v1934_v29, %v1933_v25 }
 0x364   : > { %5565 = vmatpush3.bf16.msra.mxu0 %v5564_v36  ;;  %v1935_v36 = vld [vmem:[%s7818_s3 + $0x2b0] sm:$0xff] }
 0x365   : > { %5567 = vmatprep.subr.bf16.mxu0 %v5566_v37  ;;  %v1936_v37 = vld [vmem:[%s7818_s3 + $0x2b8] sm:$0xff] }
 0x366   : > { %v5538_v38 = vpack.c.bf16 %v1936_v37, %v1935_v36 }
 0x368   : > { %5569 = vmatpush3.bf16.msra.mxu0 %v5568_v17  ;;  %v1938_v17 = vld [vmem:[%s7818_s3 + $0x2c8] sm:$0xff] }
 0x369   : > { %5571 = vmatprep.subr.bf16.mxu0 %v5570_v40  ;;  %v5540_v40 = vpack.c.bf16 %v1920_v14, %v1919_v39  ;;  %v5542_v42 = vpack.c.bf16 %v1938_v17, %v1937_v0 }
 0x36c   : > { %5573 = vmatpush3.bf16.msra.mxu0 %v5572_v63  ;;  %v1940_v63 = vld [vmem:[%s7818_s3 + $0x2d8] sm:$0xff] }
 0x36d   : > { %5575 = vmatprep.subr.bf16.mxu0 %v5574_v2  ;;  %v5544_v2 = vpack.c.bf16 %v1922_v55, %v1921_v46  ;;  %v5546_v4 = vpack.c.bf16 %v1940_v63, %v1939_v56 }
 0x370   : > { %5577 = vmatpush3.bf16.msra.mxu0 %v5576_v41  ;;  %v1942_v41 = vld [vmem:[%s7818_s3 + $0x2e8] sm:$0xff] }
 0x371   : > { %5579 = vmatprep.subr.bf16.mxu0 %v5578_v6  ;;  %v5548_v6 = vpack.c.bf16 %v1924_v20, %v1923_v11  ;;  %v5550_v47 = vpack.c.bf16 %v1942_v41, %v1941_v21  ;;  %v7126_v21 = vld [vmem:[%s7817_s2 + $0xe8] sm:$0xff] }
 0x374   : > { %5581 = vmatpush3.bf16.msra.mxu0 %v5580_v49  ;;  %v1944_v49 = vld [vmem:[%s7818_s3 + $0x2f8] sm:$0xff] }
 0x375   : > { %5583 = vmatprep.subr.bf16.mxu0 %v5582_v50  ;;  %v5552_v50 = vpack.c.bf16 %v1926_v43, %v1925_v48  ;;  %v5554_v51 = vpack.c.bf16 %v1944_v49, %v1943_v44  ;;  %v7138_v48 = vld [vmem:[%s7817_s2 + $0x58] sm:$0xff] }
 0x376   : > { %v7148_v49 = vld [vmem:[%s7817_s2 + $0xb8] sm:$0xff] }
 0x378   : > { %5585 = vmatpush3.bf16.msra.mxu0 %v5584_v27 }
 0x379   : > { %5587 = vmatprep.subr.bf16.mxu0 %v5586_v57 }
 0x37c   : > { %5589 = vmatpush3.bf16.msra.mxu0 %v5588_v58 }
 0x37f   : > { %2190 = vmatmul.mubr.f32.vlgmr.msra.gmra.mrb[6].mxu0 %v6649_v24 }
 0x412   : > { %v4958_v60 = vpop.f32.mrb[2].mxu0 }
 0x413   : > { %v4959_v32 = vpop.f32.mrb[3].mxu0 }
 0x414   : > { %v4960_v61 = vadd.f32 %v4959_v32, %v4958_v60 }
 0x416   : > { %5244 = vmatpush3.msk.msra.mxu1 %vm734_vm14, %v4960_v61  ;;  %v2016_v61 = vpop.permute.xlu0 %2015 }
 0x417   : > { %5246 = vmatmul.mubr.msk.f32.vlgmr.msra.gmra.mrb[2].mxu1 %vm731_vm15, %v1652_v62  ;;  %5248 = vmatprep.subr.mxu1 %v6130_v28  ;;  %v6967_v62 = vld [vmem:[%s7817_s2] sm:$0xff] }
 0x418   : > { %5250 = vmatprep.mubr.msk.f32.mxu1 %vm6141_vm0, %v6130_v28  ;;  %2464 = vrot.lane.b32.xlu0 %v6967_v62, %s6146_s27 }
 0x432   : > { %v4995_v8 = vpop.f32.mrb[4].mxu0 }
 0x433   : > { %v4996_v12 = vpop.f32.mrb[5].mxu0 }
 0x434   : > { %v4997_v15 = vadd.f32 %v4996_v12, %v4995_v8  ;;  %v1730_v8 = vpop.permute.xlu0 %1729 }
 0x436   : > { %5249 = vmatpush3.msk.msra.mxu1 %vm734_vm14, %v4997_v15 }
 0x437   : > { %5251 = vmatmul.mubr.msk.f32.vlgmr.msra.gmra.mrb[2].mxu1 %vm731_vm15, %v1836_v16  ;;  %5527 = vmatprep.subr.bf16.mxu1 %v5526_v13  ;;  %v4824_v13 = vld [vmem:[%s7821_s6 + $0x1] ss:$0 sm:$0xff] }
 0x438   : > { %5529 = vmatpush3.bf16.msra.mxu1 %v5528_v18  ;;  %2009 = vmatprep.mubr.f32.mxu1 %v6647_v45  ;;  %v5536_v45 = vpack.c.bf16 %v1918_v31, %v1917_v35  ;;  %v7028_v25 = vpop.permute.xlu0 %2296 }
 0x439   : > { %5531 = vmatprep.subr.bf16.mxu1 %v5530_v19 }
 0x43c   : > { %5533 = vmatpush3.bf16.msra.mxu1 %v5532_v30  ;;  %v7041_v29 = vpop.permute.xlu0 %2304 }
 0x43d   : > { %5535 = vmatprep.subr.bf16.mxu1 %v5534_v26 }
 0x440   : > { %5537 = vmatpush3.bf16.msra.mxu1 %v5536_v45 }
 0x441   : > { %5539 = vmatprep.subr.bf16.mxu1 %v5538_v38 }
 0x444   : > { %5541 = vmatpush3.bf16.msra.mxu1 %v5540_v40 }
 0x445   : > { %5543 = vmatprep.subr.bf16.mxu1 %v5542_v42 }
 0x448   : > { %5545 = vmatpush3.bf16.msra.mxu1 %v5544_v2 }
 0x449   : > { %5547 = vmatprep.subr.bf16.mxu1 %v5546_v4 }
 0x44c   : > { %5549 = vmatpush3.bf16.msra.mxu1 %v5548_v6 }
 0x44d   : > { %5551 = vmatprep.subr.bf16.mxu1 %v5550_v47  ;;  %v6155_v47 = vmov 20  }
 0x44e   : > { %5910 = vset.pattern.permute.xlu0 %v6155_v47  ;;  %5911 = vset.pattern.permute.xlu1 %v6155_v47 }
 0x450   : > { %5553 = vmatpush3.bf16.msra.mxu1 %v5552_v50 }
 0x451   : > { %5555 = vmatprep.subr.bf16.mxu1 %v5554_v51 }
 0x452   : > { %v5069_v27 = vpop.f32.mrb[6].mxu0 }
 0x453   : > { %v5070_v57 = vpop.f32.mrb[7].mxu0 }
 0x454   : > { %v5071_v33 = vadd.f32 %v5070_v57, %v5069_v27  ;;  %5557 = vmatpush3.bf16.msra.mxu1 %v5556_v54  ;;  %v7159_v54 = vld [vmem:[%s7817_s2 + $0x118] sm:$0xff] }
 0x455   : > { %5253 = vmatprep.subr.mxu1 %v6130_v28 }
 0x457   : > { %2010 = vmatmul.mubr.f32.vlgmr.msra.gmra.mrb[4].mxu1 %v6649_v24  ;;  %v2196_v24 = vpop.permute.xlu1 %2195 }
 0x458   : > { %5255 = vmatprep.mubr.msk.f32.mxu1 %vm6141_vm0, %v6130_v28 }
 0x48a   : > { %v2465_v30 = vpop.permute.xlu0 %2464 }
 0x52a   : > { %v5032_v58 = vpop.f32.mrb[4].mxu1 }
 0x52b   : > { %v5033_v60 = vpop.f32.mrb[5].mxu1 }
 0x52c   : > { %v5034_v32 = vadd.f32 %v5033_v60, %v5032_v58  ;;  %v7177_v60 = vld [vmem:[%s7817_s2 + $0x88] sm:$0xff] }
 0x52e   : > { %5254 = vmatpush3.msk.msra.mxu1 %vm734_vm14, %v5034_v32 }
 0x52f   : > { %5256 = vmatmul.mubr.msk.f32.vlgmr.msra.gmra.mrb[2].mxu1 %vm731_vm15, %v2016_v61  ;;  %5258 = vmatprep.subr.mxu1 %v6130_v28 }
 0x530   : > { %5259 = vmatpush3.msk.msra.mxu1 %vm734_vm14, %v5071_v33  ;;  %5260 = vmatprep.mubr.msk.f32.mxu1 %vm6141_vm0, %v6130_v28  ;;  %v6975_v28 = vld [vmem:[%s7817_s2 + $0x60] sm:$0xff]  ;;  %v7169_v33 = vld [vmem:[%s7817_s2 + $0x28] sm:$0xff] }
 0x531   : > { %2468 = vrot.lane.b32.xlu0 %v6975_v28, %s6146_s27 }
 0x535   : > { %2472 = vrot.lane.b32.xlu0 %v6981_v1, %s6146_s27 }
 0x537   : > { %5261 = vmatmul.mubr.msk.f32.vlgmr.msra.gmra.mrb[2].mxu1 %vm731_vm15, %v2196_v24 }
 0x538   : > { %5265 = vmatprep.mubr.msk.f32.mxu1 %vm731_vm15, %v6967_v62 }
 0x539   : > { %2596 = vrot.lane.b32.xlu0 %v6987_v3, %s6147_s10 }
 0x53d   : > { %2600 = vrot.lane.b32.xlu0 %v6994_v5, %s6147_s10 }
 0x541   : > { %2604 = vrot.lane.b32.xlu0 %v7001_v7, %s6147_s10 }
 0x5a3   : > { %v2469_v37 = vpop.permute.xlu0 %2468 }
 0x5a7   : > { %v2473_v38 = vpop.permute.xlu0 %2472 }
 0x5ab   : > { %v2597_v14 = vpop.permute.xlu0 %2596 }
 0x5af   : > { %v2601_v17 = vpop.permute.xlu0 %2600 }
 0x5b3   : > { %v2605_v42 = vpop.permute.xlu0 %2604 }
 0x60a   : > { %v2268_v10 = vpop.f32.mrb[2].mxu1 }
 0x60b   : > { %v5759_v9 = vadd.f32 %v2268_v10, %v1730_v8  ;;  %v5262_v12 = vpop.f32.mrb[3].mxu1 }
 0x60d   : > { %2274 = vrot.lane.b32.xlu1 %v5759_v9, %s6148_s28 }
 0x611   : > { %2291 = vrot.lane.b32.xlu1 %v4824_v13, %s6109_s11  ;;  %s6150_s11 = smov 116  }
 0x615   : > { %2300 = vrot.lane.b32.xlu1 %v4824_v13, %s6149_s15 }
 0x619   : > { %2466 = vrot.lane.b32.xlu1 %v6987_v3, %s6146_s27 }
 0x61d   : > { %2470 = vrot.lane.b32.xlu1 %v6994_v5, %s6146_s27 }
 0x621   : > { %2474 = vrot.lane.b32.xlu1 %v7001_v7, %s6146_s27  ;;  %s6152_s27 = smov 118  }
 0x625   : > { %2594 = vrot.lane.b32.xlu1 %v6967_v62, %s6147_s10 }
 0x67f   : > { %v2275_v15 = vpop.permute.xlu1 %2274 }
 0x680   : > { %v2278_v16 = vsel %vm2277_vm1, 0.0, %v2275_v15 }
 0x681   : > { %v7017_v18 = vsel %vm2279_vm3, %v2278_v16, 0.0 }
 0x682   : > { %2477 = vrot.lane.b32.xlu1 %v7017_v18, %s6122_s19  ;;  %v2285_v19 = vmul.f32 %v6959_v59, %v7017_v18  ;;  %v2299_v26 = vmul.f32 %v7028_v25, %v7017_v18  ;;  %v2307_v36 = vmul.f32 %v7041_v29, %v7017_v18 }
 0x683   : > { %v7023_v22 = vpop.permute.xlu1 %2291 }
 0x684   : > { %5263 = vmatprep.subr.msk.mxu1 %vm734_vm14, %v2285_v19  ;;  %v2294_v23 = vmul.f32 %v7023_v22, %v7017_v18 }
 0x685   : > { %5264 = vmatpush3.msk.msra.mxu1 %vm734_vm14, %v2285_v19 }
 0x686   : > { %2598 = vrot.lane.b32.xlu1 %v6975_v28, %s6147_s10  ;;  %2607 = vrot.lane.b32.xlu0 %v2294_v23, %s6123_s20 }
 0x687   : > { %5266 = vmatmul.mubr.msk.f32.vlgmr.msra.gmra.mrb[6].mxu1 %vm731_vm15, %v6987_v3  ;;  %v7069_v35 = vpop.permute.xlu1 %2300 }
 0x688   : > { %5268 = vmatprep.mubr.msk.f32.mxu1 %vm731_vm15, %v6975_v28  ;;  %v2303_v31 = vmul.f32 %v7069_v35, %v7017_v18 }
 0x68a   : > { %2602 = vrot.lane.b32.xlu1 %v6981_v1, %s6147_s10  ;;  %2726 = vrot.lane.b32.xlu0 %v6987_v3, %s6150_s11 }
 0x68b   : > { %5269 = vmatmul.mubr.msk.f32.gmra.mrb[8].mxu1 %vm731_vm15, %v6994_v5  ;;  %v2467_v45 = vpop.permute.xlu1 %2466 }
 0x68c   : > { %5271 = vmatprep.mubr.msk.f32.mxu1 %vm731_vm15, %v6981_v1 }
 0x68e   : > { %2308 = vrot.lane.b32.xlu1 %v4824_v13, %s6113_s16  ;;  %2730 = vrot.lane.b32.xlu0 %v6994_v5, %s6150_s11  ;;  %s6151_s16 = smov 108  }
 0x68f   : > { %5272 = vmatmul.mubr.msk.f32.gmra.mrb[10].mxu1 %vm731_vm15, %v7001_v7  ;;  %v2471_v39 = vpop.permute.xlu1 %2470 }
 0x690   : > { %5276 = vmatprep.mubr.msk.f32.mxu1 %vm731_vm15, %v2465_v30 }
 0x692   : > { %2724 = vrot.lane.b32.xlu1 %v6967_v62, %s6150_s11  ;;  %2737 = vrot.lane.b32.xlu0 %v2299_v26, %s6147_s10 }
 0x693   : > { %v2475_v0 = vpop.permute.xlu1 %2474 }
 0x696   : > { %2728 = vrot.lane.b32.xlu1 %v6975_v28, %s6150_s11  ;;  %2734 = vrot.lane.b32.xlu0 %v7001_v7, %s6150_s11 }
 0x697   : > { %v2595_v40 = vpop.permute.xlu1 %2594 }
 0x69a   : > { %2732 = vrot.lane.b32.xlu1 %v6981_v1, %s6150_s11  ;;  %2854 = vrot.lane.b32.xlu0 %v6967_v62, %s6124_s21 }
 0x69e   : > { %2866 = vrot.lane.b32.xlu1 %v7017_v18, %s6137_s12  ;;  %2858 = vrot.lane.b32.xlu0 %v6975_v28, %s6124_s21 }
 0x6a2   : > { %2856 = vrot.lane.b32.xlu1 %v6987_v3, %s6124_s21  ;;  %2862 = vrot.lane.b32.xlu0 %v6981_v1, %s6124_s21 }
 0x6a6   : > { %2860 = vrot.lane.b32.xlu1 %v6994_v5, %s6124_s21  ;;  %2985 = vrot.lane.b32.xlu0 %v6987_v3, %s6151_s16 }
 0x6aa   : > { %2864 = vrot.lane.b32.xlu1 %v7001_v7, %s6124_s21  ;;  %2996 = vrot.lane.b32.xlu0 %v2303_v31, %s6152_s27 }
 0x6ae   : > { %2983 = vrot.lane.b32.xlu1 %v6967_v62, %s6151_s16  ;;  %2989 = vrot.lane.b32.xlu0 %v6994_v5, %s6151_s16 }
 0x6b2   : > { %2987 = vrot.lane.b32.xlu1 %v6975_v28, %s6151_s16  ;;  %2993 = vrot.lane.b32.xlu0 %v7001_v7, %s6151_s16 }
 0x6b6   : > { %2991 = vrot.lane.b32.xlu1 %v6981_v1, %s6151_s16  ;;  %3113 = vrot.lane.b32.xlu0 %v6967_v62, %s6153_s8 }
 0x6ba   : > { %3115 = vrot.lane.b32.xlu1 %v6987_v3, %s6153_s8  ;;  %3117 = vrot.lane.b32.xlu0 %v6975_v28, %s6153_s8 }
 0x6be   : > { %3126 = vrot.lane.b32.xlu1 %v2307_v36, %s6124_s21  ;;  %3121 = vrot.lane.b32.xlu0 %v6981_v1, %s6153_s8 }
 0x6c2   : > { %3255 = vrot.lane.b32.xlu0 %v7017_v18, %s6125_s22  ;;  %3119 = vrot.lane.b32.xlu1 %v6994_v5, %s6153_s8 }
 0x6c6   : > { %3123 = vrot.lane.b32.xlu1 %v7001_v7, %s6153_s8  ;;  %3245 = vrot.lane.b32.xlu0 %v6987_v3, %s6154_s9 }
 0x6ca   : > { %3243 = vrot.lane.b32.xlu1 %v6967_v62, %s6154_s9  ;;  %3249 = vrot.lane.b32.xlu0 %v6994_v5, %s6154_s9 }
 0x6ce   : > { %3247 = vrot.lane.b32.xlu1 %v6975_v28, %s6154_s9  ;;  %3253 = vrot.lane.b32.xlu0 %v7001_v7, %s6154_s9 }
 0x6d2   : > { %3251 = vrot.lane.b32.xlu1 %v6981_v1, %s6154_s9  ;;  %3372 = vrot.lane.b32.xlu0 %v6967_v62, %s6127_s26 }
 0x6d6   : > { %3376 = vrot.lane.b32.xlu0 %v6975_v28, %s6127_s26 }
 0x6da   : > { %3380 = vrot.lane.b32.xlu0 %v6981_v1, %s6127_s26 }
 0x6de   : > { %2450 = vperm.xlu0 %5910, %v7126_v21  }
 0x6e2   : > { %2435 = vperm.xlu0 %5910, %v7138_v48  }
 0x6e6   : > { %2445 = vperm.xlu0 %5910, %v7148_v49  }
 0x6f4   : > { %v2478_v46 = vpop.permute.xlu1 %2477 }
 0x6f5   : > { %5274 = vmatprep.subr.msk.mxu1 %vm734_vm14, %v2478_v46 }
 0x6f6   : > { %5275 = vmatpush3.msk.msra.mxu1 %vm734_vm14, %v2478_v46 }
 0x6f7   : > { %5277 = vmatmul.mubr.msk.f32.vlgmr.msra.gmra.mrb[6].mxu1 %vm731_vm15, %v2467_v45 }
 0x6f8   : > { %v2608_v55 = vpop.permute.xlu0 %2607  ;;  %v2599_v56 = vpop.permute.xlu1 %2598  ;;  %5279 = vmatprep.mubr.msk.f32.mxu1 %vm731_vm15, %v2469_v37 }
 0x6f9   : > { %5285 = vmatprep.subr.msk.mxu1 %vm734_vm14, %v2608_v55 }
 0x6fa   : > { %5286 = vmatpush3.msk.msra.mxu1 %vm734_vm14, %v2608_v55 }
 0x6fb   : > { %5280 = vmatmul.mubr.msk.f32.gmra.mrb[8].mxu1 %vm731_vm15, %v2471_v39 }
 0x6fc   : > { %v2727_v63 = vpop.permute.xlu0 %2726  ;;  %v2603_v2 = vpop.permute.xlu1 %2602  ;;  %5282 = vmatprep.mubr.msk.f32.mxu1 %vm731_vm15, %v2473_v38 }
 0x6ff   : > { %5283 = vmatmul.mubr.msk.f32.gmra.mrb[10].mxu1 %vm731_vm15, %v2475_v0 }
 0x700   : > { %v2731_v4 = vpop.permute.xlu0 %2730  ;;  %5287 = vmatprep.mubr.msk.f32.mxu1 %vm731_vm15, %v2595_v40  ;;  %v7117_v11 = vpop.permute.xlu1 %2308 }
 0x701   : > { %v2311_v20 = vmul.f32 %v7117_v11, %v7017_v18 }
 0x703   : > { %5288 = vmatmul.mubr.msk.f32.vlgmr.msra.gmra.mrb[6].mxu1 %vm731_vm15, %v2597_v14  ;;  %3385 = vrot.lane.b32.xlu1 %v2311_v20, %s6126_s23 }
 0x704   : > { %v2738_v41 = vpop.permute.xlu0 %2737  ;;  %5290 = vmatprep.mubr.msk.f32.mxu1 %vm731_vm15, %v2599_v56  ;;  %v2725_v6 = vpop.permute.xlu1 %2724 }
 0x705   : > { %5296 = vmatprep.subr.msk.mxu1 %vm734_vm14, %v2738_v41 }
 0x706   : > { %5297 = vmatpush3.msk.msra.mxu1 %vm734_vm14, %v2738_v41 }
 0x707   : > { %5291 = vmatmul.mubr.msk.f32.gmra.mrb[8].mxu1 %vm731_vm15, %v2601_v17  ;;  %3374 = vrot.lane.b32.xlu1 %v6987_v3, %s6127_s26 }
 0x708   : > { %v2735_v43 = vpop.permute.xlu0 %2734  ;;  %5293 = vmatprep.mubr.msk.f32.mxu1 %vm731_vm15, %v2603_v2  ;;  %v2729_v44 = vpop.permute.xlu1 %2728 }
 0x70b   : > { %3378 = vrot.lane.b32.xlu1 %v6994_v5, %s6127_s26  ;;  %5294 = vmatmul.mubr.msk.f32.gmra.mrb[10].mxu1 %vm731_vm15, %v2605_v42 }
 0x70c   : > { %v2855_v50 = vpop.permute.xlu0 %2854  ;;  %v2733_v51 = vpop.permute.xlu1 %2732  ;;  %5298 = vmatprep.mubr.msk.f32.mxu1 %vm731_vm15, %v2725_v6 }
 0x70f   : > { %3382 = vrot.lane.b32.xlu1 %v7001_v7, %s6127_s26  ;;  %5299 = vmatmul.mubr.msk.f32.vlgmr.msra.gmra.mrb[6].mxu1 %vm731_vm15, %v2727_v63 }
 0x710   : > { %v2859_v52 = vpop.permute.xlu0 %2858  ;;  %v2867_v53 = vpop.permute.xlu1 %2866  ;;  %5301 = vmatprep.mubr.msk.f32.mxu1 %vm731_vm15, %v2729_v44 }
 0x711   : > { %5307 = vmatprep.subr.msk.mxu1 %vm734_vm14, %v2867_v53 }
 0x712   : > { %5308 = vmatpush3.msk.msra.mxu1 %vm734_vm14, %v2867_v53 }
 0x713   : > { %5302 = vmatmul.mubr.msk.f32.gmra.mrb[8].mxu1 %vm731_vm15, %v2731_v4  ;;  %2455 = vperm.xlu1 %5911, %v7159_v54  }
 0x714   : > { %v2863_v27 = vpop.permute.xlu0 %2862  ;;  %v2857_v57 = vpop.permute.xlu1 %2856  ;;  %5304 = vmatprep.mubr.msk.f32.mxu1 %vm731_vm15, %v2733_v51 }
 0x717   : > { %5305 = vmatmul.mubr.msk.f32.gmra.mrb[10].mxu1 %vm731_vm15, %v2735_v43  ;;  %2430 = vperm.xlu1 %5911, %v7169_v33  }
 0x718   : > { %v2986_v34 = vpop.permute.xlu0 %2985  ;;  %v2861_v58 = vpop.permute.xlu1 %2860  ;;  %5309 = vmatprep.mubr.msk.f32.mxu1 %vm731_vm15, %v2855_v50 }
 0x71b   : > { %5310 = vmatmul.mubr.msk.f32.vlgmr.msra.gmra.mrb[6].mxu1 %vm731_vm15, %v2857_v57  ;;  %2440 = vperm.xlu1 %5911, %v7177_v60  }
 0x71c   : > { %v2997_v32 = vpop.permute.xlu0 %2996  ;;  %v2865_v61 = vpop.permute.xlu1 %2864  ;;  %5312 = vmatprep.mubr.msk.f32.mxu1 %vm731_vm15, %v2859_v52 }
 0x71d   : > { %5318 = vmatprep.subr.msk.mxu1 %vm734_vm14, %v2997_v32 }
 0x71e   : > { %5319 = vmatpush3.msk.msra.mxu1 %vm734_vm14, %v2997_v32 }
 0x71f   : > { %5313 = vmatmul.mubr.msk.f32.gmra.mrb[8].mxu1 %vm731_vm15, %v2861_v58 }
 0x720   : > { %v2990_v24 = vpop.permute.xlu0 %2989  ;;  %v2984_v8 = vpop.permute.xlu1 %2983  ;;  %5315 = vmatprep.mubr.msk.f32.mxu1 %vm731_vm15, %v2863_v27 }
 0x723   : > { %5316 = vmatmul.mubr.msk.f32.gmra.mrb[10].mxu1 %vm731_vm15, %v2865_v61 }
 0x724   : > { %v2994_v10 = vpop.permute.xlu0 %2993  ;;  %v2988_v9 = vpop.permute.xlu1 %2987  ;;  %5320 = vmatprep.mubr.msk.f32.mxu1 %vm731_vm15, %v2984_v8 }
 0x727   : > { %5321 = vmatmul.mubr.msk.f32.vlgmr.msra.gmra.mrb[6].mxu1 %vm731_vm15, %v2986_v34 }
 0x728   : > { %v3114_v12 = vpop.permute.xlu0 %3113  ;;  %v2992_v13 = vpop.permute.xlu1 %2991  ;;  %5323 = vmatprep.mubr.msk.f32.mxu1 %vm731_vm15, %v2988_v9 }
 0x72b   : > { %5324 = vmatmul.mubr.msk.f32.gmra.mrb[8].mxu1 %vm731_vm15, %v2990_v24 }
 0x72c   : > { %v3118_v15 = vpop.permute.xlu0 %3117  ;;  %v3116_v16 = vpop.permute.xlu1 %3115  ;;  %5326 = vmatprep.mubr.msk.f32.mxu1 %vm731_vm15, %v2992_v13 }
 0x72f   : > { %5327 = vmatmul.mubr.msk.f32.gmra.mrb[10].mxu1 %vm731_vm15, %v2994_v10 }
 0x730   : > { %v3122_v18 = vpop.permute.xlu0 %3121  ;;  %v3127_v19 = vpop.permute.xlu1 %3126  ;;  %5331 = vmatprep.mubr.msk.f32.mxu1 %vm731_vm15, %v3114_v12 }
 0x731   : > { %5329 = vmatprep.subr.msk.mxu1 %vm734_vm14, %v3127_v19 }
 0x732   : > { %5330 = vmatpush3.msk.msra.mxu1 %vm734_vm14, %v3127_v19 }
 0x733   : > { %5332 = vmatmul.mubr.msk.f32.vlgmr.msra.gmra.mrb[6].mxu1 %vm731_vm15, %v3116_v16 }
 0x734   : > { %v3256_v23 = vpop.permute.xlu0 %3255  ;;  %5334 = vmatprep.mubr.msk.f32.mxu1 %vm731_vm15, %v3118_v15  ;;  %v3120_v30 = vpop.permute.xlu1 %3119 }
 0x735   : > { %5340 = vmatprep.subr.msk.mxu1 %vm734_vm14, %v3256_v23 }
 0x736   : > { %5341 = vmatpush3.msk.msra.mxu1 %vm734_vm14, %v3256_v23 }
 0x737   : > { %5335 = vmatmul.mubr.msk.f32.gmra.mrb[8].mxu1 %vm731_vm15, %v3120_v30 }
 0x738   : > { %5337 = vmatprep.mubr.msk.f32.mxu1 %vm731_vm15, %v3122_v18  ;;  %v3124_v26 = vpop.permute.xlu1 %3123  ;;  %v3246_v31 = vpop.permute.xlu0 %3245 }
 0x73b   : > { %5338 = vmatmul.mubr.msk.f32.gmra.mrb[10].mxu1 %vm731_vm15, %v3124_v26 }
 0x73c   : > { %v3244_v36 = vpop.permute.xlu1 %3243  ;;  %v3250_v37 = vpop.permute.xlu0 %3249 }
 0x73d   : > { %5342 = vmatprep.mubr.msk.f32.mxu1 %vm731_vm15, %v3244_v36 }
 0x73f   : > { %5343 = vmatmul.mubr.msk.f32.vlgmr.msra.gmra.mrb[6].mxu1 %vm731_vm15, %v3246_v31 }
 0x740   : > { %v3248_v45 = vpop.permute.xlu1 %3247  ;;  %v3254_v38 = vpop.permute.xlu0 %3253 }
 0x741   : > { %5345 = vmatprep.mubr.msk.f32.mxu1 %vm731_vm15, %v3248_v45 }
 0x743   : > { %5346 = vmatmul.mubr.msk.f32.gmra.mrb[8].mxu1 %vm731_vm15, %v3250_v37 }
 0x744   : > { %v3252_v39 = vpop.permute.xlu1 %3251  ;;  %v3373_v14 = vpop.permute.xlu0 %3372 }
 0x745   : > { %5348 = vmatprep.mubr.msk.f32.mxu1 %vm731_vm15, %v3252_v39 }
 0x747   : > { %5349 = vmatmul.mubr.msk.f32.gmra.mrb[10].mxu1 %vm731_vm15, %v3254_v38 }
 0x748   : > { %5353 = vmatprep.mubr.msk.f32.mxu1 %vm731_vm15, %v3373_v14  ;;  %v3377_v17 = vpop.permute.xlu0 %3376 }
 0x74c   : > { %v3381_v42 = vpop.permute.xlu0 %3380 }
 0x75d   : > { %v2451_v56 = vpop.permute.xlu0 %2450 }
 0x761   : > { %v2436_v6 = vpop.permute.xlu0 %2435 }
 0x765   : > { %v2446_v57 = vpop.permute.xlu0 %2445 }
 0x775   : > { %v3386_v0 = vpop.permute.xlu1 %3385 }
 0x776   : > { %5351 = vmatprep.subr.msk.mxu1 %vm734_vm14, %v3386_v0 }
 0x777   : > { %5352 = vmatpush3.msk.msra.mxu1 %vm734_vm14, %v3386_v0 }
 0x779   : > { %v3375_v40 = vpop.permute.xlu1 %3374 }
 0x77a   : > { %5354 = vmatmul.mubr.msk.f32.vlgmr.msra.gmra.mrb[6].mxu1 %vm731_vm15, %v3375_v40 }
 0x77b   : > { %5356 = vmatprep.mubr.msk.f32.mxu1 %vm731_vm15, %v3377_v17 }
 0x77d   : > { %v3379_v46 = vpop.permute.xlu1 %3378 }
 0x77e   : > { %5357 = vmatmul.mubr.msk.f32.gmra.mrb[8].mxu1 %vm731_vm15, %v3379_v46 }
 0x77f   : > { %5359 = vmatprep.mubr.msk.f32.mxu1 %vm731_vm15, %v3381_v42 }
 0x781   : > { %v3383_v55 = vpop.permute.xlu1 %3382 }
 0x782   : > { %5360 = vmatmul.mubr.msk.f32.gmra.mrb[10].mxu1 %vm731_vm15, %v3383_v55 }
 0x792   : > { %v2456_v2 = vpop.permute.xlu1 %2455 }
 0x796   : > { %v2431_v47 = vpop.permute.xlu1 %2430 }
 0x79a   : > { %v2441_v58 = vpop.permute.xlu1 %2440 }
 0x84d   : > { %v5355_v63 = vpop.f32.mrb[6].mxu1 }
 0x84e   : > { %v3467_v4 = vpop.f32.mrb[7].mxu1  ;;  %v5760_v52 = vadd.f32 %v5355_v63, %v2436_v6 }
 0x84f   : > { %v5761_v27 = vadd.f32 %v3467_v4, %v2431_v47 }
 0x850   : > { %v3503_v32 = vmax.f32 %v5760_v52, 0.0 }
 0x851   : > { %v5358_v20 = vpop.f32.mrb[8].mxu1  ;;  %v3502_v24 = vmax.f32 %v5761_v27, 0.0 }
 0x852   : > { %v3477_v41 = vpop.f32.mrb[9].mxu1  ;;  %v5762_v61 = vadd.f32 %v5358_v20, %v2446_v57 }
 0x853   : > { %v5763_v8 = vadd.f32 %v3477_v41, %v2441_v58 }
 0x854   : > { %v3505_v10 = vmax.f32 %v5762_v61, 0.0 }
 0x855   : > { %v5361_v43 = vpop.f32.mrb[10].mxu1  ;;  %v3504_v9 = vmax.f32 %v5763_v8, 0.0 }
 0x856   : > { %v5764_v44 = vadd.f32 %v5361_v43, %v2456_v2  ;;  %v3487_v50 = vpop.f32.mrb[11].mxu1 }
 0x857   : > { %v5765_v51 = vadd.f32 %v3487_v50, %v2451_v56 }
 0x858   : > { %v3507_v53 = vmax.f32 %v5764_v44, 0.0 }
 0x859   : > { %v3506_v34 = vmax.f32 %v5765_v51, 0.0 }
 0x85a   : > { %3524 = vrot.lane.b32.xlu0 %v3507_v53, %s6148_s28 }
 0x85b   : > { %3522 = vrot.lane.b32.xlu1 %v3506_v34, %s6148_s28 }
 0x85e   : > { %3516 = vrot.lane.b32.xlu0 %v3503_v32, %s6148_s28 }
 0x85f   : > { %3514 = vrot.lane.b32.xlu1 %v3502_v24, %s6148_s28 }
 0x862   : > { %3520 = vrot.lane.b32.xlu0 %v3505_v10, %s6148_s28 }
 0x863   : > { %3518 = vrot.lane.b32.xlu1 %v3504_v9, %s6148_s28 }
 0x8cc   : > { %v3525_v12 = vpop.permute.xlu0 %3524 }
 0x8cd   : > { %v3537_v13 = vsel %vm2277_vm1, 0.0, %v3525_v12  ;;  %v3523_v15 = vpop.permute.xlu1 %3522 }
 0x8ce   : > { %v7225_v16 = vsel %vm2279_vm3, %v3537_v13, 0.0  ;;  %v3536_v18 = vsel %vm2277_vm1, 0.0, %v3523_v15 }
 0x8cf   : > { %v7229_v19 = vsel %vm2279_vm3, %v3536_v18, 0.0  ;;  %v3555_v23 = vmul.f32 %v7225_v16, %v7023_v22  ;;  %v3561_v46 = vmul.f32 %v7225_v16, %v7028_v25  ;;  %v7277_v50 = vmul.f32 %v7225_v16, %v7117_v11 }
 0x8d0   : > { %v3517_v30 = vpop.permute.xlu0 %3516  ;;  %v3554_v26 = vmul.f32 %v7229_v19, %v7023_v22  ;;  %v3560_v2 = vmul.f32 %v7229_v19, %v7028_v25  ;;  %v7273_v44 = vmul.f32 %v7229_v19, %v7117_v11  ;;  %v7297_v27 = vmul.f32 %v6959_v59, %v7229_v19 }
 0x8d1   : > { %v3533_v31 = vsel %vm2277_vm1, 0.0, %v3517_v30  ;;  %v3515_v36 = vpop.permute.xlu1 %3514  ;;  %v7309_v58 = vmul.f32 %v6959_v59, %v7225_v16  ;;  %v5957_v12 = vpack.i.bf16 %v7225_v16, %v7229_v19 }
 0x8d2   : > { %v7237_v37 = vsel %vm2279_vm3, %v3533_v31, 0.0  ;;  %v3532_v45 = vsel %vm2277_vm1, 0.0, %v3515_v36  ;;  %v5912_v38 = vpack.i.bf16 %v3555_v23, %v3554_v26  ;;  %v5932_v6 = vpack.i.bf16 %v3561_v46, %v3560_v2  ;;  %v286_v31 = vld [vmem:[%s7817_s2 + $0x38] sm:$0xff]  ;;  %v283_v36 = vld [vmem:[%s7817_s2 + $0x8] sm:$0xff] }
 0x8d3   : > { %v7241_v39 = vsel %vm2279_vm3, %v3532_v45, 0.0  ;;  %v3557_v14 = vmul.f32 %v7237_v37, %v7028_v25  ;;  %v7285_v51 = vmul.f32 %v6959_v59, %v7237_v37  ;;  %v6072_v57 = vpack.i.bf16 %v7277_v50, %v7273_v44  ;;  %v284_v45 = vld [vmem:[%s7817_s2 + $0x10] sm:$0xff]  ;;  %v7456_v44 = vld [vmem:[%s7817_s2 + $0xd8] sm:$0xff]  ;;  %v7461_v50 = vld [vmem:[%s7817_s2 + $0xa8] sm:$0xff] }
 0x8d4   : > { %v3521_v0 = vpop.permute.xlu0 %3520  ;;  %5913 = vrot.lane.b32.xlu1 %v5912_v38, %s6123_s20  ;;  %v3556_v17 = vmul.f32 %v7241_v39, %v7028_v25  ;;  %v7269_v43 = vpack.i.bf16 %v7237_v37, %v7241_v39  ;;  %v5600_v24 = vpack.c.bf16 %v7309_v58, %v7297_v27  ;;  %v3562_v8 = vmul.f32 %v7241_v39, %v7069_v35 }
 0x8d5   : > { %v3535_v40 = vsel %vm2277_vm1, 0.0, %v3521_v0  ;;  %v3519_v42 = vpop.permute.xlu1 %3518  ;;  %v3550_v10 = vmul.f32 %v7241_v39, %v7023_v22  ;;  %v3551_v9 = vmul.f32 %v7237_v37, %v7023_v22  ;;  %v5982_v0 = vpack.i.bf16 %v284_v45, %v283_v36 }
 0x8d6   : > { %v7252_v55 = vsel %vm2279_vm3, %v3535_v40, 0.0  ;;  %v3534_v56 = vsel %vm2277_vm1, 0.0, %v3519_v42  ;;  %v5917_v63 = vpack.i.bf16 %v3557_v14, %v3556_v17  ;;  %v3568_v17 = vmul.f32 %v7241_v39, %v7041_v29 }
 0x8d7   : > { %v7258_v4 = vsel %vm2279_vm3, %v3534_v56, 0.0  ;;  %v3559_v20 = vmul.f32 %v7252_v55, %v7028_v25  ;;  %v7293_v53 = vmul.f32 %v6959_v59, %v7252_v55  ;;  %v5962_v15 = vpack.i.bf16 %v3551_v9, %v3550_v10  ;;  %v293_v10 = vld [vmem:[%s7817_s2 + $0xa0] sm:$0xff] }
 0x8d8   : > { %5918 = vrot.lane.b32.xlu0 %v5917_v63, %s6147_s10  ;;  %v3558_v41 = vmul.f32 %v7258_v4, %v7028_v25  ;;  %v7281_v25 = vmul.f32 %v6959_v59, %v7241_v39  ;;  %v7289_v52 = vmul.f32 %v6959_v59, %v7258_v4  ;;  %v5947_v61 = vpack.i.bf16 %v7252_v55, %v7258_v4 }
 0x8d9   : > { %v3563_v59 = vmul.f32 %v7237_v37, %v7069_v35  ;;  %v3564_v18 = vmul.f32 %v7258_v4, %v7069_v35  ;;  %v3565_v23 = vmul.f32 %v7252_v55, %v7069_v35  ;;  %v3552_v30 = vmul.f32 %v7258_v4, %v7023_v22 }
 0x8da   : > { %v5922_v47 = vpack.i.bf16 %v3559_v20, %v3558_v41  ;;  %v5592_v34 = vpack.c.bf16 %v7285_v51, %v7281_v25  ;;  %v5596_v32 = vpack.c.bf16 %v7293_v53, %v7289_v52  ;;  %v3553_v26 = vmul.f32 %v7252_v55, %v7023_v22 }
 0x8db   : > { %v5967_v13 = vpack.i.bf16 %v3563_v59, %v3562_v8  ;;  %v5977_v38 = vpack.i.bf16 %v3565_v23, %v3564_v18  ;;  %v5987_v22 = vpack.i.bf16 %v286_v31, %v6967_v62  ;;  %v3569_v40 = vmul.f32 %v7237_v37, %v7041_v29  ;;  %v292_v59 = vld [vmem:[%s7817_s2 + $0x98] sm:$0xff] }
 0x8dc   : > { %5933 = vrot.lane.b32.xlu0 %v5932_v6, %s6147_s10  ;;  %5923 = vrot.lane.b32.xlu1 %v5922_v47, %s6147_s10  ;;  %v5972_v14 = vpack.i.bf16 %v3553_v26, %v3552_v30  ;;  %v3566_v42 = vmul.f32 %v7229_v19, %v7069_v35  ;;  %v3567_v46 = vmul.f32 %v7225_v16, %v7069_v35  ;;  %v287_v35 = vld [vmem:[%s7817_s2 + $0x40] sm:$0xff]  ;;  %v290_v47 = vld [vmem:[%s7817_s2 + $0x70] sm:$0xff]  ;;  %v6157_v30 = vmov 21  }
 0x8dd   : > { %v3572_v62 = vmul.f32 %v7229_v19, %v7041_v29  ;;  %v3573_v56 = vmul.f32 %v7225_v16, %v7041_v29  ;;  %v5997_v63 = vpack.i.bf16 %v3569_v40, %v3568_v17  ;;  %v3570_v20 = vmul.f32 %v7258_v4, %v7041_v29  ;;  %v298_v18 = vld [vmem:[%s7817_s2 + $0xf8] sm:$0xff]  ;;  %6077 = vset.pattern.permute.xlu0 %v6157_v30 }
 0x8de   : > { %v5992_v2 = vpack.i.bf16 %v3567_v46, %v3566_v42  ;;  %v3571_v41 = vmul.f32 %v7252_v55, %v7041_v29  ;;  %v6017_v16 = vpack.i.bf16 %v6987_v3, %v287_v35  ;;  %v289_v29 = vld [vmem:[%s7817_s2 + $0x68] sm:$0xff]  ;;  %v6037_v3 = vpack.i.bf16 %v292_v59, %v6975_v28  ;;  %6078 = vset.pattern.permute.xlu1 %v6157_v30 }
 0x8df   : > { %v6012_v19 = vpack.i.bf16 %v3573_v56, %v3572_v62  ;;  %v6027_v8 = vpack.i.bf16 %v290_v47, %v289_v29  ;;  %v3574_v9 = vmul.f32 %v7241_v39, %v7117_v11  ;;  %v295_v28 = vld [vmem:[%s7817_s2 + $0xc8] sm:$0xff]  ;;  %v3576_v39 = vmul.f32 %v7258_v4, %v7117_v11  ;;  %v7431_v4 = vld [vmem:[%s7817_s2 + $0x18] sm:$0xff] }
 0x8e0   : > { %5938 = vrot.lane.b32.xlu0 %v7269_v43, %s6137_s12  ;;  %5928 = vrot.lane.b32.xlu1 %v7269_v43, %s6122_s19  ;;  %v6002_v6 = vpack.i.bf16 %v3571_v41, %v3570_v20 }
 0x8e4   : > { %5948 = vrot.lane.b32.xlu0 %v5947_v61, %s6137_s12  ;;  %5943 = vrot.lane.b32.xlu1 %v5947_v61, %s6122_s19 }
 0x8e8   : > { %5958 = vrot.lane.b32.xlu0 %v5957_v12, %s6137_s12  ;;  %5953 = vrot.lane.b32.xlu1 %v5957_v12, %s6122_s19 }
 0x8ec   : > { %5968 = vrot.lane.b32.xlu0 %v5967_v13, %s6152_s27  ;;  %5963 = vrot.lane.b32.xlu1 %v5962_v15, %s6123_s20  ;;  %v6042_v13 = vpack.i.bf16 %v6994_v5, %v293_v10 }
 0x8f0   : > { %5978 = vrot.lane.b32.xlu0 %v5977_v38, %s6152_s27  ;;  %5973 = vrot.lane.b32.xlu1 %v5972_v14, %s6123_s20 }
 0x8f4   : > { %5988 = vrot.lane.b32.xlu0 %v5987_v22, %s6156_s17  ;;  %5983 = vrot.lane.b32.xlu1 %v5982_v0, %s6156_s17 }
 0x8f8   : > { %5998 = vrot.lane.b32.xlu0 %v5997_v63, %s6124_s21  ;;  %5993 = vrot.lane.b32.xlu1 %v5992_v2, %s6152_s27 }
 0x8fc   : > { %6013 = vrot.lane.b32.xlu0 %v6012_v19, %s6124_s21  ;;  %6003 = vrot.lane.b32.xlu1 %v6002_v6, %s6124_s21 }
 0x900   : > { %6018 = vrot.lane.b32.xlu0 %v6017_v16, %s6156_s17  ;;  %6008 = vrot.lane.b32.xlu1 %v7269_v43, %s6125_s22  ;;  %v3575_v43 = vmul.f32 %v7237_v37, %v7117_v11  ;;  %v3577_v37 = vmul.f32 %v7252_v55, %v7117_v11  ;;  %v6062_v55 = vpack.i.bf16 %v298_v18, %v6981_v1  ;;  %v7442_v1 = vld [vmem:[%s7817_s2 + $0x78] sm:$0xff] }
 0x902   : > { %v6047_v15 = vpack.i.bf16 %v3575_v43, %v3574_v9  ;;  %v6057_v23 = vpack.i.bf16 %v3577_v37, %v3576_v39 }
 0x904   : > { %6028 = vrot.lane.b32.xlu0 %v6027_v8, %s6156_s17  ;;  %6023 = vrot.lane.b32.xlu1 %v5947_v61, %s6125_s22  ;;  %v296_v61 = vld [vmem:[%s7817_s2 + $0xd0] sm:$0xff] }
 0x905   : > { %v6052_v5 = vpack.i.bf16 %v296_v61, %v295_v28 }
 0x908   : > { %6038 = vrot.lane.b32.xlu0 %v6037_v3, %s6156_s17  ;;  %6033 = vrot.lane.b32.xlu1 %v5957_v12, %s6125_s22  ;;  %v299_v12 = vld [vmem:[%s7817_s2 + $0x100] sm:$0xff]  ;;  %s5834_s22 = smul.u32 48, %s7824_s25 }
 0x909   : > { %v6067_v11 = vpack.i.bf16 %v7001_v7, %v299_v12  ;;  %v7447_v7 = vld [vmem:[%s7817_s2 + $0x48] sm:$0xff] }
 0x90a   : > { %s275_s13 = scalar_lea.vmem %s7822_s7, %s5834_s22 }
 0x90c   : > { %6048 = vrot.lane.b32.xlu0 %v6047_v15, %s6126_s23  ;;  %6043 = vrot.lane.b32.xlu1 %v6042_v13, %s6156_s17 }
 0x910   : > { %6058 = vrot.lane.b32.xlu0 %v6057_v23, %s6126_s23  ;;  %6053 = vrot.lane.b32.xlu1 %v6052_v5, %s6156_s17 }
 0x914   : > { %6068 = vrot.lane.b32.xlu0 %v6067_v11, %s6156_s17  ;;  %6063 = vrot.lane.b32.xlu1 %v6062_v55, %s6156_s17 }
 0x918   : > { %3808 = vrot.lane.b32.xlu0 %v7431_v4, %s6156_s17  ;;  %6073 = vrot.lane.b32.xlu1 %v6072_v57, %s6126_s23  ;;  %v7470_v57 = vld [vmem:[%s7817_s2 + $0x108] sm:$0xff] }
 0x91c   : > { %3824 = vrot.lane.b32.xlu0 %v7442_v1, %s6156_s17  ;;  %3816 = vrot.lane.b32.xlu1 %v7447_v7, %s6156_s17 }
 0x920   : > { %3840 = vrot.lane.b32.xlu0 %v7456_v44, %s6156_s17  ;;  %3832 = vrot.lane.b32.xlu1 %v7461_v50, %s6156_s17 }
 0x924   : > { %3848 = vrot.lane.b32.xlu1 %v7470_v57, %s6156_s17  ;;  %3761 = vperm.xlu0 %6077, %v7169_v33   ;;  %s6159_s17 = smov 44  }
 0x928   : > { %3765 = vperm.xlu1 %6078, %v7138_v48   ;;  %3773 = vperm.xlu0 %6077, %v7148_v49  }
 0x92c   : > { %3769 = vperm.xlu1 %6078, %v7177_v60   ;;  %3781 = vperm.xlu0 %6077, %v7159_v54  }
 0x930   : > { %3777 = vperm.xlu1 %6078, %v7126_v21  }
 0x946   : > { %v5914_v26 = vpop.permute.xlu1 %5913 }
 0x947   : > { %v5916_v31 = vunpack.i.h.bf16 %v5914_v26  ;;  %v5915_v36 = vunpack.i.l.bf16 %v5914_v26 }
 0x949   : > { %v5590_v45 = vpack.c.bf16 %v5916_v31, %v5915_v36 }
 0x94a   : > { %v5919_v38 = vpop.permute.xlu0 %5918 }
 0x94b   : > { %v5921_v14 = vunpack.i.h.bf16 %v5919_v38  ;;  %v5920_v22 = vunpack.i.l.bf16 %v5919_v38  ;;  %5591 = vmatprep.subr.bf16.mxu0 %v5590_v45  ;;  %v6158_v45 = vmov 0.0|0.0  }
 0x94c   : > { %5593 = vmatpush3.bf16.msra.mxu0 %v5592_v34 }
 0x94d   : > { %v5594_v48 = vpack.c.bf16 %v5921_v14, %v5920_v22 }
 0x94e   : > { %v5934_v33 = vpop.permute.xlu0 %5933  ;;  %v5924_v60 = vpop.permute.xlu1 %5923 }
 0x94f   : > { %v5936_v49 = vunpack.i.h.bf16 %v5934_v33  ;;  %v5935_v0 = vunpack.i.l.bf16 %v5934_v33  ;;  %v5926_v21 = vunpack.i.h.bf16 %v5924_v60  ;;  %v5925_v17 = vunpack.i.l.bf16 %v5924_v60  ;;  %5595 = vmatprep.subr.bf16.mxu0 %v5594_v48 }
 0x950   : > { %5597 = vmatpush3.bf16.msra.mxu0 %v5596_v32 }
 0x951   : > { %v5598_v54 = vpack.c.bf16 %v5926_v21, %v5925_v17  ;;  %v5602_v40 = vpack.c.bf16 %v5936_v49, %v5935_v0 }
 0x952   : > { %v5939_v42 = vpop.permute.xlu0 %5938  ;;  %v5929_v46 = vpop.permute.xlu1 %5928 }
 0x953   : > { %v5941_v62 = vunpack.i.h.bf16 %v5939_v42  ;;  %v5940_v56 = vunpack.i.l.bf16 %v5939_v42  ;;  %v5931_v25 = vunpack.i.h.bf16 %v5929_v46  ;;  %v5930_v51 = vunpack.i.l.bf16 %v5929_v46  ;;  %5599 = vmatprep.subr.bf16.mxu0 %v5598_v54 }
 0x954   : > { %5601 = vmatpush3.bf16.msra.mxu0 %v5600_v24 }
 0x955   : > { %v5604_v34 = vpack.c.bf16 %v5931_v25, %v5930_v51  ;;  %5603 = vmatprep.subr.bf16.mxu0 %v5602_v40  ;;  %v5606_v63 = vpack.c.bf16 %v5941_v62, %v5940_v56 }
 0x956   : > { %v5949_v2 = vpop.permute.xlu0 %5948  ;;  %v5944_v20 = vpop.permute.xlu1 %5943 }
 0x957   : > { %v5951_v52 = vunpack.i.h.bf16 %v5949_v2  ;;  %v5950_v53 = vunpack.i.l.bf16 %v5949_v2  ;;  %v5946_v32 = vunpack.i.h.bf16 %v5944_v20  ;;  %v5945_v41 = vunpack.i.l.bf16 %v5944_v20 }
 0x958   : > { %5605 = vmatpush3.bf16.msra.mxu0 %v5604_v34 }
 0x959   : > { %v5608_v35 = vpack.c.bf16 %v5946_v32, %v5945_v41  ;;  %5607 = vmatprep.subr.bf16.mxu0 %v5606_v63  ;;  %v5610_v19 = vpack.c.bf16 %v5951_v52, %v5950_v53 }
 0x95a   : > { %v5959_v6 = vpop.permute.xlu0 %5958  ;;  %v5954_v16 = vpop.permute.xlu1 %5953 }
 0x95b   : > { %v5961_v29 = vunpack.i.h.bf16 %v5959_v6  ;;  %v5960_v47 = vunpack.i.l.bf16 %v5959_v6  ;;  %v5956_v8 = vunpack.i.h.bf16 %v5954_v16  ;;  %v5955_v27 = vunpack.i.l.bf16 %v5954_v16 }
 0x95c   : > { %5609 = vmatpush3.bf16.msra.mxu0 %v5608_v35 }
 0x95d   : > { %v5612_v58 = vpack.c.bf16 %v5956_v8, %v5955_v27  ;;  %5611 = vmatprep.subr.bf16.mxu0 %v5610_v19  ;;  %v5614_v24 = vpack.c.bf16 %v5961_v29, %v5960_v47 }
 0x95e   : > { %v5969_v59 = vpop.permute.xlu0 %5968  ;;  %v5964_v3 = vpop.permute.xlu1 %5963 }
 0x95f   : > { %v5971_v10 = vunpack.i.h.bf16 %v5969_v59  ;;  %v5970_v9 = vunpack.i.l.bf16 %v5969_v59  ;;  %v5966_v43 = vunpack.i.h.bf16 %v5964_v3  ;;  %v5965_v13 = vunpack.i.l.bf16 %v5964_v3 }
 0x960   : > { %5613 = vmatpush3.bf16.msra.mxu0 %v5612_v58 }
 0x961   : > { %v5616_v28 = vpack.c.bf16 %v5966_v43, %v5965_v13  ;;  %5615 = vmatprep.subr.bf16.mxu0 %v5614_v24  ;;  %v5618_v39 = vpack.c.bf16 %v5971_v10, %v5970_v9 }
 0x962   : > { %v5979_v61 = vpop.permute.xlu0 %5978  ;;  %v5974_v15 = vpop.permute.xlu1 %5973 }
 0x963   : > { %v5976_v37 = vunpack.i.h.bf16 %v5974_v15  ;;  %v5975_v5 = vunpack.i.l.bf16 %v5974_v15  ;;  %v5981_v18 = vunpack.i.h.bf16 %v5979_v61  ;;  %v5980_v23 = vunpack.i.l.bf16 %v5979_v61 }
 0x964   : > { %5617 = vmatpush3.bf16.msra.mxu0 %v5616_v28 }
 0x965   : > { %v5620_v12 = vpack.c.bf16 %v5976_v37, %v5975_v5  ;;  %5619 = vmatprep.subr.bf16.mxu0 %v5618_v39  ;;  %v5623_v14 = vpack.c.bf16 %v5981_v18, %v5980_v23 }
 0x966   : > { %v5989_v11 = vpop.permute.xlu0 %5988  ;;  %v7489_v55 = vpop.permute.xlu1 %5983 }
 0x967   : > { %v5990_v30 = vunpack.i.l.bf16 %v5989_v11  ;;  %v5986_v26 = vunpack.i.h.bf16 %v7489_v55  ;;  %v5985_v31 = vunpack.i.l.bf16 %v7489_v55  ;;  %v5991_v25 = vunpack.i.h.bf16 %v5989_v11 }
 0x968   : > { %5621 = vmatpush3.bf16.msra.mxu0 %v5620_v12 }
 0x969   : > { %v3852_v36 = vsel %vm3850_vm4, %v5985_v31, %v5986_v26  ;;  %5622 = vmatprep.subr.bf16.mxu0 %v6158_v45  ;;  %v3851_v38 = vsel %vm3850_vm4, %v5990_v30, %v5985_v31 }
 0x96a   : > { %v5999_v22 = vpop.permute.xlu0 %5998  ;;  %v5994_v48 = vpop.permute.xlu1 %5993  ;;  %3964 = vmatprep.mubr.f32.mxu0 %v3852_v36 }
 0x96b   : > { %v5996_v33 = vunpack.i.h.bf16 %v5994_v48  ;;  %v5995_v60 = vunpack.i.l.bf16 %v5994_v48  ;;  %3965 = vmatmul.mubr.f32.vlgmr.msra.gmra.mrb[8].mxu0 %v3851_v38  ;;  %v6001_v0 = vunpack.i.h.bf16 %v5999_v22  ;;  %v6000_v21 = vunpack.i.l.bf16 %v5999_v22 }
 0x96c   : > { %5624 = vmatpush1.bf16.msra.mxu0 %v5623_v14 }
 0x96d   : > { %v5626_v49 = vpack.c.bf16 %v5996_v33, %v5995_v60  ;;  %5625 = vmatprep.subr.bf16.mxu0 %v6158_v45  ;;  %v5629_v40 = vpack.c.bf16 %v6001_v0, %v6000_v21 }
 0x96e   : > { %v6014_v17 = vpop.permute.xlu0 %6013  ;;  %v6004_v54 = vpop.permute.xlu1 %6003 }
 0x96f   : > { %v6006_v42 = vunpack.i.h.bf16 %v6004_v54  ;;  %v6005_v46 = vunpack.i.l.bf16 %v6004_v54  ;;  %v6016_v20 = vunpack.i.h.bf16 %v6014_v17  ;;  %v6015_v52 = vunpack.i.l.bf16 %v6014_v17 }
 0x970   : > { %5627 = vmatpush1.bf16.msra.mxu0 %v5626_v49 }
 0x971   : > { %5628 = vmatprep.subr.bf16.mxu0 %v6158_v45  ;;  %v5632_v53 = vpack.c.bf16 %v6006_v42, %v6005_v46  ;;  %v5635_v16 = vpack.c.bf16 %v6016_v20, %v6015_v52 }
 0x972   : > { %v7500_v62 = vpop.permute.xlu0 %6018  ;;  %v6009_v56 = vpop.permute.xlu1 %6008 }
 0x973   : > { %v6021_v51 = vunpack.i.h.bf16 %v7500_v62  ;;  %v6020_v34 = vunpack.i.l.bf16 %v7500_v62  ;;  %v6011_v29 = vunpack.i.h.bf16 %v6009_v56  ;;  %v6010_v47 = vunpack.i.l.bf16 %v6009_v56 }
 0x974   : > { %5630 = vmatpush1.bf16.msra.mxu0 %v5629_v40 }
 0x975   : > { %v3855_v63 = vsel %vm3850_vm4, %v5991_v25, %v6020_v34  ;;  %v3854_v2 = vsel %vm3850_vm4, %v6021_v51, %v5991_v25  ;;  %5631 = vmatprep.subr.bf16.mxu0 %v6158_v45  ;;  %v5638_v3 = vpack.c.bf16 %v6011_v29, %v6010_v47  ;;  %v4097_v29 = vld [vmem:[%s7819_s4 + $0x8] sm:$0xff]  ;;  %v4218_v47 = vld [vmem:[%s7819_s4 + $0x40] sm:$0xff] }
 0x976   : > { %v7509_v32 = vpop.permute.xlu0 %6028  ;;  %v6024_v41 = vpop.permute.xlu1 %6023  ;;  %3969 = vmatprep.mubr.f32.mxu0 %v3855_v63 }
 0x977   : > { %v6031_v35 = vunpack.i.h.bf16 %v7509_v32  ;;  %v6030_v19 = vunpack.i.l.bf16 %v7509_v32  ;;  %3970 = vmatmul.mubr.f32.gmra.mrb[10].mxu0 %v3854_v2  ;;  %v6026_v10 = vunpack.i.h.bf16 %v6024_v41  ;;  %v6025_v9 = vunpack.i.l.bf16 %v6024_v41 }
 0x978   : > { %5633 = vmatpush1.bf16.msra.mxu0 %v5632_v53 }
 0x979   : > { %5634 = vmatprep.subr.bf16.mxu0 %v6158_v45  ;;  %v3858_v6 = vsel %vm3850_vm4, %v6030_v19, %v6031_v35  ;;  %v5641_v37 = vpack.c.bf16 %v6026_v10, %v6025_v9  ;;  %v4221_v9 = vld [vmem:[%s7819_s4 + $0x58] sm:$0xff] }
 0x97a   : > { %v6039_v8 = vpop.permute.xlu0 %6038  ;;  %v6034_v27 = vpop.permute.xlu1 %6033  ;;  %3974 = vmatprep.mubr.f32.mxu0 %v3858_v6 }
 0x97b   : > { %v6040_v58 = vunpack.i.l.bf16 %v6039_v8  ;;  %v6041_v24 = vunpack.i.h.bf16 %v6039_v8  ;;  %v6036_v5 = vunpack.i.h.bf16 %v6034_v27  ;;  %v6035_v12 = vunpack.i.l.bf16 %v6034_v27  ;;  %v4219_v27 = vld [vmem:[%s7819_s4 + $0x48] sm:$0xff] }
 0x97c   : > { %5636 = vmatpush1.bf16.msra.mxu0 %v5635_v16 }
 0x97d   : > { %5637 = vmatprep.subr.bf16.mxu0 %v6158_v45  ;;  %v3857_v59 = vsel %vm3850_vm4, %v6040_v58, %v6030_v19  ;;  %v5644_v36 = vpack.c.bf16 %v6036_v5, %v6035_v12  ;;  %v5671_v58 = vpack.c.bf16 %v4219_v27, %v4218_v47  ;;  %v4102_v5 = vld [vmem:[%s7819_s4 + $0x30] sm:$0xff]  ;;  %v4103_v12 = vld [vmem:[%s7819_s4 + $0x38] sm:$0xff] }
 0x97e   : > { %v6049_v43 = vpop.permute.xlu0 %6048  ;;  %v7519_v13 = vpop.permute.xlu1 %6043  ;;  %3975 = vmatmul.mubr.f32.gmra.mrb[12].mxu0 %v3857_v59  ;;  %v4099_v59 = vld [vmem:[%s7819_s4 + $0x18] sm:$0xff] }
 0x97f   : > { %v6046_v28 = vunpack.i.h.bf16 %v7519_v13  ;;  %v6045_v61 = vunpack.i.l.bf16 %v7519_v13  ;;  %v6051_v38 = vunpack.i.h.bf16 %v6049_v43  ;;  %v6050_v14 = vunpack.i.l.bf16 %v6049_v43  ;;  %v4100_v13 = vld [vmem:[%s7819_s4 + $0x20] sm:$0xff] }
 0x980   : > { %5639 = vmatpush1.bf16.msra.mxu0 %v5638_v3  ;;  %v4220_v3 = vld [vmem:[%s7819_s4 + $0x50] sm:$0xff] }
 0x981   : > { %5640 = vmatprep.subr.bf16.mxu0 %v6158_v45  ;;  %v3861_v15 = vsel %vm3850_vm4, %v6041_v24, %v6045_v61  ;;  %v3860_v39 = vsel %vm3850_vm4, %v6046_v28, %v6041_v24  ;;  %v5647_v54 = vpack.c.bf16 %v6051_v38, %v6050_v14  ;;  %v4098_v24 = vld [vmem:[%s7819_s4 + $0x10] sm:$0xff]  ;;  %v5675_v43 = vpack.c.bf16 %v4221_v9, %v4220_v3  ;;  %v4101_v28 = vld [vmem:[%s7819_s4 + $0x28] sm:$0xff]  ;;  %v4424_v38 = vld [vmem:[%s7819_s4 + $0xc0] sm:$0xff] }
 0x982   : > { %v6059_v18 = vpop.permute.xlu0 %6058  ;;  %v6054_v23 = vpop.permute.xlu1 %6053  ;;  %3979 = vmatprep.mubr.f32.mxu0 %v3861_v15  ;;  %v5659_v10 = vpack.c.bf16 %v4099_v59, %v4098_v24  ;;  %v5663_v15 = vpack.c.bf16 %v4101_v28, %v4100_v13  ;;  %v4323_v59 = vld [vmem:[%s7819_s4 + $0x90] sm:$0xff]  ;;  %v4324_v9 = vld [vmem:[%s7819_s4 + $0x98] sm:$0xff] }
 0x983   : > { %v6056_v11 = vunpack.i.h.bf16 %v6054_v23  ;;  %v6055_v30 = vunpack.i.l.bf16 %v6054_v23  ;;  %3980 = vmatmul.mubr.f32.gmra.mrb[14].mxu0 %v3860_v39  ;;  %v6061_v40 = vunpack.i.h.bf16 %v6059_v18  ;;  %v6060_v42 = vunpack.i.l.bf16 %v6059_v18  ;;  %v4223_v39 = vld [vmem:[%s7819_s4 + $0x68] sm:$0xff]  ;;  %v4224_v18 = vld [vmem:[%s7819_s4 + $0x70] sm:$0xff]  ;;  %v4427_v13 = vld [vmem:[%s7819_s4 + $0xd8] sm:$0xff] }
 0x984   : > { %5642 = vmatpush1.bf16.msra.mxu0 %v5641_v37  ;;  %v5667_v23 = vpack.c.bf16 %v4103_v12, %v4102_v5  ;;  %v4325_v12 = vld [vmem:[%s7819_s4 + $0xa0] sm:$0xff] }
 0x985   : > { %5643 = vmatprep.subr.bf16.mxu0 %v6158_v45  ;;  %v3864_v31 = vsel %vm3850_vm4, %v6055_v30, %v6056_v11  ;;  %v5650_v25 = vpack.c.bf16 %v6061_v40, %v6060_v42  ;;  %v7668_v40 = vld [vmem:[%s7817_s2 + $0xe8] sm:$0xff]  ;;  %v311_v42 = vld [vmem:[%s7817_s2 + $0x110] sm:$0xff] }
 0x986   : > { %v6069_v22 = vpop.permute.xlu0 %6068  ;;  %v6064_v48 = vpop.permute.xlu1 %6063  ;;  %3984 = vmatprep.mubr.f32.mxu0 %v3864_v31  ;;  %v4321_v31 = vld [vmem:[%s7819_s4 + $0x80] sm:$0xff] }
 0x987   : > { %v6071_v33 = vunpack.i.h.bf16 %v6069_v22  ;;  %v6070_v60 = vunpack.i.l.bf16 %v6069_v22  ;;  %v6066_v49 = vunpack.i.h.bf16 %v6064_v48  ;;  %v6065_v0 = vunpack.i.l.bf16 %v6064_v48  ;;  %v4425_v22 = vld [vmem:[%s7819_s4 + $0xc8] sm:$0xff] }
 0x988   : > { %5645 = vmatpush1.bf16.msra.mxu0 %v5644_v36  ;;  %v4322_v36 = vld [vmem:[%s7819_s4 + $0x88] sm:$0xff]  ;;  %v7618_v48 = vpack.c.bf16 %v4425_v22, %v4424_v38 }
 0x989   : > { %5646 = vmatprep.subr.bf16.mxu0 %v6158_v45  ;;  %v3863_v21 = vsel %vm3850_vm4, %v6065_v0, %v6055_v30  ;;  %v3867_v17 = vsel %vm3850_vm4, %v6066_v49, %v6070_v60  ;;  %v3866_v56 = vsel %vm3850_vm4, %v6071_v33, %v6066_v49  ;;  %v7613_v14 = vpack.c.bf16 %v4322_v36, %v4321_v31  ;;  %v301_v33 = vld [vmem:[%s7817_s2 + $0x20] sm:$0xff]  ;;  %v7630_v49 = vld [vmem:[%s7817_s2 + $0x28] sm:$0xff]  ;;  %v303_v0 = vld [vmem:[%s7817_s2 + $0x50] sm:$0xff] }
 0x98a   : > { %3985 = vmatmul.mubr.f32.gmra.mrb[16].mxu0 %v3863_v21  ;;  %v6074_v46 = vpop.permute.xlu1 %6073  ;;  %v3809_v51 = vpop.permute.xlu0 %3808  ;;  %4559 = vrot.lane.b32.xlu1 %v301_v33, %s6159_s17  ;;  %v305_v21 = vld [vmem:[%s7817_s2 + $0x80] sm:$0xff]  ;;  %v4429_v31 = vld [vmem:[%s7819_s4 + $0xe8] sm:$0xff] }
 0x98b   : > { %3989 = vmatprep.mubr.f32.mxu0 %v3867_v17  ;;  %v6076_v63 = vunpack.i.h.bf16 %v6074_v46  ;;  %v6075_v2 = vunpack.i.l.bf16 %v6074_v46  ;;  %v3853_v52 = vsel %vm3850_vm4, %v5986_v26, %v3809_v51  ;;  %4561 = vrot.lane.b32.xlu0 %v7630_v49, %s6159_s17  ;;  %v7650_v17 = vld [vmem:[%s7817_s2 + $0x88] sm:$0xff]  ;;  %v7678_v46 = vld [vmem:[%s7817_s2 + $0x118] sm:$0xff] }
 0x98c   : > { %5648 = vmatpush1.bf16.msra.mxu0 %v5647_v54  ;;  %v309_v54 = vld [vmem:[%s7817_s2 + $0xe0] sm:$0xff] }
 0x98d   : > { %5649 = vmatprep.subr.bf16.mxu0 %v6158_v45  ;;  %v5653_v20 = vpack.c.bf16 %v6076_v63, %v6075_v2 }
 0x98e   : > { %3990 = vmatmul.mubr.f32.gmra.mrb[18].mxu0 %v3866_v56  ;;  %v3817_v53 = vpop.permute.xlu1 %3816  ;;  %v3825_v19 = vpop.permute.xlu0 %3824 }
 0x98f   : > { %4888 = vmatprep.mubr.msk.f32.mxu0 %vm3887_vm5, %v3809_v51  ;;  %v3856_v41 = vsel %vm3850_vm4, %v6020_v34, %v3817_v53  ;;  %v3859_v6 = vsel %vm3850_vm4, %v6031_v35, %v3825_v19  ;;  %v4096_v35 = vld [vmem:[%s7819_s4] sm:$0xff]  ;;  %4565 = vrot.lane.b32.xlu0 %v303_v0, %s6159_s17 }
 0x990   : > { %5651 = vmatpush1.bf16.msra.mxu0 %v5650_v25  ;;  %v5655_v8 = vpack.c.bf16 %v4097_v29, %v4096_v35 }
 0x991   : > { %5652 = vmatprep.subr.bf16.mxu0 %v6158_v45 }
 0x992   : > { %v3833_v16 = vpop.permute.xlu1 %3832  ;;  %v3841_v26 = vpop.permute.xlu0 %3840  ;;  %5656 = vmatprep.subr.bf16.mxu1 %v5655_v8 }
 0x993   : > { %v3862_v55 = vsel %vm3850_vm4, %v6045_v61, %v3833_v16  ;;  %v3865_v62 = vsel %vm3850_vm4, %v6056_v11, %v3841_v26  ;;  %5658 = vmatpush3.bf16.msra.mxu1 %v5655_v8  ;;  %v4222_v61 = vld [vmem:[%s7819_s4 + $0x60] sm:$0xff]  ;;  %v4225_v11 = vld [vmem:[%s7819_s4 + $0x78] sm:$0xff]  ;;  %4571 = vrot.lane.b32.xlu0 %v305_v21, %s6159_s17  ;;  %v4327_v21 = vld [vmem:[%s7819_s4 + $0xb0] sm:$0xff] }
 0x994   : > { %5654 = vmatpush1.bf16.msra.mxu0 %v5653_v20  ;;  %5660 = vmatprep.subr.bf16.mxu1 %v5659_v10  ;;  %v5679_v37 = vpack.c.bf16 %v4223_v39, %v4222_v61  ;;  %v5683_v30 = vpack.c.bf16 %v4225_v11, %v4224_v18  ;;  %v4326_v11 = vld [vmem:[%s7819_s4 + $0xa8] sm:$0xff] }
 0x995   : > { %5672 = vmatprep.subr.bf16.mxu0 %v5671_v58 }
 0x996   : > { %v3849_v34 = vpop.permute.xlu1 %3848 }
 0x997   : > { %4060 = vmatmul.mubr.f32.vlgmr.msra.gmra.mrb[20].mxu0 %v3853_v52  ;;  %v3868_v32 = vsel %vm3850_vm4, %v6070_v60, %v3849_v34  ;;  %5662 = vmatpush3.bf16.msra.mxu1 %v5659_v10  ;;  %v6079_v60 = vpack.i.bf16 %v7447_v7, %v7431_v4  ;;  %v6084_v4 = vpack.i.bf16 %v7461_v50, %v7442_v1  ;;  %v7644_v7 = vld [vmem:[%s7817_s2 + $0x58] sm:$0xff]  ;;  %v307_v1 = vld [vmem:[%s7817_s2 + $0xb0] sm:$0xff] }
 0x998   : > { %4889 = vmatprep.mubr.msk.f32.mxu0 %vm3887_vm5, %v3817_v53  ;;  %5674 = vmatpush3.bf16.msra.mxu0 %v5671_v58  ;;  %v7659_v50 = vld [vmem:[%s7817_s2 + $0xb8] sm:$0xff] }
 0x999   : > { %5676 = vmatprep.subr.bf16.mxu0 %v5675_v43  ;;  %5664 = vmatprep.subr.bf16.mxu1 %v5663_v15 }
 0x99a   : > { %6080 = vrot.lane.b32.xlu1 %v6079_v60, %s6159_s17  ;;  %6085 = vrot.lane.b32.xlu0 %v6084_v4, %s6159_s17  ;;  %v5695_v60 = vpack.c.bf16 %v4326_v11, %v4325_v12 }
 0x99b   : > { %4065 = vmatmul.mubr.f32.gmra.mrb[22].mxu0 %v3856_v41  ;;  %5666 = vmatpush3.bf16.msra.mxu1 %v5663_v15 }
 0x99c   : > { %4890 = vmatprep.mubr.msk.f32.mxu0 %vm3887_vm5, %v3825_v19  ;;  %5678 = vmatpush3.bf16.msra.mxu0 %v5675_v43  ;;  %v4426_v43 = vld [vmem:[%s7819_s4 + $0xd0] sm:$0xff] }
 0x99d   : > { %5680 = vmatprep.subr.bf16.mxu0 %v5679_v37  ;;  %5668 = vmatprep.subr.bf16.mxu1 %v5667_v23  ;;  %v5707_v5 = vpack.c.bf16 %v4427_v13, %v4426_v43 }
 0x99e   : > { %4567 = vrot.lane.b32.xlu1 %v7644_v7, %s6159_s17  ;;  %4579 = vrot.lane.b32.xlu0 %v7659_v50, %s6159_s17 }
 0x99f   : > { %4070 = vmatmul.mubr.f32.gmra.mrb[24].mxu0 %v3859_v6  ;;  %5670 = vmatpush3.bf16.msra.mxu1 %v5667_v23 }
 0x9a0   : > { %4891 = vmatprep.mubr.msk.f32.mxu0 %vm3887_vm5, %v3833_v16  ;;  %5682 = vmatpush3.bf16.msra.mxu0 %v5679_v37  ;;  %v5691_v37 = vpack.c.bf16 %v4324_v9, %v4323_v59 }
 0x9a1   : > { %5684 = vmatprep.subr.bf16.mxu0 %v5683_v30  ;;  %5688 = vmatprep.subr.bf16.mxu1 %v7613_v14 }
 0x9a2   : > { %4573 = vrot.lane.b32.xlu1 %v7650_v17, %s6159_s17  ;;  %4585 = vrot.lane.b32.xlu0 %v7668_v40, %s6159_s17 }
 0x9a3   : > { %4075 = vmatmul.mubr.f32.gmra.mrb[26].mxu0 %v3862_v55 }
 0x9a4   : > { %4892 = vmatprep.mubr.msk.f32.mxu0 %vm3887_vm5, %v3841_v26  ;;  %5686 = vmatpush3.bf16.msra.mxu0 %v5683_v30  ;;  %v4428_v30 = vld [vmem:[%s7819_s4 + $0xe0] sm:$0xff] }
 0x9a5   : > { %5704 = vmatprep.subr.bf16.mxu0 %v7618_v48  ;;  %v5711_v0 = vpack.c.bf16 %v4429_v31, %v4428_v30 }
 0x9a6   : > { %4577 = vrot.lane.b32.xlu1 %v307_v1, %s6159_s17  ;;  %4589 = vrot.lane.b32.xlu0 %v311_v42, %s6159_s17 }
 0x9a7   : > { %4080 = vmatmul.mubr.f32.gmra.mrb[28].mxu0 %v3865_v62  ;;  %v3766_v29 = vpop.permute.xlu1 %3765 }
 0x9a8   : > { %4893 = vmatprep.mubr.msk.f32.mxu0 %vm3887_vm5, %v3849_v34 }
 0x9aa   : > { %4583 = vrot.lane.b32.xlu1 %v309_v54, %s6159_s17  ;;  %4587 = vrot.lane.b32.xlu0 %v7470_v57, %s6159_s17  ;;  %v3762_v57 = vpop.permute.xlu0 %3761  ;;  %v4328_v54 = vld [vmem:[%s7819_s4 + $0xb8] sm:$0xff] }
 0x9ab   : > { %4085 = vmatmul.mubr.f32.gmra.mrb[30].mxu0 %v3868_v32  ;;  %v3770_v3 = vpop.permute.xlu1 %3769 }
 0x9ae   : > { %4581 = vrot.lane.b32.xlu1 %v7456_v44, %s6159_s17  ;;  %v3774_v18 = vpop.permute.xlu0 %3773 }
 0x9af   : > { %v3778_v4 = vpop.permute.xlu1 %3777 }
 0x9b2   : > { %4591 = vrot.lane.b32.xlu1 %v7678_v46, %s6159_s17 }
 0xa3e   : > { %v5169_v56 = vpop.f32.mrb[8].mxu0 }
 0xa3f   : > { %v5170_v25 = vpop.f32.mrb[9].mxu0 }
 0xa40   : > { %v5171_v51 = vadd.f32 %v5170_v25, %v5169_v56 }
 0xa42   : > { %v3967_v35 = vadd.f32 %v5171_v51, %v3762_v57 }
 0xa4a   : > { %v5172_v63 = vpop.f32.mrb[10].mxu0 }
 0xa4b   : > { %v5173_v2 = vpop.f32.mrb[11].mxu0 }
 0xa4c   : > { %v5174_v20 = vadd.f32 %v5173_v2, %v5172_v63  ;;  %v5699_v63 = vpack.c.bf16 %v4328_v54, %v4327_v21 }
 0xa4e   : > { %v3972_v58 = vadd.f32 %v5174_v20, %v3766_v29  ;;  %v3782_v20 = vpop.permute.xlu0 %3781 }
 0xa51   : > { %v5175_v52 = vpop.f32.mrb[12].mxu0 }
 0xa52   : > { %v5176_v53 = vpop.f32.mrb[13].mxu0 }
 0xa53   : > { %v5177_v41 = vadd.f32 %v5176_v53, %v5175_v52 }
 0xa55   : > { %v3977_v15 = vadd.f32 %v5177_v41, %v3770_v3 }
 0xa56   : > { %v5178_v44 = vpop.f32.mrb[14].mxu0 }
 0xa57   : > { %v5179_v19 = vpop.f32.mrb[15].mxu0 }
 0xa58   : > { %v5180_v6 = vadd.f32 %v5179_v19, %v5178_v44 }
 0xa5a   : > { %v3982_v22 = vadd.f32 %v5180_v6, %v3774_v18 }
 0xa5d   : > { %v5181_v16 = vpop.f32.mrb[16].mxu0 }
 0xa5e   : > { %v5182_v55 = vpop.f32.mrb[17].mxu0 }
 0xa5f   : > { %v5183_v26 = vadd.f32 %v5182_v55, %v5181_v16 }
 0xa61   : > { %v5184_v62 = vpop.f32.mrb[18].mxu0  ;;  %v3987_v25 = vadd.f32 %v5183_v26, %v3778_v4 }
 0xa62   : > { %v5185_v34 = vpop.f32.mrb[19].mxu0 }
 0xa63   : > { %v7682_v32 = vadd.f32 %v5185_v34, %v5184_v62  ;;  %v4560_v62 = vpop.permute.xlu1 %4559  ;;  %v4562_v34 = vpop.permute.xlu0 %4561 }
 0xa65   : > { %v3992_v44 = vadd.f32 %v7682_v32, %v3782_v20  ;;  %v4595_v32 = vsel %vm4593_vm7, %v4560_v62, %v4562_v34 }
 0xa67   : > { %v7761_v57 = vpop.permute.xlu1 %6080  ;;  %v4566_v54 = vpop.permute.xlu0 %4565 }
 0xa6a   : > { %v4061_v47 = vpop.f32.mrb[20].mxu0 }
 0xa6b   : > { %v4062_v8 = vadd.f32 %v4061_v47, %v3967_v35  ;;  %v4063_v27 = vpop.f32.mrb[21].mxu0  ;;  %v6082_v35 = vunpack.i.l.bf16 %v7761_v57  ;;  %v6160_v47 = vmov 22  }
 0xa6c   : > { %6089 = vset.pattern.permute.xlu1 %v6160_v47  ;;  %6090 = vset.pattern.permute.xlu0 %v6160_v47 }
 0xa6d   : > { %v7684_v24 = vmax.f32 %v4062_v8, 0.0  ;;  %v7766_v29 = vsel %vm4593_vm7, %v6082_v35, %v4560_v62  ;;  %4528 = vperm.xlu1 %6089, %v7630_v49   ;;  %4532 = vperm.xlu0 %6090, %v7644_v7  }
 0xa6e   : > { %v4066_v10 = vpop.f32.mrb[22].mxu0 }
 0xa6f   : > { %v4067_v28 = vadd.f32 %v4066_v10, %v3972_v58  ;;  %v4068_v61 = vpop.f32.mrb[23].mxu0  ;;  %5378 = vmatprep.mubr.msk.f32.mxu1 %vm4104_vm6, %v7684_v24  ;;  %5403 = vmatprep.mubr.msk.f32.mxu0 %vm4104_vm6, %v7684_v24 }
 0xa71   : > { %v7702_v39 = vmax.f32 %v4067_v28, 0.0  ;;  %4536 = vperm.xlu1 %6089, %v7650_v17   ;;  %4544 = vperm.xlu0 %6090, %v7668_v40  }
 0xa72   : > { %v4071_v23 = vpop.f32.mrb[24].mxu0 }
 0xa73   : > { %v4072_v36 = vadd.f32 %v4071_v23, %v3977_v15  ;;  %v4073_v38 = vpop.f32.mrb[25].mxu0  ;;  %5379 = vmatmul.mubr.msk.f32.vlgmr.msra.gmra.mrb[12].mxu1 %vm4104_vm6, %v7702_v39  ;;  %5404 = vmatmul.mubr.msk.f32.vlgmr.msra.gmra.mrb[32].mxu0 %vm4104_vm6, %v7702_v39 }
 0xa74   : > { %5690 = vmatpush3.bf16.msra.mxu1 %v7613_v14  ;;  %5706 = vmatpush3.bf16.msra.mxu0 %v7618_v48  ;;  %v4430_v14 = vld [vmem:[%s7819_s4 + $0xf0] sm:$0xff]  ;;  %v4431_v48 = vld [vmem:[%s7819_s4 + $0xf8] sm:$0xff] }
 0xa75   : > { %v4092_v33 = vmax.f32 %v4072_v36, 0.0  ;;  %5692 = vmatprep.subr.bf16.mxu1 %v5691_v37  ;;  %5708 = vmatprep.subr.bf16.mxu0 %v5707_v5  ;;  %v5715_v2 = vpack.c.bf16 %v4431_v48, %v4430_v14  ;;  %v4572_v48 = vpop.permute.xlu0 %4571 }
 0xa76   : > { %v4076_v1 = vpop.f32.mrb[26].mxu0  ;;  %4540 = vperm.xlu1 %6089, %v7659_v50  }
 0xa77   : > { %v4077_v42 = vadd.f32 %v4076_v1, %v3982_v22  ;;  %v4078_v56 = vpop.f32.mrb[27].mxu0  ;;  %5381 = vmatprep.mubr.msk.f32.mxu1 %vm4104_vm6, %v4092_v33  ;;  %5406 = vmatprep.mubr.msk.f32.mxu0 %vm4104_vm6, %v4092_v33  ;;  %v4568_v1 = vpop.permute.xlu1 %4567 }
 0xa78   : > { %5694 = vmatpush3.bf16.msra.mxu1 %v5691_v37  ;;  %5710 = vmatpush3.bf16.msra.mxu0 %v5707_v5 }
 0xa79   : > { %v4093_v51 = vmax.f32 %v4077_v42, 0.0  ;;  %5696 = vmatprep.subr.bf16.mxu1 %v5695_v60  ;;  %5712 = vmatprep.subr.bf16.mxu0 %v5711_v0  ;;  %v6086_v56 = vpop.permute.xlu0 %6085 }
 0xa7a   : > { %v4081_v52 = vpop.f32.mrb[28].mxu0  ;;  %4548 = vperm.xlu1 %6089, %v7678_v46   ;;  %v6087_v20 = vunpack.i.l.bf16 %v6086_v56 }
 0xa7b   : > { %v4082_v53 = vadd.f32 %v4081_v52, %v3987_v25  ;;  %v4083_v41 = vpop.f32.mrb[29].mxu0  ;;  %5382 = vmatmul.mubr.msk.f32.gmra.mrb[14].mxu1 %vm4104_vm6, %v4093_v51  ;;  %5407 = vmatmul.mubr.msk.f32.gmra.mrb[34].mxu0 %vm4104_vm6, %v4093_v51  ;;  %v4574_v14 = vpop.permute.xlu1 %4573 }
 0xa7c   : > { %5698 = vmatpush3.bf16.msra.mxu1 %v5695_v60  ;;  %5714 = vmatpush3.bf16.msra.mxu0 %v5711_v0 }
 0xa7d   : > { %v4094_v19 = vmax.f32 %v4082_v53, 0.0  ;;  %5700 = vmatprep.subr.bf16.mxu1 %v5699_v63  ;;  %5716 = vmatprep.subr.bf16.mxu0 %v5715_v2  ;;  %v4580_v25 = vpop.permute.xlu0 %4579  ;;  %v4599_v53 = vsel %vm4593_vm7, %v4572_v48, %v4574_v14 }
 0xa7e   : > { %v4086_v6 = vpop.f32.mrb[30].mxu0 }
 0xa7f   : > { %v4087_v16 = vadd.f32 %v4086_v6, %v3992_v44  ;;  %v4088_v55 = vpop.f32.mrb[31].mxu0  ;;  %5384 = vmatprep.mubr.msk.f32.mxu1 %vm4104_vm6, %v4094_v19  ;;  %5409 = vmatprep.mubr.msk.f32.mxu0 %vm4104_vm6, %v4094_v19  ;;  %v4578_v42 = vpop.permute.xlu1 %4577  ;;  %v6088_v44 = vunpack.i.h.bf16 %v6086_v56 }
 0xa80   : > { %5702 = vmatpush3.bf16.msra.mxu1 %v5699_v63  ;;  %5718 = vmatpush3.bf16.msra.mxu0 %v5715_v2  ;;  %v4597_v2 = vsel %vm4593_vm7, %v4566_v54, %v4568_v1  ;;  %v4601_v6 = vsel %vm4593_vm7, %v4578_v42, %v4580_v25 }
 0xa81   : > { %v4095_v26 = vmax.f32 %v4087_v16, 0.0  ;;  %5719 = vmatprep.subr.bf16.mxu1 %v6158_v45  ;;  %v4586_v41 = vpop.permute.xlu0 %4585  ;;  %v4600_v55 = vsel %vm4593_vm7, %v6088_v44, %v4578_v42 }
 0xa83   : > { %5385 = vmatmul.mubr.msk.f32.gmra.mrb[16].mxu1 %vm4104_vm6, %v4095_v26  ;;  %5410 = vmatmul.mubr.msk.f32.gmra.mrb[36].mxu0 %vm4104_vm6, %v4095_v26  ;;  %v4584_v63 = vpop.permute.xlu1 %4583 }
 0xa84   : > { %5428 = vmatprep.mubr.msk.f32.mxu1 %vm4104_vm6, %v7684_v24  ;;  %5453 = vmatprep.mubr.msk.f32.mxu0 %vm4104_vm6, %v7684_v24  ;;  %v4603_v62 = vsel %vm4593_vm7, %v4584_v63, %v4586_v41 }
 0xa85   : > { %v4590_v16 = vpop.permute.xlu0 %4589 }
 0xa87   : > { %5429 = vmatmul.mubr.msk.f32.vlgmr.msra.gmra.mrb[18].mxu1 %vm4104_vm6, %v7702_v39  ;;  %5454 = vmatmul.mubr.msk.f32.vlgmr.msra.gmra.mrb[38].mxu0 %vm4104_vm6, %v7702_v39 }
 0xa88   : > { %5431 = vmatprep.mubr.msk.f32.mxu1 %vm4104_vm6, %v4092_v33  ;;  %5456 = vmatprep.mubr.msk.f32.mxu0 %vm4104_vm6, %v4092_v33 }
 0xa8b   : > { %5432 = vmatmul.mubr.msk.f32.gmra.mrb[20].mxu1 %vm4104_vm6, %v4093_v51  ;;  %5457 = vmatmul.mubr.msk.f32.gmra.mrb[40].mxu0 %vm4104_vm6, %v4093_v51  ;;  %v6083_v51 = vunpack.i.h.bf16 %v7761_v57  ;;  %v4588_v57 = vpop.permute.xlu0 %4587 }
 0xa8c   : > { %5434 = vmatprep.mubr.msk.f32.mxu1 %vm4104_vm6, %v4094_v19  ;;  %5459 = vmatprep.mubr.msk.f32.mxu0 %vm4104_vm6, %v4094_v19  ;;  %v4598_v19 = vsel %vm4593_vm7, %v6087_v20, %v4572_v48  ;;  %v4604_v35 = vsel %vm4593_vm7, %v4588_v57, %v4590_v16 }
 0xa8d   : > { %v4596_v52 = vsel %vm4593_vm7, %v6083_v51, %v4566_v54 }
 0xa8f   : > { %5435 = vmatmul.mubr.msk.f32.gmra.mrb[22].mxu1 %vm4104_vm6, %v4095_v26  ;;  %5460 = vmatmul.mubr.msk.f32.gmra.mrb[42].mxu0 %vm4104_vm6, %v4095_v26 }
 0xa90   : > { %4918 = vmatprep.mubr.msk.f32.mxu1 %vm4104_vm6, %v4595_v32 }
 0xb46   : > { %v5380_v8 = vpop.f32.mrb[12].mxu1  ;;  %v5405_v27 = vpop.f32.mrb[32].mxu0 }
 0xb47   : > { %v4189_v58 = vpop.f32.mrb[13].mxu1  ;;  %v4292_v24 = vpop.f32.mrb[33].mxu0 }
 0xb48   : > { %v5720_v59 = vpack.c.bf16 %v5380_v8, %v4189_v58  ;;  %v5729_v3 = vpack.c.bf16 %v5405_v27, %v4292_v24  ;;  %v4533_v58 = vpop.permute.xlu0 %4532 }
 0xb4a   : > { %5721 = vmatpush1.bf16.msra.mxu1 %v5720_v59 }
 0xb4b   : > { %5722 = vmatprep.subr.bf16.mxu1 %v6158_v45 }
 0xb4e   : > { %v5383_v49 = vpop.f32.mrb[14].mxu1  ;;  %v5408_v10 = vpop.f32.mrb[34].mxu0 }
 0xb4f   : > { %v4199_v7 = vpop.f32.mrb[15].mxu1  ;;  %v4302_v9 = vpop.f32.mrb[35].mxu0 }
 0xb50   : > { %v5723_v17 = vpack.c.bf16 %v5383_v49, %v4199_v7  ;;  %v5732_v43 = vpack.c.bf16 %v5408_v10, %v4302_v9 }
 0xb52   : > { %5724 = vmatpush1.bf16.msra.mxu1 %v5723_v17 }
 0xb53   : > { %5725 = vmatprep.subr.bf16.mxu1 %v6158_v45 }
 0xb56   : > { %v5386_v50 = vpop.f32.mrb[16].mxu1  ;;  %v5411_v40 = vpop.f32.mrb[36].mxu0 }
 0xb57   : > { %v4209_v46 = vpop.f32.mrb[17].mxu1  ;;  %v4312_v13 = vpop.f32.mrb[37].mxu0 }
 0xb58   : > { %v5726_v28 = vpack.c.bf16 %v5386_v50, %v4209_v46  ;;  %v5735_v61 = vpack.c.bf16 %v5411_v40, %v4312_v13  ;;  %v4545_v46 = vpop.permute.xlu0 %4544 }
 0xb5a   : > { %v5430_v15 = vpop.f32.mrb[18].mxu1  ;;  %v5455_v39 = vpop.f32.mrb[38].mxu0  ;;  %5727 = vmatpush1.bf16.msra.mxu1 %v5726_v28 }
 0xb5b   : > { %v4395_v37 = vpop.f32.mrb[19].mxu1  ;;  %v4498_v5 = vpop.f32.mrb[39].mxu0  ;;  %5728 = vmatprep.subr.bf16.mxu1 %v6158_v45 }
 0xb5c   : > { %v5738_v12 = vpack.c.bf16 %v5430_v15, %v4395_v37  ;;  %v5747_v18 = vpack.c.bf16 %v5455_v39, %v4498_v5 }
 0xb5e   : > { %v5433_v23 = vpop.f32.mrb[20].mxu1  ;;  %v5458_v11 = vpop.f32.mrb[40].mxu0  ;;  %5730 = vmatpush1.bf16.msra.mxu1 %v5729_v3 }
 0xb5f   : > { %v4405_v30 = vpop.f32.mrb[21].mxu1  ;;  %v4508_v31 = vpop.f32.mrb[41].mxu0  ;;  %5731 = vmatprep.subr.bf16.mxu1 %v6158_v45 }
 0xb60   : > { %v5741_v36 = vpack.c.bf16 %v5433_v23, %v4405_v30  ;;  %v5750_v38 = vpack.c.bf16 %v5458_v11, %v4508_v31 }
 0xb62   : > { %v5436_v22 = vpop.f32.mrb[22].mxu1  ;;  %v5461_v33 = vpop.f32.mrb[42].mxu0  ;;  %5733 = vmatpush1.bf16.msra.mxu1 %v5732_v43 }
 0xb63   : > { %v4415_v60 = vpop.f32.mrb[23].mxu1  ;;  %v4518_v0 = vpop.f32.mrb[43].mxu0  ;;  %5734 = vmatprep.subr.bf16.mxu1 %v6158_v45 }
 0xb64   : > { %v5744_v21 = vpack.c.bf16 %v5436_v22, %v4415_v60  ;;  %v5753_v4 = vpack.c.bf16 %v5461_v33, %v4518_v0 }
 0xb66   : > { %5736 = vmatpush1.bf16.msra.mxu1 %v5735_v61 }
 0xb67   : > { %5737 = vmatprep.subr.bf16.mxu1 %v6158_v45 }
 0xb6a   : > { %5739 = vmatpush1.bf16.msra.mxu1 %v5738_v12 }
 0xb6b   : > { %5740 = vmatprep.subr.bf16.mxu1 %v6158_v45 }
 0xb6e   : > { %5742 = vmatpush1.bf16.msra.mxu1 %v5741_v36 }
 0xb6f   : > { %5743 = vmatprep.subr.bf16.mxu1 %v6158_v45 }
 0xb72   : > { %5745 = vmatpush1.bf16.msra.mxu1 %v5744_v21 }
 0xb73   : > { %5746 = vmatprep.subr.bf16.mxu1 %v6158_v45 }
 0xb76   : > { %5748 = vmatpush1.bf16.msra.mxu1 %v5747_v18 }
 0xb77   : > { %5749 = vmatprep.subr.bf16.mxu1 %v6158_v45 }
 0xb7a   : > { %5751 = vmatpush1.bf16.msra.mxu1 %v5750_v38 }
 0xb7b   : > { %5752 = vmatprep.subr.bf16.mxu1 %v6158_v45  ;;  %v4582_v45 = vpop.permute.xlu1 %4581 }
 0xb7c   : > { %v4602_v32 = vsel %vm4593_vm7, %v4582_v45, %v4584_v63 }
 0xb7e   : > { %5754 = vmatpush1.bf16.msra.mxu1 %v5753_v4 }
 0xb7f   : > { %v4592_v26 = vpop.permute.xlu1 %4591 }
 0xb80   : > { %v4605_v34 = vsel %vm4593_vm7, %v4590_v16, %v4592_v26 }
 0xb81   : > { %4689 = vmatmul.mubr.f32.vlgmr.msra.gmra.mrb[24].mxu1 %v7766_v29 }
 0xb82   : > { %4919 = vmatprep.mubr.msk.f32.mxu1 %vm4104_vm6, %v4597_v2 }
 0xb83   : > { %v4529_v29 = vpop.permute.xlu1 %4528 }
 0xb85   : > { %4694 = vmatmul.mubr.f32.gmra.mrb[26].mxu1 %v4596_v52 }
 0xb86   : > { %4920 = vmatprep.mubr.msk.f32.mxu1 %vm4104_vm6, %v4599_v53 }
 0xb87   : > { %v4537_v49 = vpop.permute.xlu1 %4536 }
 0xb89   : > { %4699 = vmatmul.mubr.f32.gmra.mrb[28].mxu1 %v4598_v19 }
 0xb8a   : > { %4921 = vmatprep.mubr.msk.f32.mxu1 %vm4104_vm6, %v4601_v6 }
 0xb8b   : > { %v4541_v17 = vpop.permute.xlu1 %4540 }
 0xb8d   : > { %4704 = vmatmul.mubr.f32.gmra.mrb[30].mxu1 %v4600_v55 }
 0xb8e   : > { %4922 = vmatprep.mubr.msk.f32.mxu1 %vm4104_vm6, %v4603_v62 }
 0xb8f   : > { %v4549_v15 = vpop.permute.xlu1 %4548 }
 0xb91   : > { %4709 = vmatmul.mubr.f32.gmra.mrb[32].mxu1 %v4602_v32 }
 0xb92   : > { %4923 = vmatprep.mubr.msk.f32.mxu1 %vm4104_vm6, %v4605_v34 }
 0xb95   : > { %4714 = vmatmul.mubr.f32.gmra.mrb[34].mxu1 %v4604_v35 }
 0xc54   : > { %v4690_v47 = vpop.f32.mrb[24].mxu1 }
 0xc55   : > { %v4691_v8 = vadd.f32 %v4690_v47, %v4529_v29  ;;  %v4692_v27 = vpop.f32.mrb[25].mxu1 }
 0xc57   : > { %4719 = vst.msk [vmem:[%s275_s13] sm:$0xff] %vm377_vm2, %v4691_v8 }
 0xc58   : > { %v4695_v24 = vpop.f32.mrb[26].mxu1 }
 0xc59   : > { %v4696_v59 = vadd.f32 %v4695_v24, %v4533_v58  ;;  %v4697_v3 = vpop.f32.mrb[27].mxu1 }
 0xc5b   : > { %4720 = vst.msk [vmem:[%s275_s13 + $0x8] sm:$0xff] %vm377_vm2, %v4696_v59 }
 0xc5c   : > { %v4700_v10 = vpop.f32.mrb[28].mxu1 }
 0xc5d   : > { %v4701_v7 = vadd.f32 %v4700_v10, %v4537_v49  ;;  %v4702_v9 = vpop.f32.mrb[29].mxu1 }
 0xc5f   : > { %4721 = vst.msk [vmem:[%s275_s13 + $0x10] sm:$0xff] %vm377_vm2, %v4701_v7 }
 0xc60   : > { %v4705_v43 = vpop.f32.mrb[30].mxu1 }
 0xc61   : > { %v4706_v50 = vadd.f32 %v4705_v43, %v4541_v17  ;;  %v4707_v40 = vpop.f32.mrb[31].mxu1 }
 0xc63   : > { %4722 = vst.msk [vmem:[%s275_s13 + $0x18] sm:$0xff] %vm377_vm2, %v4706_v50 }
 0xc64   : > { %v4710_v13 = vpop.f32.mrb[32].mxu1 }
 0xc65   : > { %v4712_v28 = vpop.f32.mrb[33].mxu1  ;;  %v4711_v61 = vadd.f32 %v4710_v13, %v4545_v46 }
 0xc67   : > { %4723 = vst.msk [vmem:[%s275_s13 + $0x20] sm:$0xff] %vm377_vm2, %v4711_v61 }
 0xc68   : > { %v4715_v39 = vpop.f32.mrb[34].mxu1 }
 0xc69   : > { %v4716_v37 = vadd.f32 %v4715_v39, %v4549_v15  ;;  %v4717_v5 = vpop.f32.mrb[35].mxu1 }
 0xc6b   : > { %4724 = vst.msk [vmem:[%s275_s13 + $0x28] sm:$0xff] %vm377_vm2, %v4716_v37 }
 0xc6c PF: > { %s17_s24 = sadd.s32 1, %s6104_s24  }
 0xc6d   : > { %p14_p4 = scmp.ge.s32.totalorder %s17_s24, 4  }
 0xc6f   :  { %16 = sbr.rel (!%p14_p4) target bundleno = 1 (0x1), region = 79 }

</bundles_post_ra>
